<compile_context>
chip_gen: v7x
topology: tpu7x:2x2x1
jax: 0.10.0
libtpu: 0.0.40
codegen_flags: <defaults>
</compile_context>

<pallas_src>
import functools

import jax
import jax.numpy as jnp
from jax.experimental import pallas as pl
from jax.experimental.pallas import tpu as pltpu


def layer_dims(num_specs, latent_dim):
    """Feature widths implied by the module (encoder then decoder)."""
    return (num_specs, 32, 16, 8, latent_dim, 8, 16, 32, num_specs)


def _make_kernel(dims, tb, chunk):
    n_layers = len(dims) - 1
    tanh_layers = (3, n_layers - 1)  # encoder head and decoder head use tanh
    n_chunks = tb // chunk

    def kernel(x_ref, w_ref, b_ref, o_ref):
        # x_ref : (num_specs, TB)       f32   activations, batch on lanes
        # w_ref : (L, DMAX, DMAX)       bf16  w_ref[l, :out_l, :in_l] = W_l
        # b_ref : (L, DMAX, CHUNK)      f32   bias pre-broadcast across lanes
        # o_ref : (num_specs, TB)       f32
        #
        # Static (fully unrolled) loop over lane sub-chunks: intermediates are
        # bounded to [32, CHUNK] (<= 16 vregs) so nothing spills, while the
        # large TB tile amortizes the per-grid-step overhead.
        for c in range(n_chunks):
            lo = c * chunk
            h = x_ref[:, lo:lo + chunk]                       # (num_specs, CHUNK) f32
            for l in range(n_layers):                         # static unroll
                din, dout = dims[l], dims[l + 1]
                w = w_ref[l, :dout, :din]                     # (dout, din) bf16, resident
                b = b_ref[l, :dout, :]                        # (dout, CHUNK) f32, resident
                y = jnp.dot(w, h.astype(jnp.bfloat16),
                            preferred_element_type=jnp.float32) + b
                h = jnp.tanh(y) if l in tanh_layers else jnp.maximum(y, 0.0)
            o_ref[:, lo:lo + chunk] = h.astype(o_ref.dtype)

    return kernel


@functools.partial(jax.jit, static_argnames=("dims", "tb", "chunk"))
def autoencoder_forward_fm(x_fm, w_slab, b_slab, *, dims, tb=2048, chunk=512):
    """Feature-major forward: x_fm [num_specs, B] f32 -> [num_specs, B] f32.

    No relayouts in this path — keep data feature-major in the surrounding
    pipeline for best end-to-end performance.
    """
    num_specs, B = x_fm.shape
    n_layers = len(dims) - 1
    dmax = max(dims)
    assert num_specs == dims[0] == dims[-1]
    assert tb % chunk == 0 and chunk % 128 == 0
    assert w_slab.shape == (n_layers, dmax, dmax)
    assert b_slab.shape == (n_layers, dmax, chunk)

    n_tiles = pl.cdiv(B, tb)
    b_pad = n_tiles * tb
    if b_pad != B:
        x_fm = jnp.pad(x_fm, ((0, 0), (0, b_pad - B)))

    out = pl.pallas_call(
        _make_kernel(dims, tb, chunk),
        out_shape=jax.ShapeDtypeStruct((num_specs, b_pad), jnp.float32),
        grid=(n_tiles,),
        in_specs=[
            pl.BlockSpec((num_specs, tb), lambda i: (0, i)),      # x batch tile
            pl.BlockSpec(w_slab.shape, lambda i: (0, 0, 0)),      # resident weights
            pl.BlockSpec(b_slab.shape, lambda i: (0, 0, 0)),      # resident biases
        ],
        out_specs=pl.BlockSpec((num_specs, tb), lambda i: (0, i)),
        compiler_params=pltpu.CompilerParams(
            dimension_semantics=("parallel",),   # shard batch tiles across TCs
        ),
    )(x_fm, w_slab, b_slab)

    if b_pad != B:
        out = out[:, :B]
    return out


def autoencoder_forward(x, w_slab, b_slab, *, dims, tb=2048, chunk=512):
    """Compatibility shim for the PyTorch [B, num_specs] layout.

    Note: the two transposes are separate XLA relayout ops (extra HBM
    passes); prefer `autoencoder_forward_fm` when the pipeline can stay
    feature-major.
    """
    return autoencoder_forward_fm(x.T, w_slab, b_slab,
                                  dims=dims, tb=tb, chunk=chunk).T


# ---------------------------------------------------------------------------
# Parameter construction / packing and pure-JAX references
# ---------------------------------------------------------------------------
def init_params(key, dims):
    """Deterministic nn.Linear-style init: U(-1/sqrt(fan_in), 1/sqrt(fan_in)).
    Weights are PyTorch-native [out, in]; biases are [out]."""
    params = []
    for l in range(len(dims) - 1):
        fan_in, fan_out = dims[l], dims[l + 1]
        key, kw, kb = jax.random.split(key, 3)
        bound = 1.0 / float(fan_in) ** 0.5
        W = jax.random.uniform(kw, (fan_out, fan_in), jnp.float32, -bound, bound)
        b = jax.random.uniform(kb, (fan_out,), jnp.float32, -bound, bound)
        params += [W, b]
    return params


def pack_params(params, dims, chunk):
    """Pack the 8 (W, b) pairs into one bf16 weight slab and one f32 bias slab.

    Weights are rounded to bf16 once here (not per grid step in the kernel);
    biases are pre-broadcast to the kernel chunk width so the in-kernel bias
    add is a plain full-width VALU add with no lane-broadcast.
    """
    n_layers = len(dims) - 1
    dmax = max(dims)
    w_slab = jnp.zeros((n_layers, dmax, dmax), jnp.bfloat16)
    b_slab = jnp.zeros((n_layers, dmax, chunk), jnp.float32)
    for l in range(n_layers):
        W, b = params[2 * l], params[2 * l + 1]
        dout, din = W.shape
        w_slab = w_slab.at[l, :dout, :din].set(W.astype(jnp.bfloat16))
        b_slab = b_slab.at[l, :dout, :].set(
            jnp.broadcast_to(b[:, None], (dout, chunk)))
    return w_slab, b_slab


def reference_forward_f32(x, params, dims):
    """Pure-f32 JAX equivalent of the PyTorch forward ([B, num_specs] layout)."""
    n_layers = len(dims) - 1
    h = x
    for l in range(n_layers):
        W, b = params[2 * l], params[2 * l + 1]
        y = h @ W.T + b
        h = jnp.tanh(y) if l in (3, n_layers - 1) else jnp.maximum(y, 0.0)
    return h


def reference_forward_mixed(x, params, dims):
    """Same bf16-operand / f32-accumulate matmul scheme the kernel uses."""
    n_layers = len(dims) - 1
    h = x
    for l in range(n_layers):
        W, b = params[2 * l], params[2 * l + 1]
        y = jnp.dot(h.astype(jnp.bfloat16), W.astype(jnp.bfloat16).T,
                    preferred_element_type=jnp.float32) + b
        h = jnp.tanh(y) if l in (3, n_layers - 1) else jnp.maximum(y, 0.0)
    return h


if __name__ == "__main__":
    # Shapes implied by the module: 5 chemical species, latent dim 3.
    num_specs, latent_dim = 5, 3
    dims = layer_dims(num_specs, latent_dim)

    tb, chunk = 2048, 512
    batch = 4 * tb          # 8192 samples -> 4 even grid tiles (both v7x TCs busy)

    key = jax.random.PRNGKey(0)
    key, kx = jax.random.split(key)
    # Feature-major activations end-to-end: [num_specs, B].
    x_fm = jax.random.uniform(kx, (num_specs, batch), jnp.float32)

    params = init_params(key, dims)
    w_slab, b_slab = pack_params(params, dims, chunk)

    out_fm = autoencoder_forward_fm(x_fm, w_slab, b_slab,
                                    dims=dims, tb=tb, chunk=chunk)
    out_fm = jax.block_until_ready(out_fm)

    assert out_fm.shape == (num_specs, batch)
    assert bool(jnp.all(jnp.isfinite(out_fm)))

    # Checks performed in the PyTorch layout (transpose is test-only plumbing).
    out = out_fm.T
    x = x_fm.T

    # Tight structural check against a JAX reference that uses the same
    # bf16-operand / f32-accumulate matmuls as the kernel.
    ref_mixed = reference_forward_mixed(x, params, dims)
    assert jnp.allclose(out, ref_mixed, atol=1e-2, rtol=1e-2), \
        float(jnp.max(jnp.abs(out - ref_mixed)))

    # Semantics check against the pure-f32 PyTorch-equivalent forward
    # (tolerance covers the bf16 MXU-operand rounding).
    ref_f32 = reference_forward_f32(x, params, dims)
    assert jnp.allclose(out, ref_f32, atol=6e-2, rtol=6e-2), \
        float(jnp.max(jnp.abs(out - ref_f32)))

    print("KERNEL_OK")
</pallas_src>

<mosaic_0001>
module attributes {stable_mosaic.version = 11 : i64} {
  func.func @kernel(%arg0: i32, %arg1: memref<5x2048xf32, #tpu.memory_space<vmem>>, %arg2: memref<8x32x32xbf16, #tpu.memory_space<vmem>>, %arg3: memref<8x32x512xf32, #tpu.memory_space<vmem>>, %arg4: memref<5x2048xf32, #tpu.memory_space<vmem>>) attributes {dimension_semantics = [#tpu.dimension_semantics<parallel>], iteration_bounds = array<i64: 4>, scalar_prefetch = 0 : i64, scratch_operands = 0 : i64, tpu.core_type = #tpu.core_type<tc>, window_params = [{transform_indices = @transform_0, window_bounds = array<i64: 5, 2048>}, {pipeline_mode = #tpu.pipeline_mode<synchronous>, transform_indices = @transform_1, window_bounds = array<i64: 8, 32, 32>}, {pipeline_mode = #tpu.pipeline_mode<synchronous>, transform_indices = @transform_2, window_bounds = array<i64: 8, 32, 512>}, {transform_indices = @transform_3, window_bounds = array<i64: 5, 2048>}]} {
    %c0 = arith.constant 0 : index
    %c0_0 = arith.constant 0 : index
    %0 = vector.load %arg1[%c0, %c0_0] : memref<5x2048xf32, #tpu.memory_space<vmem>>, vector<5x512xf32>
    %c0_1 = arith.constant 0 : index
    %c0_2 = arith.constant 0 : index
    %c0_3 = arith.constant 0 : index
    %1 = vector.load %arg2[%c0_1, %c0_2, %c0_3] : memref<8x32x32xbf16, #tpu.memory_space<vmem>>, vector<1x32x5xbf16>
    %2 = vector.shape_cast %1 : vector<1x32x5xbf16> to vector<32x5xbf16>
    %c0_4 = arith.constant 0 : index
    %c0_5 = arith.constant 0 : index
    %c0_6 = arith.constant 0 : index
    %3 = vector.load %arg3[%c0_4, %c0_5, %c0_6] : memref<8x32x512xf32, #tpu.memory_space<vmem>>, vector<1x32x512xf32>
    %4 = vector.shape_cast %3 : vector<1x32x512xf32> to vector<32x512xf32>
    %5 = arith.truncf %0 : vector<5x512xf32> to vector<5x512xbf16>
    %cst = arith.constant dense<0.000000e+00> : vector<32x512xf32>
    %6 = tpu.matmul %2, %5, %cst {dimension_numbers = #tpu.dot_dimension_numbers<[1], [0], [0], [1], [0, 0, 1, 1], [], []>} : vector<32x5xbf16>, vector<5x512xbf16>, vector<32x512xf32> -> vector<32x512xf32>
    %7 = arith.addf %6, %4 : vector<32x512xf32>
    %cst_7 = arith.constant 0.000000e+00 : f32
    %8 = vector.broadcast %cst_7 : f32 to vector<32x512xf32>
    %9 = arith.maximumf %7, %8 : vector<32x512xf32>
    %c1 = arith.constant 1 : index
    %c0_8 = arith.constant 0 : index
    %c0_9 = arith.constant 0 : index
    %10 = vector.load %arg2[%c1, %c0_8, %c0_9] : memref<8x32x32xbf16, #tpu.memory_space<vmem>>, vector<1x16x32xbf16>
    %11 = vector.shape_cast %10 : vector<1x16x32xbf16> to vector<16x32xbf16>
    %c1_10 = arith.constant 1 : index
    %c0_11 = arith.constant 0 : index
    %c0_12 = arith.constant 0 : index
    %12 = vector.load %arg3[%c1_10, %c0_11, %c0_12] : memref<8x32x512xf32, #tpu.memory_space<vmem>>, vector<1x16x512xf32>
    %13 = vector.shape_cast %12 : vector<1x16x512xf32> to vector<16x512xf32>
    %14 = arith.truncf %9 : vector<32x512xf32> to vector<32x512xbf16>
    %cst_13 = arith.constant dense<0.000000e+00> : vector<16x512xf32>
    %15 = tpu.matmul %11, %14, %cst_13 {dimension_numbers = #tpu.dot_dimension_numbers<[1], [0], [0], [1], [0, 0, 1, 1], [], []>} : vector<16x32xbf16>, vector<32x512xbf16>, vector<16x512xf32> -> vector<16x512xf32>
    %16 = arith.addf %15, %13 : vector<16x512xf32>
    %cst_14 = arith.constant 0.000000e+00 : f32
    %17 = vector.broadcast %cst_14 : f32 to vector<16x512xf32>
    %18 = arith.maximumf %16, %17 : vector<16x512xf32>
    %c2 = arith.constant 2 : index
    %c0_15 = arith.constant 0 : index
    %c0_16 = arith.constant 0 : index
    %19 = vector.load %arg2[%c2, %c0_15, %c0_16] : memref<8x32x32xbf16, #tpu.memory_space<vmem>>, vector<1x8x16xbf16>
    %20 = vector.shape_cast %19 : vector<1x8x16xbf16> to vector<8x16xbf16>
    %c2_17 = arith.constant 2 : index
    %c0_18 = arith.constant 0 : index
    %c0_19 = arith.constant 0 : index
    %21 = vector.load %arg3[%c2_17, %c0_18, %c0_19] : memref<8x32x512xf32, #tpu.memory_space<vmem>>, vector<1x8x512xf32>
    %22 = vector.shape_cast %21 : vector<1x8x512xf32> to vector<8x512xf32>
    %23 = arith.truncf %18 : vector<16x512xf32> to vector<16x512xbf16>
    %cst_20 = arith.constant dense<0.000000e+00> : vector<8x512xf32>
    %24 = tpu.matmul %20, %23, %cst_20 {dimension_numbers = #tpu.dot_dimension_numbers<[1], [0], [0], [1], [0, 0, 1, 1], [], []>} : vector<8x16xbf16>, vector<16x512xbf16>, vector<8x512xf32> -> vector<8x512xf32>
    %25 = arith.addf %24, %22 : vector<8x512xf32>
    %cst_21 = arith.constant 0.000000e+00 : f32
    %26 = vector.broadcast %cst_21 : f32 to vector<8x512xf32>
    %27 = arith.maximumf %25, %26 : vector<8x512xf32>
    %c3 = arith.constant 3 : index
    %c0_22 = arith.constant 0 : index
    %c0_23 = arith.constant 0 : index
    %28 = vector.load %arg2[%c3, %c0_22, %c0_23] : memref<8x32x32xbf16, #tpu.memory_space<vmem>>, vector<1x3x8xbf16>
    %29 = vector.shape_cast %28 : vector<1x3x8xbf16> to vector<3x8xbf16>
    %c3_24 = arith.constant 3 : index
    %c0_25 = arith.constant 0 : index
    %c0_26 = arith.constant 0 : index
    %30 = vector.load %arg3[%c3_24, %c0_25, %c0_26] : memref<8x32x512xf32, #tpu.memory_space<vmem>>, vector<1x3x512xf32>
    %31 = vector.shape_cast %30 : vector<1x3x512xf32> to vector<3x512xf32>
    %32 = arith.truncf %27 : vector<8x512xf32> to vector<8x512xbf16>
    %cst_27 = arith.constant dense<0.000000e+00> : vector<3x512xf32>
    %33 = tpu.matmul %29, %32, %cst_27 {dimension_numbers = #tpu.dot_dimension_numbers<[1], [0], [0], [1], [0, 0, 1, 1], [], []>} : vector<3x8xbf16>, vector<8x512xbf16>, vector<3x512xf32> -> vector<3x512xf32>
    %34 = arith.addf %33, %31 : vector<3x512xf32>
    %35 = math.tanh %34 : vector<3x512xf32>
    %c4 = arith.constant 4 : index
    %c0_28 = arith.constant 0 : index
    %c0_29 = arith.constant 0 : index
    %36 = vector.load %arg2[%c4, %c0_28, %c0_29] : memref<8x32x32xbf16, #tpu.memory_space<vmem>>, vector<1x8x3xbf16>
    %37 = vector.shape_cast %36 : vector<1x8x3xbf16> to vector<8x3xbf16>
    %c4_30 = arith.constant 4 : index
    %c0_31 = arith.constant 0 : index
    %c0_32 = arith.constant 0 : index
    %38 = vector.load %arg3[%c4_30, %c0_31, %c0_32] : memref<8x32x512xf32, #tpu.memory_space<vmem>>, vector<1x8x512xf32>
    %39 = vector.shape_cast %38 : vector<1x8x512xf32> to vector<8x512xf32>
    %40 = arith.truncf %35 : vector<3x512xf32> to vector<3x512xbf16>
    %cst_33 = arith.constant dense<0.000000e+00> : vector<8x512xf32>
    %41 = tpu.matmul %37, %40, %cst_33 {dimension_numbers = #tpu.dot_dimension_numbers<[1], [0], [0], [1], [0, 0, 1, 1], [], []>} : vector<8x3xbf16>, vector<3x512xbf16>, vector<8x512xf32> -> vector<8x512xf32>
    %42 = arith.addf %41, %39 : vector<8x512xf32>
    %cst_34 = arith.constant 0.000000e+00 : f32
    %43 = vector.broadcast %cst_34 : f32 to vector<8x512xf32>
    %44 = arith.maximumf %42, %43 : vector<8x512xf32>
    %c5 = arith.constant 5 : index
    %c0_35 = arith.constant 0 : index
    %c0_36 = arith.constant 0 : index
    %45 = vector.load %arg2[%c5, %c0_35, %c0_36] : memref<8x32x32xbf16, #tpu.memory_space<vmem>>, vector<1x16x8xbf16>
    %46 = vector.shape_cast %45 : vector<1x16x8xbf16> to vector<16x8xbf16>
    %c5_37 = arith.constant 5 : index
    %c0_38 = arith.constant 0 : index
    %c0_39 = arith.constant 0 : index
    %47 = vector.load %arg3[%c5_37, %c0_38, %c0_39] : memref<8x32x512xf32, #tpu.memory_space<vmem>>, vector<1x16x512xf32>
    %48 = vector.shape_cast %47 : vector<1x16x512xf32> to vector<16x512xf32>
    %49 = arith.truncf %44 : vector<8x512xf32> to vector<8x512xbf16>
    %cst_40 = arith.constant dense<0.000000e+00> : vector<16x512xf32>
    %50 = tpu.matmul %46, %49, %cst_40 {dimension_numbers = #tpu.dot_dimension_numbers<[1], [0], [0], [1], [0, 0, 1, 1], [], []>} : vector<16x8xbf16>, vector<8x512xbf16>, vector<16x512xf32> -> vector<16x512xf32>
    %51 = arith.addf %50, %48 : vector<16x512xf32>
    %cst_41 = arith.constant 0.000000e+00 : f32
    %52 = vector.broadcast %cst_41 : f32 to vector<16x512xf32>
    %53 = arith.maximumf %51, %52 : vector<16x512xf32>
    %c6 = arith.constant 6 : index
    %c0_42 = arith.constant 0 : index
    %c0_43 = arith.constant 0 : index
    %54 = vector.load %arg2[%c6, %c0_42, %c0_43] : memref<8x32x32xbf16, #tpu.memory_space<vmem>>, vector<1x32x16xbf16>
    %55 = vector.shape_cast %54 : vector<1x32x16xbf16> to vector<32x16xbf16>
    %c6_44 = arith.constant 6 : index
    %c0_45 = arith.constant 0 : index
    %c0_46 = arith.constant 0 : index
    %56 = vector.load %arg3[%c6_44, %c0_45, %c0_46] : memref<8x32x512xf32, #tpu.memory_space<vmem>>, vector<1x32x512xf32>
    %57 = vector.shape_cast %56 : vector<1x32x512xf32> to vector<32x512xf32>
    %58 = arith.truncf %53 : vector<16x512xf32> to vector<16x512xbf16>
    %cst_47 = arith.constant dense<0.000000e+00> : vector<32x512xf32>
    %59 = tpu.matmul %55, %58, %cst_47 {dimension_numbers = #tpu.dot_dimension_numbers<[1], [0], [0], [1], [0, 0, 1, 1], [], []>} : vector<32x16xbf16>, vector<16x512xbf16>, vector<32x512xf32> -> vector<32x512xf32>
    %60 = arith.addf %59, %57 : vector<32x512xf32>
    %cst_48 = arith.constant 0.000000e+00 : f32
    %61 = vector.broadcast %cst_48 : f32 to vector<32x512xf32>
    %62 = arith.maximumf %60, %61 : vector<32x512xf32>
    %c7 = arith.constant 7 : index
    %c0_49 = arith.constant 0 : index
    %c0_50 = arith.constant 0 : index
    %63 = vector.load %arg2[%c7, %c0_49, %c0_50] : memref<8x32x32xbf16, #tpu.memory_space<vmem>>, vector<1x5x32xbf16>
    %64 = vector.shape_cast %63 : vector<1x5x32xbf16> to vector<5x32xbf16>
    %c7_51 = arith.constant 7 : index
    %c0_52 = arith.constant 0 : index
    %c0_53 = arith.constant 0 : index
    %65 = vector.load %arg3[%c7_51, %c0_52, %c0_53] : memref<8x32x512xf32, #tpu.memory_space<vmem>>, vector<1x5x512xf32>
    %66 = vector.shape_cast %65 : vector<1x5x512xf32> to vector<5x512xf32>
    %67 = arith.truncf %62 : vector<32x512xf32> to vector<32x512xbf16>
    %cst_54 = arith.constant dense<0.000000e+00> : vector<5x512xf32>
    %68 = tpu.matmul %64, %67, %cst_54 {dimension_numbers = #tpu.dot_dimension_numbers<[1], [0], [0], [1], [0, 0, 1, 1], [], []>} : vector<5x32xbf16>, vector<32x512xbf16>, vector<5x512xf32> -> vector<5x512xf32>
    %69 = arith.addf %68, %66 : vector<5x512xf32>
    %70 = math.tanh %69 : vector<5x512xf32>
    %c0_55 = arith.constant 0 : index
    %c0_56 = arith.constant 0 : index
    %71 = vector.load %arg4[%c0_55, %c0_56] : memref<5x2048xf32, #tpu.memory_space<vmem>>, vector<5x512xf32>
    tpu.vector_store %arg4[%c0_55, %c0_56], %70 {strides = array<i32>} : memref<5x2048xf32, #tpu.memory_space<vmem>>, vector<5x512xf32>,
    %c0_57 = arith.constant 0 : index
    %c512 = arith.constant 512 : index
    %72 = vector.load %arg1[%c0_57, %c512] : memref<5x2048xf32, #tpu.memory_space<vmem>>, vector<5x512xf32>
    %c0_58 = arith.constant 0 : index
    %c0_59 = arith.constant 0 : index
    %c0_60 = arith.constant 0 : index
    %73 = vector.load %arg2[%c0_58, %c0_59, %c0_60] : memref<8x32x32xbf16, #tpu.memory_space<vmem>>, vector<1x32x5xbf16>
    %74 = vector.shape_cast %73 : vector<1x32x5xbf16> to vector<32x5xbf16>
    %c0_61 = arith.constant 0 : index
    %c0_62 = arith.constant 0 : index
    %c0_63 = arith.constant 0 : index
    %75 = vector.load %arg3[%c0_61, %c0_62, %c0_63] : memref<8x32x512xf32, #tpu.memory_space<vmem>>, vector<1x32x512xf32>
    %76 = vector.shape_cast %75 : vector<1x32x512xf32> to vector<32x512xf32>
    %77 = arith.truncf %72 : vector<5x512xf32> to vector<5x512xbf16>
    %cst_64 = arith.constant dense<0.000000e+00> : vector<32x512xf32>
    %78 = tpu.matmul %74, %77, %cst_64 {dimension_numbers = #tpu.dot_dimension_numbers<[1], [0], [0], [1], [0, 0, 1, 1], [], []>} : vector<32x5xbf16>, vector<5x512xbf16>, vector<32x512xf32> -> vector<32x512xf32>
    %79 = arith.addf %78, %76 : vector<32x512xf32>
    %cst_65 = arith.constant 0.000000e+00 : f32
    %80 = vector.broadcast %cst_65 : f32 to vector<32x512xf32>
    %81 = arith.maximumf %79, %80 : vector<32x512xf32>
    %c1_66 = arith.constant 1 : index
    %c0_67 = arith.constant 0 : index
    %c0_68 = arith.constant 0 : index
    %82 = vector.load %arg2[%c1_66, %c0_67, %c0_68] : memref<8x32x32xbf16, #tpu.memory_space<vmem>>, vector<1x16x32xbf16>
    %83 = vector.shape_cast %82 : vector<1x16x32xbf16> to vector<16x32xbf16>
    %c1_69 = arith.constant 1 : index
    %c0_70 = arith.constant 0 : index
    %c0_71 = arith.constant 0 : index
    %84 = vector.load %arg3[%c1_69, %c0_70, %c0_71] : memref<8x32x512xf32, #tpu.memory_space<vmem>>, vector<1x16x512xf32>
    %85 = vector.shape_cast %84 : vector<1x16x512xf32> to vector<16x512xf32>
    %86 = arith.truncf %81 : vector<32x512xf32> to vector<32x512xbf16>
    %cst_72 = arith.constant dense<0.000000e+00> : vector<16x512xf32>
    %87 = tpu.matmul %83, %86, %cst_72 {dimension_numbers = #tpu.dot_dimension_numbers<[1], [0], [0], [1], [0, 0, 1, 1], [], []>} : vector<16x32xbf16>, vector<32x512xbf16>, vector<16x512xf32> -> vector<16x512xf32>
    %88 = arith.addf %87, %85 : vector<16x512xf32>
    %cst_73 = arith.constant 0.000000e+00 : f32
    %89 = vector.broadcast %cst_73 : f32 to vector<16x512xf32>
    %90 = arith.maximumf %88, %89 : vector<16x512xf32>
    %c2_74 = arith.constant 2 : index
    %c0_75 = arith.constant 0 : index
    %c0_76 = arith.constant 0 : index
    %91 = vector.load %arg2[%c2_74, %c0_75, %c0_76] : memref<8x32x32xbf16, #tpu.memory_space<vmem>>, vector<1x8x16xbf16>
    %92 = vector.shape_cast %91 : vector<1x8x16xbf16> to vector<8x16xbf16>
    %c2_77 = arith.constant 2 : index
    %c0_78 = arith.constant 0 : index
    %c0_79 = arith.constant 0 : index
    %93 = vector.load %arg3[%c2_77, %c0_78, %c0_79] : memref<8x32x512xf32, #tpu.memory_space<vmem>>, vector<1x8x512xf32>
    %94 = vector.shape_cast %93 : vector<1x8x512xf32> to vector<8x512xf32>
    %95 = arith.truncf %90 : vector<16x512xf32> to vector<16x512xbf16>
    %cst_80 = arith.constant dense<0.000000e+00> : vector<8x512xf32>
    %96 = tpu.matmul %92, %95, %cst_80 {dimension_numbers = #tpu.dot_dimension_numbers<[1], [0], [0], [1], [0, 0, 1, 1], [], []>} : vector<8x16xbf16>, vector<16x512xbf16>, vector<8x512xf32> -> vector<8x512xf32>
    %97 = arith.addf %96, %94 : vector<8x512xf32>
    %cst_81 = arith.constant 0.000000e+00 : f32
    %98 = vector.broadcast %cst_81 : f32 to vector<8x512xf32>
    %99 = arith.maximumf %97, %98 : vector<8x512xf32>
    %c3_82 = arith.constant 3 : index
    %c0_83 = arith.constant 0 : index
    %c0_84 = arith.constant 0 : index
    %100 = vector.load %arg2[%c3_82, %c0_83, %c0_84] : memref<8x32x32xbf16, #tpu.memory_space<vmem>>, vector<1x3x8xbf16>
    %101 = vector.shape_cast %100 : vector<1x3x8xbf16> to vector<3x8xbf16>
    %c3_85 = arith.constant 3 : index
    %c0_86 = arith.constant 0 : index
    %c0_87 = arith.constant 0 : index
    %102 = vector.load %arg3[%c3_85, %c0_86, %c0_87] : memref<8x32x512xf32, #tpu.memory_space<vmem>>, vector<1x3x512xf32>
    %103 = vector.shape_cast %102 : vector<1x3x512xf32> to vector<3x512xf32>
    %104 = arith.truncf %99 : vector<8x512xf32> to vector<8x512xbf16>
    %cst_88 = arith.constant dense<0.000000e+00> : vector<3x512xf32>
    %105 = tpu.matmul %101, %104, %cst_88 {dimension_numbers = #tpu.dot_dimension_numbers<[1], [0], [0], [1], [0, 0, 1, 1], [], []>} : vector<3x8xbf16>, vector<8x512xbf16>, vector<3x512xf32> -> vector<3x512xf32>
    %106 = arith.addf %105, %103 : vector<3x512xf32>
    %107 = math.tanh %106 : vector<3x512xf32>
    %c4_89 = arith.constant 4 : index
    %c0_90 = arith.constant 0 : index
    %c0_91 = arith.constant 0 : index
    %108 = vector.load %arg2[%c4_89, %c0_90, %c0_91] : memref<8x32x32xbf16, #tpu.memory_space<vmem>>, vector<1x8x3xbf16>
    %109 = vector.shape_cast %108 : vector<1x8x3xbf16> to vector<8x3xbf16>
    %c4_92 = arith.constant 4 : index
    %c0_93 = arith.constant 0 : index
    %c0_94 = arith.constant 0 : index
    %110 = vector.load %arg3[%c4_92, %c0_93, %c0_94] : memref<8x32x512xf32, #tpu.memory_space<vmem>>, vector<1x8x512xf32>
    %111 = vector.shape_cast %110 : vector<1x8x512xf32> to vector<8x512xf32>
    %112 = arith.truncf %107 : vector<3x512xf32> to vector<3x512xbf16>
    %cst_95 = arith.constant dense<0.000000e+00> : vector<8x512xf32>
    %113 = tpu.matmul %109, %112, %cst_95 {dimension_numbers = #tpu.dot_dimension_numbers<[1], [0], [0], [1], [0, 0, 1, 1], [], []>} : vector<8x3xbf16>, vector<3x512xbf16>, vector<8x512xf32> -> vector<8x512xf32>
    %114 = arith.addf %113, %111 : vector<8x512xf32>
    %cst_96 = arith.constant 0.000000e+00 : f32
    %115 = vector.broadcast %cst_96 : f32 to vector<8x512xf32>
    %116 = arith.maximumf %114, %115 : vector<8x512xf32>
    %c5_97 = arith.constant 5 : index
    %c0_98 = arith.constant 0 : index
    %c0_99 = arith.constant 0 : index
    %117 = vector.load %arg2[%c5_97, %c0_98, %c0_99] : memref<8x32x32xbf16, #tpu.memory_space<vmem>>, vector<1x16x8xbf16>
    %118 = vector.shape_cast %117 : vector<1x16x8xbf16> to vector<16x8xbf16>
    %c5_100 = arith.constant 5 : index
    %c0_101 = arith.constant 0 : index
    %c0_102 = arith.constant 0 : index
    %119 = vector.load %arg3[%c5_100, %c0_101, %c0_102] : memref<8x32x512xf32, #tpu.memory_space<vmem>>, vector<1x16x512xf32>
    %120 = vector.shape_cast %119 : vector<1x16x512xf32> to vector<16x512xf32>
    %121 = arith.truncf %116 : vector<8x512xf32> to vector<8x512xbf16>
    %cst_103 = arith.constant dense<0.000000e+00> : vector<16x512xf32>
    %122 = tpu.matmul %118, %121, %cst_103 {dimension_numbers = #tpu.dot_dimension_numbers<[1], [0], [0], [1], [0, 0, 1, 1], [], []>} : vector<16x8xbf16>, vector<8x512xbf16>, vector<16x512xf32> -> vector<16x512xf32>
    %123 = arith.addf %122, %120 : vector<16x512xf32>
    %cst_104 = arith.constant 0.000000e+00 : f32
    %124 = vector.broadcast %cst_104 : f32 to vector<16x512xf32>
    %125 = arith.maximumf %123, %124 : vector<16x512xf32>
    %c6_105 = arith.constant 6 : index
    %c0_106 = arith.constant 0 : index
    %c0_107 = arith.constant 0 : index
    %126 = vector.load %arg2[%c6_105, %c0_106, %c0_107] : memref<8x32x32xbf16, #tpu.memory_space<vmem>>, vector<1x32x16xbf16>
    %127 = vector.shape_cast %126 : vector<1x32x16xbf16> to vector<32x16xbf16>
    %c6_108 = arith.constant 6 : index
    %c0_109 = arith.constant 0 : index
    %c0_110 = arith.constant 0 : index
    %128 = vector.load %arg3[%c6_108, %c0_109, %c0_110] : memref<8x32x512xf32, #tpu.memory_space<vmem>>, vector<1x32x512xf32>
    %129 = vector.shape_cast %128 : vector<1x32x512xf32> to vector<32x512xf32>
    %130 = arith.truncf %125 : vector<16x512xf32> to vector<16x512xbf16>
    %cst_111 = arith.constant dense<0.000000e+00> : vector<32x512xf32>
    %131 = tpu.matmul %127, %130, %cst_111 {dimension_numbers = #tpu.dot_dimension_numbers<[1], [0], [0], [1], [0, 0, 1, 1], [], []>} : vector<32x16xbf16>, vector<16x512xbf16>, vector<32x512xf32> -> vector<32x512xf32>
    %132 = arith.addf %131, %129 : vector<32x512xf32>
    %cst_112 = arith.constant 0.000000e+00 : f32
    %133 = vector.broadcast %cst_112 : f32 to vector<32x512xf32>
    %134 = arith.maximumf %132, %133 : vector<32x512xf32>
    %c7_113 = arith.constant 7 : index
    %c0_114 = arith.constant 0 : index
    %c0_115 = arith.constant 0 : index
    %135 = vector.load %arg2[%c7_113, %c0_114, %c0_115] : memref<8x32x32xbf16, #tpu.memory_space<vmem>>, vector<1x5x32xbf16>
    %136 = vector.shape_cast %135 : vector<1x5x32xbf16> to vector<5x32xbf16>
    %c7_116 = arith.constant 7 : index
    %c0_117 = arith.constant 0 : index
    %c0_118 = arith.constant 0 : index
    %137 = vector.load %arg3[%c7_116, %c0_117, %c0_118] : memref<8x32x512xf32, #tpu.memory_space<vmem>>, vector<1x5x512xf32>
    %138 = vector.shape_cast %137 : vector<1x5x512xf32> to vector<5x512xf32>
    %139 = arith.truncf %134 : vector<32x512xf32> to vector<32x512xbf16>
    %cst_119 = arith.constant dense<0.000000e+00> : vector<5x512xf32>
    %140 = tpu.matmul %136, %139, %cst_119 {dimension_numbers = #tpu.dot_dimension_numbers<[1], [0], [0], [1], [0, 0, 1, 1], [], []>} : vector<5x32xbf16>, vector<32x512xbf16>, vector<5x512xf32> -> vector<5x512xf32>
    %141 = arith.addf %140, %138 : vector<5x512xf32>
    %142 = math.tanh %141 : vector<5x512xf32>
    %c0_120 = arith.constant 0 : index
    %c512_121 = arith.constant 512 : index
    %143 = vector.load %arg4[%c0_120, %c512_121] : memref<5x2048xf32, #tpu.memory_space<vmem>>, vector<5x512xf32>
    tpu.vector_store %arg4[%c0_120, %c512_121], %142 {strides = array<i32>} : memref<5x2048xf32, #tpu.memory_space<vmem>>, vector<5x512xf32>,
    %c0_122 = arith.constant 0 : index
    %c1024 = arith.constant 1024 : index
    %144 = vector.load %arg1[%c0_122, %c1024] : memref<5x2048xf32, #tpu.memory_space<vmem>>, vector<5x512xf32>
    %c0_123 = arith.constant 0 : index
    %c0_124 = arith.constant 0 : index
    %c0_125 = arith.constant 0 : index
    %145 = vector.load %arg2[%c0_123, %c0_124, %c0_125] : memref<8x32x32xbf16, #tpu.memory_space<vmem>>, vector<1x32x5xbf16>
    %146 = vector.shape_cast %145 : vector<1x32x5xbf16> to vector<32x5xbf16>
    %c0_126 = arith.constant 0 : index
    %c0_127 = arith.constant 0 : index
    %c0_128 = arith.constant 0 : index
    %147 = vector.load %arg3[%c0_126, %c0_127, %c0_128] : memref<8x32x512xf32, #tpu.memory_space<vmem>>, vector<1x32x512xf32>
    %148 = vector.shape_cast %147 : vector<1x32x512xf32> to vector<32x512xf32>
    %149 = arith.truncf %144 : vector<5x512xf32> to vector<5x512xbf16>
    %cst_129 = arith.constant dense<0.000000e+00> : vector<32x512xf32>
    %150 = tpu.matmul %146, %149, %cst_129 {dimension_numbers = #tpu.dot_dimension_numbers<[1], [0], [0], [1], [0, 0, 1, 1], [], []>} : vector<32x5xbf16>, vector<5x512xbf16>, vector<32x512xf32> -> vector<32x512xf32>
    %151 = arith.addf %150, %148 : vector<32x512xf32>
    %cst_130 = arith.constant 0.000000e+00 : f32
    %152 = vector.broadcast %cst_130 : f32 to vector<32x512xf32>
    %153 = arith.maximumf %151, %152 : vector<32x512xf32>
    %c1_131 = arith.constant 1 : index
    %c0_132 = arith.constant 0 : index
    %c0_133 = arith.constant 0 : index
    %154 = vector.load %arg2[%c1_131, %c0_132, %c0_133] : memref<8x32x32xbf16, #tpu.memory_space<vmem>>, vector<1x16x32xbf16>
    %155 = vector.shape_cast %154 : vector<1x16x32xbf16> to vector<16x32xbf16>
    %c1_134 = arith.constant 1 : index
    %c0_135 = arith.constant 0 : index
    %c0_136 = arith.constant 0 : index
    %156 = vector.load %arg3[%c1_134, %c0_135, %c0_136] : memref<8x32x512xf32, #tpu.memory_space<vmem>>, vector<1x16x512xf32>
    %157 = vector.shape_cast %156 : vector<1x16x512xf32> to vector<16x512xf32>
    %158 = arith.truncf %153 : vector<32x512xf32> to vector<32x512xbf16>
    %cst_137 = arith.constant dense<0.000000e+00> : vector<16x512xf32>
    %159 = tpu.matmul %155, %158, %cst_137 {dimension_numbers = #tpu.dot_dimension_numbers<[1], [0], [0], [1], [0, 0, 1, 1], [], []>} : vector<16x32xbf16>, vector<32x512xbf16>, vector<16x512xf32> -> vector<16x512xf32>
    %160 = arith.addf %159, %157 : vector<16x512xf32>
    %cst_138 = arith.constant 0.000000e+00 : f32
    %161 = vector.broadcast %cst_138 : f32 to vector<16x512xf32>
    %162 = arith.maximumf %160, %161 : vector<16x512xf32>
    %c2_139 = arith.constant 2 : index
    %c0_140 = arith.constant 0 : index
    %c0_141 = arith.constant 0 : index
    %163 = vector.load %arg2[%c2_139, %c0_140, %c0_141] : memref<8x32x32xbf16, #tpu.memory_space<vmem>>, vector<1x8x16xbf16>
    %164 = vector.shape_cast %163 : vector<1x8x16xbf16> to vector<8x16xbf16>
    %c2_142 = arith.constant 2 : index
    %c0_143 = arith.constant 0 : index
    %c0_144 = arith.constant 0 : index
    %165 = vector.load %arg3[%c2_142, %c0_143, %c0_144] : memref<8x32x512xf32, #tpu.memory_space<vmem>>, vector<1x8x512xf32>
    %166 = vector.shape_cast %165 : vector<1x8x512xf32> to vector<8x512xf32>
    %167 = arith.truncf %162 : vector<16x512xf32> to vector<16x512xbf16>
    %cst_145 = arith.constant dense<0.000000e+00> : vector<8x512xf32>
    %168 = tpu.matmul %164, %167, %cst_145 {dimension_numbers = #tpu.dot_dimension_numbers<[1], [0], [0], [1], [0, 0, 1, 1], [], []>} : vector<8x16xbf16>, vector<16x512xbf16>, vector<8x512xf32> -> vector<8x512xf32>
    %169 = arith.addf %168, %166 : vector<8x512xf32>
    %cst_146 = arith.constant 0.000000e+00 : f32
    %170 = vector.broadcast %cst_146 : f32 to vector<8x512xf32>
    %171 = arith.maximumf %169, %170 : vector<8x512xf32>
    %c3_147 = arith.constant 3 : index
    %c0_148 = arith.constant 0 : index
    %c0_149 = arith.constant 0 : index
    %172 = vector.load %arg2[%c3_147, %c0_148, %c0_149] : memref<8x32x32xbf16, #tpu.memory_space<vmem>>, vector<1x3x8xbf16>
    %173 = vector.shape_cast %172 : vector<1x3x8xbf16> to vector<3x8xbf16>
    %c3_150 = arith.constant 3 : index
    %c0_151 = arith.constant 0 : index
    %c0_152 = arith.constant 0 : index
    %174 = vector.load %arg3[%c3_150, %c0_151, %c0_152] : memref<8x32x512xf32, #tpu.memory_space<vmem>>, vector<1x3x512xf32>
    %175 = vector.shape_cast %174 : vector<1x3x512xf32> to vector<3x512xf32>
    %176 = arith.truncf %171 : vector<8x512xf32> to vector<8x512xbf16>
    %cst_153 = arith.constant dense<0.000000e+00> : vector<3x512xf32>
    %177 = tpu.matmul %173, %176, %cst_153 {dimension_numbers = #tpu.dot_dimension_numbers<[1], [0], [0], [1], [0, 0, 1, 1], [], []>} : vector<3x8xbf16>, vector<8x512xbf16>, vector<3x512xf32> -> vector<3x512xf32>
    %178 = arith.addf %177, %175 : vector<3x512xf32>
    %179 = math.tanh %178 : vector<3x512xf32>
    %c4_154 = arith.constant 4 : index
    %c0_155 = arith.constant 0 : index
    %c0_156 = arith.constant 0 : index
    %180 = vector.load %arg2[%c4_154, %c0_155, %c0_156] : memref<8x32x32xbf16, #tpu.memory_space<vmem>>, vector<1x8x3xbf16>
    %181 = vector.shape_cast %180 : vector<1x8x3xbf16> to vector<8x3xbf16>
    %c4_157 = arith.constant 4 : index
    %c0_158 = arith.constant 0 : index
    %c0_159 = arith.constant 0 : index
    %182 = vector.load %arg3[%c4_157, %c0_158, %c0_159] : memref<8x32x512xf32, #tpu.memory_space<vmem>>, vector<1x8x512xf32>
    %183 = vector.shape_cast %182 : vector<1x8x512xf32> to vector<8x512xf32>
    %184 = arith.truncf %179 : vector<3x512xf32> to vector<3x512xbf16>
    %cst_160 = arith.constant dense<0.000000e+00> : vector<8x512xf32>
    %185 = tpu.matmul %181, %184, %cst_160 {dimension_numbers = #tpu.dot_dimension_numbers<[1], [0], [0], [1], [0, 0, 1, 1], [], []>} : vector<8x3xbf16>, vector<3x512xbf16>, vector<8x512xf32> -> vector<8x512xf32>
    %186 = arith.addf %185, %183 : vector<8x512xf32>
    %cst_161 = arith.constant 0.000000e+00 : f32
    %187 = vector.broadcast %cst_161 : f32 to vector<8x512xf32>
    %188 = arith.maximumf %186, %187 : vector<8x512xf32>
    %c5_162 = arith.constant 5 : index
    %c0_163 = arith.constant 0 : index
    %c0_164 = arith.constant 0 : index
    %189 = vector.load %arg2[%c5_162, %c0_163, %c0_164] : memref<8x32x32xbf16, #tpu.memory_space<vmem>>, vector<1x16x8xbf16>
    %190 = vector.shape_cast %189 : vector<1x16x8xbf16> to vector<16x8xbf16>
    %c5_165 = arith.constant 5 : index
    %c0_166 = arith.constant 0 : index
    %c0_167 = arith.constant 0 : index
    %191 = vector.load %arg3[%c5_165, %c0_166, %c0_167] : memref<8x32x512xf32, #tpu.memory_space<vmem>>, vector<1x16x512xf32>
    %192 = vector.shape_cast %191 : vector<1x16x512xf32> to vector<16x512xf32>
    %193 = arith.truncf %188 : vector<8x512xf32> to vector<8x512xbf16>
    %cst_168 = arith.constant dense<0.000000e+00> : vector<16x512xf32>
    %194 = tpu.matmul %190, %193, %cst_168 {dimension_numbers = #tpu.dot_dimension_numbers<[1], [0], [0], [1], [0, 0, 1, 1], [], []>} : vector<16x8xbf16>, vector<8x512xbf16>, vector<16x512xf32> -> vector<16x512xf32>
    %195 = arith.addf %194, %192 : vector<16x512xf32>
    %cst_169 = arith.constant 0.000000e+00 : f32
    %196 = vector.broadcast %cst_169 : f32 to vector<16x512xf32>
    %197 = arith.maximumf %195, %196 : vector<16x512xf32>
    %c6_170 = arith.constant 6 : index
    %c0_171 = arith.constant 0 : index
    %c0_172 = arith.constant 0 : index
    %198 = vector.load %arg2[%c6_170, %c0_171, %c0_172] : memref<8x32x32xbf16, #tpu.memory_space<vmem>>, vector<1x32x16xbf16>
    %199 = vector.shape_cast %198 : vector<1x32x16xbf16> to vector<32x16xbf16>
    %c6_173 = arith.constant 6 : index
    %c0_174 = arith.constant 0 : index
    %c0_175 = arith.constant 0 : index
    %200 = vector.load %arg3[%c6_173, %c0_174, %c0_175] : memref<8x32x512xf32, #tpu.memory_space<vmem>>, vector<1x32x512xf32>
    %201 = vector.shape_cast %200 : vector<1x32x512xf32> to vector<32x512xf32>
    %202 = arith.truncf %197 : vector<16x512xf32> to vector<16x512xbf16>
    %cst_176 = arith.constant dense<0.000000e+00> : vector<32x512xf32>
    %203 = tpu.matmul %199, %202, %cst_176 {dimension_numbers = #tpu.dot_dimension_numbers<[1], [0], [0], [1], [0, 0, 1, 1], [], []>} : vector<32x16xbf16>, vector<16x512xbf16>, vector<32x512xf32> -> vector<32x512xf32>
    %204 = arith.addf %203, %201 : vector<32x512xf32>
    %cst_177 = arith.constant 0.000000e+00 : f32
    %205 = vector.broadcast %cst_177 : f32 to vector<32x512xf32>
    %206 = arith.maximumf %204, %205 : vector<32x512xf32>
    %c7_178 = arith.constant 7 : index
    %c0_179 = arith.constant 0 : index
    %c0_180 = arith.constant 0 : index
    %207 = vector.load %arg2[%c7_178, %c0_179, %c0_180] : memref<8x32x32xbf16, #tpu.memory_space<vmem>>, vector<1x5x32xbf16>
    %208 = vector.shape_cast %207 : vector<1x5x32xbf16> to vector<5x32xbf16>
    %c7_181 = arith.constant 7 : index
    %c0_182 = arith.constant 0 : index
    %c0_183 = arith.constant 0 : index
    %209 = vector.load %arg3[%c7_181, %c0_182, %c0_183] : memref<8x32x512xf32, #tpu.memory_space<vmem>>, vector<1x5x512xf32>
    %210 = vector.shape_cast %209 : vector<1x5x512xf32> to vector<5x512xf32>
    %211 = arith.truncf %206 : vector<32x512xf32> to vector<32x512xbf16>
    %cst_184 = arith.constant dense<0.000000e+00> : vector<5x512xf32>
    %212 = tpu.matmul %208, %211, %cst_184 {dimension_numbers = #tpu.dot_dimension_numbers<[1], [0], [0], [1], [0, 0, 1, 1], [], []>} : vector<5x32xbf16>, vector<32x512xbf16>, vector<5x512xf32> -> vector<5x512xf32>
    %213 = arith.addf %212, %210 : vector<5x512xf32>
    %214 = math.tanh %213 : vector<5x512xf32>
    %c0_185 = arith.constant 0 : index
    %c1024_186 = arith.constant 1024 : index
    %215 = vector.load %arg4[%c0_185, %c1024_186] : memref<5x2048xf32, #tpu.memory_space<vmem>>, vector<5x512xf32>
    tpu.vector_store %arg4[%c0_185, %c1024_186], %214 {strides = array<i32>} : memref<5x2048xf32, #tpu.memory_space<vmem>>, vector<5x512xf32>,
    %c0_187 = arith.constant 0 : index
    %c1536 = arith.constant 1536 : index
    %216 = vector.load %arg1[%c0_187, %c1536] : memref<5x2048xf32, #tpu.memory_space<vmem>>, vector<5x512xf32>
    %c0_188 = arith.constant 0 : index
    %c0_189 = arith.constant 0 : index
    %c0_190 = arith.constant 0 : index
    %217 = vector.load %arg2[%c0_188, %c0_189, %c0_190] : memref<8x32x32xbf16, #tpu.memory_space<vmem>>, vector<1x32x5xbf16>
    %218 = vector.shape_cast %217 : vector<1x32x5xbf16> to vector<32x5xbf16>
    %c0_191 = arith.constant 0 : index
    %c0_192 = arith.constant 0 : index
    %c0_193 = arith.constant 0 : index
    %219 = vector.load %arg3[%c0_191, %c0_192, %c0_193] : memref<8x32x512xf32, #tpu.memory_space<vmem>>, vector<1x32x512xf32>
    %220 = vector.shape_cast %219 : vector<1x32x512xf32> to vector<32x512xf32>
    %221 = arith.truncf %216 : vector<5x512xf32> to vector<5x512xbf16>
    %cst_194 = arith.constant dense<0.000000e+00> : vector<32x512xf32>
    %222 = tpu.matmul %218, %221, %cst_194 {dimension_numbers = #tpu.dot_dimension_numbers<[1], [0], [0], [1], [0, 0, 1, 1], [], []>} : vector<32x5xbf16>, vector<5x512xbf16>, vector<32x512xf32> -> vector<32x512xf32>
    %223 = arith.addf %222, %220 : vector<32x512xf32>
    %cst_195 = arith.constant 0.000000e+00 : f32
    %224 = vector.broadcast %cst_195 : f32 to vector<32x512xf32>
    %225 = arith.maximumf %223, %224 : vector<32x512xf32>
    %c1_196 = arith.constant 1 : index
    %c0_197 = arith.constant 0 : index
    %c0_198 = arith.constant 0 : index
    %226 = vector.load %arg2[%c1_196, %c0_197, %c0_198] : memref<8x32x32xbf16, #tpu.memory_space<vmem>>, vector<1x16x32xbf16>
    %227 = vector.shape_cast %226 : vector<1x16x32xbf16> to vector<16x32xbf16>
    %c1_199 = arith.constant 1 : index
    %c0_200 = arith.constant 0 : index
    %c0_201 = arith.constant 0 : index
    %228 = vector.load %arg3[%c1_199, %c0_200, %c0_201] : memref<8x32x512xf32, #tpu.memory_space<vmem>>, vector<1x16x512xf32>
    %229 = vector.shape_cast %228 : vector<1x16x512xf32> to vector<16x512xf32>
    %230 = arith.truncf %225 : vector<32x512xf32> to vector<32x512xbf16>
    %cst_202 = arith.constant dense<0.000000e+00> : vector<16x512xf32>
    %231 = tpu.matmul %227, %230, %cst_202 {dimension_numbers = #tpu.dot_dimension_numbers<[1], [0], [0], [1], [0, 0, 1, 1], [], []>} : vector<16x32xbf16>, vector<32x512xbf16>, vector<16x512xf32> -> vector<16x512xf32>
    %232 = arith.addf %231, %229 : vector<16x512xf32>
    %cst_203 = arith.constant 0.000000e+00 : f32
    %233 = vector.broadcast %cst_203 : f32 to vector<16x512xf32>
    %234 = arith.maximumf %232, %233 : vector<16x512xf32>
    %c2_204 = arith.constant 2 : index
    %c0_205 = arith.constant 0 : index
    %c0_206 = arith.constant 0 : index
    %235 = vector.load %arg2[%c2_204, %c0_205, %c0_206] : memref<8x32x32xbf16, #tpu.memory_space<vmem>>, vector<1x8x16xbf16>
    %236 = vector.shape_cast %235 : vector<1x8x16xbf16> to vector<8x16xbf16>
    %c2_207 = arith.constant 2 : index
    %c0_208 = arith.constant 0 : index
    %c0_209 = arith.constant 0 : index
    %237 = vector.load %arg3[%c2_207, %c0_208, %c0_209] : memref<8x32x512xf32, #tpu.memory_space<vmem>>, vector<1x8x512xf32>
    %238 = vector.shape_cast %237 : vector<1x8x512xf32> to vector<8x512xf32>
    %239 = arith.truncf %234 : vector<16x512xf32> to vector<16x512xbf16>
    %cst_210 = arith.constant dense<0.000000e+00> : vector<8x512xf32>
    %240 = tpu.matmul %236, %239, %cst_210 {dimension_numbers = #tpu.dot_dimension_numbers<[1], [0], [0], [1], [0, 0, 1, 1], [], []>} : vector<8x16xbf16>, vector<16x512xbf16>, vector<8x512xf32> -> vector<8x512xf32>
    %241 = arith.addf %240, %238 : vector<8x512xf32>
    %cst_211 = arith.constant 0.000000e+00 : f32
    %242 = vector.broadcast %cst_211 : f32 to vector<8x512xf32>
    %243 = arith.maximumf %241, %242 : vector<8x512xf32>
    %c3_212 = arith.constant 3 : index
    %c0_213 = arith.constant 0 : index
    %c0_214 = arith.constant 0 : index
    %244 = vector.load %arg2[%c3_212, %c0_213, %c0_214] : memref<8x32x32xbf16, #tpu.memory_space<vmem>>, vector<1x3x8xbf16>
    %245 = vector.shape_cast %244 : vector<1x3x8xbf16> to vector<3x8xbf16>
    %c3_215 = arith.constant 3 : index
    %c0_216 = arith.constant 0 : index
    %c0_217 = arith.constant 0 : index
    %246 = vector.load %arg3[%c3_215, %c0_216, %c0_217] : memref<8x32x512xf32, #tpu.memory_space<vmem>>, vector<1x3x512xf32>
    %247 = vector.shape_cast %246 : vector<1x3x512xf32> to vector<3x512xf32>
    %248 = arith.truncf %243 : vector<8x512xf32> to vector<8x512xbf16>
    %cst_218 = arith.constant dense<0.000000e+00> : vector<3x512xf32>
    %249 = tpu.matmul %245, %248, %cst_218 {dimension_numbers = #tpu.dot_dimension_numbers<[1], [0], [0], [1], [0, 0, 1, 1], [], []>} : vector<3x8xbf16>, vector<8x512xbf16>, vector<3x512xf32> -> vector<3x512xf32>
    %250 = arith.addf %249, %247 : vector<3x512xf32>
    %251 = math.tanh %250 : vector<3x512xf32>
    %c4_219 = arith.constant 4 : index
    %c0_220 = arith.constant 0 : index
    %c0_221 = arith.constant 0 : index
    %252 = vector.load %arg2[%c4_219, %c0_220, %c0_221] : memref<8x32x32xbf16, #tpu.memory_space<vmem>>, vector<1x8x3xbf16>
    %253 = vector.shape_cast %252 : vector<1x8x3xbf16> to vector<8x3xbf16>
    %c4_222 = arith.constant 4 : index
    %c0_223 = arith.constant 0 : index
    %c0_224 = arith.constant 0 : index
    %254 = vector.load %arg3[%c4_222, %c0_223, %c0_224] : memref<8x32x512xf32, #tpu.memory_space<vmem>>, vector<1x8x512xf32>
    %255 = vector.shape_cast %254 : vector<1x8x512xf32> to vector<8x512xf32>
    %256 = arith.truncf %251 : vector<3x512xf32> to vector<3x512xbf16>
    %cst_225 = arith.constant dense<0.000000e+00> : vector<8x512xf32>
    %257 = tpu.matmul %253, %256, %cst_225 {dimension_numbers = #tpu.dot_dimension_numbers<[1], [0], [0], [1], [0, 0, 1, 1], [], []>} : vector<8x3xbf16>, vector<3x512xbf16>, vector<8x512xf32> -> vector<8x512xf32>
    %258 = arith.addf %257, %255 : vector<8x512xf32>
    %cst_226 = arith.constant 0.000000e+00 : f32
    %259 = vector.broadcast %cst_226 : f32 to vector<8x512xf32>
    %260 = arith.maximumf %258, %259 : vector<8x512xf32>
    %c5_227 = arith.constant 5 : index
    %c0_228 = arith.constant 0 : index
    %c0_229 = arith.constant 0 : index
    %261 = vector.load %arg2[%c5_227, %c0_228, %c0_229] : memref<8x32x32xbf16, #tpu.memory_space<vmem>>, vector<1x16x8xbf16>
    %262 = vector.shape_cast %261 : vector<1x16x8xbf16> to vector<16x8xbf16>
    %c5_230 = arith.constant 5 : index
    %c0_231 = arith.constant 0 : index
    %c0_232 = arith.constant 0 : index
    %263 = vector.load %arg3[%c5_230, %c0_231, %c0_232] : memref<8x32x512xf32, #tpu.memory_space<vmem>>, vector<1x16x512xf32>
    %264 = vector.shape_cast %263 : vector<1x16x512xf32> to vector<16x512xf32>
    %265 = arith.truncf %260 : vector<8x512xf32> to vector<8x512xbf16>
    %cst_233 = arith.constant dense<0.000000e+00> : vector<16x512xf32>
    %266 = tpu.matmul %262, %265, %cst_233 {dimension_numbers = #tpu.dot_dimension_numbers<[1], [0], [0], [1], [0, 0, 1, 1], [], []>} : vector<16x8xbf16>, vector<8x512xbf16>, vector<16x512xf32> -> vector<16x512xf32>
    %267 = arith.addf %266, %264 : vector<16x512xf32>
    %cst_234 = arith.constant 0.000000e+00 : f32
    %268 = vector.broadcast %cst_234 : f32 to vector<16x512xf32>
    %269 = arith.maximumf %267, %268 : vector<16x512xf32>
    %c6_235 = arith.constant 6 : index
    %c0_236 = arith.constant 0 : index
    %c0_237 = arith.constant 0 : index
    %270 = vector.load %arg2[%c6_235, %c0_236, %c0_237] : memref<8x32x32xbf16, #tpu.memory_space<vmem>>, vector<1x32x16xbf16>
    %271 = vector.shape_cast %270 : vector<1x32x16xbf16> to vector<32x16xbf16>
    %c6_238 = arith.constant 6 : index
    %c0_239 = arith.constant 0 : index
    %c0_240 = arith.constant 0 : index
    %272 = vector.load %arg3[%c6_238, %c0_239, %c0_240] : memref<8x32x512xf32, #tpu.memory_space<vmem>>, vector<1x32x512xf32>
    %273 = vector.shape_cast %272 : vector<1x32x512xf32> to vector<32x512xf32>
    %274 = arith.truncf %269 : vector<16x512xf32> to vector<16x512xbf16>
    %cst_241 = arith.constant dense<0.000000e+00> : vector<32x512xf32>
    %275 = tpu.matmul %271, %274, %cst_241 {dimension_numbers = #tpu.dot_dimension_numbers<[1], [0], [0], [1], [0, 0, 1, 1], [], []>} : vector<32x16xbf16>, vector<16x512xbf16>, vector<32x512xf32> -> vector<32x512xf32>
    %276 = arith.addf %275, %273 : vector<32x512xf32>
    %cst_242 = arith.constant 0.000000e+00 : f32
    %277 = vector.broadcast %cst_242 : f32 to vector<32x512xf32>
    %278 = arith.maximumf %276, %277 : vector<32x512xf32>
    %c7_243 = arith.constant 7 : index
    %c0_244 = arith.constant 0 : index
    %c0_245 = arith.constant 0 : index
    %279 = vector.load %arg2[%c7_243, %c0_244, %c0_245] : memref<8x32x32xbf16, #tpu.memory_space<vmem>>, vector<1x5x32xbf16>
    %280 = vector.shape_cast %279 : vector<1x5x32xbf16> to vector<5x32xbf16>
    %c7_246 = arith.constant 7 : index
    %c0_247 = arith.constant 0 : index
    %c0_248 = arith.constant 0 : index
    %281 = vector.load %arg3[%c7_246, %c0_247, %c0_248] : memref<8x32x512xf32, #tpu.memory_space<vmem>>, vector<1x5x512xf32>
    %282 = vector.shape_cast %281 : vector<1x5x512xf32> to vector<5x512xf32>
    %283 = arith.truncf %278 : vector<32x512xf32> to vector<32x512xbf16>
    %cst_249 = arith.constant dense<0.000000e+00> : vector<5x512xf32>
    %284 = tpu.matmul %280, %283, %cst_249 {dimension_numbers = #tpu.dot_dimension_numbers<[1], [0], [0], [1], [0, 0, 1, 1], [], []>} : vector<5x32xbf16>, vector<32x512xbf16>, vector<5x512xf32> -> vector<5x512xf32>
    %285 = arith.addf %284, %282 : vector<5x512xf32>
    %286 = math.tanh %285 : vector<5x512xf32>
    %c0_250 = arith.constant 0 : index
    %c1536_251 = arith.constant 1536 : index
    %287 = vector.load %arg4[%c0_250, %c1536_251] : memref<5x2048xf32, #tpu.memory_space<vmem>>, vector<5x512xf32>
    tpu.vector_store %arg4[%c0_250, %c1536_251], %286 {strides = array<i32>} : memref<5x2048xf32, #tpu.memory_space<vmem>>, vector<5x512xf32>,
    return
  }
  func.func @transform_0(%arg0: i32) -> (i32, i32) {
    %c0_i32 = arith.constant 0 : i32
    %c0_i32_0 = arith.constant 0 : i32
    return %c0_i32, %arg0 : i32, i32
  }
  func.func @transform_1(%arg0: i32) -> (i32, i32, i32) {
    %c0_i32 = arith.constant 0 : i32
    %c0_i32_0 = arith.constant 0 : i32
    %c0_i32_1 = arith.constant 0 : i32
    %c0_i32_2 = arith.constant 0 : i32
    return %c0_i32, %c0_i32_0, %c0_i32_1 : i32, i32, i32
  }
  func.func @transform_2(%arg0: i32) -> (i32, i32, i32) {
    %c0_i32 = arith.constant 0 : i32
    %c0_i32_0 = arith.constant 0 : i32
    %c0_i32_1 = arith.constant 0 : i32
    %c0_i32_2 = arith.constant 0 : i32
    return %c0_i32, %c0_i32_0, %c0_i32_1 : i32, i32, i32
  }
  func.func @transform_3(%arg0: i32) -> (i32, i32) {
    %c0_i32 = arith.constant 0 : i32
    %c0_i32_0 = arith.constant 0 : i32
    return %c0_i32, %arg0 : i32, i32
  }
}

</mosaic_0001>

<bundles_post_ra>
// kernel: autoencoder_forward_fm.1
= control target key start
LH: loop header
LB: loop body
LE: loop exit
PB: predicated region body
PF: predicated region fallthrough
CT: control target
= control target key end

     0   :  { %8 = vsyncpa [#allocation3], 0  ;;  %s5824_s0 = inlined_call_operand.hbm [shape: f32[5,8192], index: 0, kind: input, shape index: {}]   ;;  %s5825_s1 = inlined_call_operand.hbm [shape: bf16[8,32,32], index: 1, kind: input, shape index: {}]   ;;  %s5826_s2 = inlined_call_operand.hbm [shape: f32[8,32,512], index: 2, kind: input, shape index: {}]   ;;  %s5827_s3 = inlined_call_operand.hbm [shape: f32[5,8192], index: 3, kind: output, shape index: {}]  }
   0x1   :  { %10 = vsyncpa [#allocation3 + $0x1], 0 }
   0x2   :  { %11 = vsyncpa [#allocation6], 0 }
   0x3   :  { %12 = vsyncpa [#allocation4], 0 }
   0x4   :  { %14 = vsyncpa [#allocation4 + $0x1], 0  ;;  %s4887_s12 = smov 0   ;;  %s4889_s13 = smov 0  }
   0x5   :  { %s4891_s14 = smov 0   ;;  %s4893_s15 = smov 0  }
   0x6 LB: > { %s4908_s16 = sadd.s32 4294967295, %s4855_s15   ;;  %s4398_s17 = sadd.s32 4294967294, %s4855_s15   ;;  %s4855_s15 = sphi %s4893_s15, %s5993_s15   ;;  %s4851_s14 = sphi %s4891_s14, %s5992_s14   ;;  %s4847_s13 = sphi %s4889_s13, %s5991_s13   ;;  %s4843_s12 = sphi %s4887_s12, %s5990_s12  }
   0x7   : > { %p40_p0 = scmp.ne.s32.totalorder %s4847_s13, %s4843_s12  ;;  %p5828_p1 = scmp.eq.s32.totalorder %s4908_s16, 0 }
   0x8   : > { %p112_p3 = scmp.eq.s32.totalorder %s4398_s17, 3  ;;  %p4399_p5 = scmp.ge.s32.totalorder %s4855_s15, 1 }
   0x9   : > { %p4917_p4 = por %p5828_p1, %p40_p0  ;;  %p119_p7 = scmp.lt.s32.totalorder %s4855_s15, 5 }
   0xa   : > { %p4922_p6 = por %p112_p3, %p40_p0  ;;  %s4857_s21 = smov [#allocation5]  }
   0xb   : > { %s5881_s18 = scalar_select %p4917_p4, 1, 0 }
   0xc   : > { %s5882_s19 = scalar_select %p4922_p6, 1, 0 }
   0xd   : > { %p4927_p8 = pnand %p4399_p5, %p119_p7  ;;  %s131_s22 = sshll.u32 %s4857_s21, 4  ;;  %s132_s22 = int_to_ptr.vmem [resolvable:$true] %s131_s22 }
   0xe   : > { %s4858_s24 = smov [#allocation7]   ;;  %s4699_s28 = scalar_lea.hbm %s5825_s1, 2048 }
   0xf   : > { %s5883_s20 = scalar_select %p4927_p8, 1, 0 }
  0x10   : > { %p4550_p9 = pneg %p4927_p8  ;;  %s144_s25 = sshll.u32 %s4858_s24, 4  ;;  %s4939_s25 = int_to_ptr.vmem [resolvable:$true] %s144_s25 }
  0x11   : > { %p4700_p11 = scmp.ne.s32.totalorder %s5825_s1, %s4699_s28  ;;  %p4706_p3 = scmp.lt.u32.totalorder %s4699_s28, %s5825_s1 }
  0x12   : > { %p4935_p10 = pnand %p4550_p9, %p5828_p1 }
  0x14   : > { %p4701_p12 = pneg %p4935_p10 }
  0x16   : > { %p4702_p13 = pnand %p4701_p12, %p4700_p11 }
  0x18   : > { %p4703_p0 = pneg %p4702_p13 }
  0x1a   : > { %p4708_p5 = pnand %p4706_p3, %p4703_p0 }
  0x1c   : > { %4711 = shalt.err (!%p4708_p5)
}
  0x1d   : > { %s4712_s6 = scalar_lea.vmem %s132_s22, 2048  ;;  %p4720_p2 = scmp.lt.s32.totalorder %s132_s22, %s132_s22 }
  0x1e   : > { %p4713_p7 = scmp.ne.s32.totalorder %s132_s22, %s4712_s6  ;;  %p4721_p6 = scmp.lt.s32.totalorder %s4712_s6, %s4712_s6 }
  0x20   : > { %p4715_p9 = pnand %p4713_p7, %p4701_p12  ;;  %p4722_p4 = por %p4721_p6, %p4720_p2 }
  0x22   : > { %p4716_p1 = pneg %p4715_p9 }
  0x24   : > { %p4723_p8 = pnand %p4722_p4, %p4716_p1 }
  0x26   : > { %4726 = shalt.err (!%p4723_p8)
}
  0x27   : > { %s4859_s7 = smov 64   ;;  %s4860_s8 = smov 4  }
  0x28   : > { %4553 = dma.hbm_to_vmem [thread:$0]  (!%p4935_p10), %s5825_s1, 2048, %s132_s22, [#allocation6], %s4859_s7, %s4859_s7, %s4860_s8  }
  0x29   : > { %s4727_s21 = scalar_lea.hbm %s5826_s2, 16384 }
  0x2a   : > { %p4728_p11 = scmp.ne.s32.totalorder %s5826_s2, %s4727_s21  ;;  %p4734_p4 = scmp.lt.u32.totalorder %s4727_s21, %s5826_s2 }
  0x2c   : > { %p4730_p1 = pnand %p4728_p11, %p4701_p12 }
  0x2e   : > { %p4731_p2 = pneg %p4730_p1 }
  0x30   : > { %p4736_p6 = pnand %p4734_p4, %p4731_p2 }
  0x32   : > { %4739 = shalt.err (!%p4736_p6)
}
  0x33   : > { %s4740_s22 = scalar_lea.vmem %s4939_s25, 16384  ;;  %p4748_p3 = scmp.lt.s32.totalorder %s4939_s25, %s4939_s25 }
  0x34   : > { %p4741_p8 = scmp.ne.s32.totalorder %s4939_s25, %s4740_s22  ;;  %p4749_p5 = scmp.lt.s32.totalorder %s4740_s22, %s4740_s22 }
  0x36   : > { %p4743_p13 = pnand %p4741_p8, %p4701_p12  ;;  %p4750_p7 = por %p4749_p5, %p4748_p3 }
  0x38   : > { %p4744_p0 = pneg %p4743_p13 }
  0x3a   : > { %p4751_p9 = pnand %p4750_p7, %p4744_p0 }
  0x3c   : > { %4754 = shalt.err (!%p4751_p9)
}
  0x3d   : > { %s4861_s29 = smov 512   ;;  %s4862_s30 = smov 32  }
  0x3e   : > { %4556 = dma.hbm_to_vmem [thread:$0]  (!%p4935_p10), %s5826_s2, 16384, %s4939_s25, [#allocation6], %s4861_s29, %s4861_s29, %s4862_s30  }
  0x3f   : > { %s4989_s6 = sadd.s32 1, %s4855_s15   ;;  %s27_s8 = sadd.s32 1, %s4851_s14 }
  0x40   : > { %s24_s7 = ssub.s32 %s4855_s15, %s4989_s6  ;;  %p34_p11 = scmp.ne.s32.totalorder %s4851_s14, %s4847_s13 }
  0x41   : > { %p25_p12 = scmp.eq.s32.totalorder %s24_s7, 0  ;;  %p35_p1 = scmp.eq.s32.totalorder %s4855_s15, 0 }
  0x42   : > { %p5885_p4 = scmp.eq.s32.totalorder %s4908_s16, 3  ;;  %p4567_p8 = scmp.lt.s32.totalorder %s4855_s15, 4 }
  0x43   : > { %s4998_s9 = scalar_select %p25_p12, %s4851_s14, %s27_s8  }
  0x44   : > { %p36_p2 = por %p35_p1, %p34_p11  ;;  %p5002_p6 = por %p5885_p4, %p34_p11 }
  0x45   : > { %s158_s23 = sand.u32 1, %s4851_s14   ;;  %s4536_s25 = sshll.u32 %s4855_s15, 11 }
  0x46   : > { %s4403_s11 = sshll.u32 %s158_s23, 7  ;;  %s5012_s24 = scalar_lea.hbm %s5824_s0, %s4536_s25 }
  0x47   : > { %s162_s26 = scalar_lea.vmem [#allocation2], %s4403_s11  ;;  %p5016_p10 = pnand %p4567_p8, %p36_p2 }
  0x48   : > { %s170_s27 = sshll.u32 %s162_s26, 4  ;;  %s159_s22 = scalar_lea.sflag [#allocation3], %s158_s23  ;;  %s5014_s27 = int_to_ptr.vmem [resolvable:$true] %s170_s27 }
  0x49   : > { %s4755_s29 = scalar_lea.hbm %s5012_s24, 2048  ;;  %p4757_p0 = pneg %p5016_p10 }
  0x4a   : > { %p4756_p13 = scmp.ne.s32.totalorder %s5012_s24, %s4755_s29  ;;  %s4760_s5 = scalar_lea.hbm %s5824_s0, 8192 }
  0x4b   : > { %p4761_p7 = scmp.lt.u32.totalorder %s5012_s24, %s5824_s0  ;;  %p4762_p9 = scmp.lt.u32.totalorder %s4760_s5, %s4755_s29 }
  0x4c   : > { %p4758_p3 = pnand %p4757_p0, %p4756_p13  ;;  %p4764_p11 = scmp.lt.u32.totalorder %s4755_s29, %s5012_s24 }
  0x4d   : > { %p4763_p12 = por %p4762_p9, %p4761_p7 }
  0x4e   : > { %p4759_p5 = pneg %p4758_p3 }
  0x4f   : > { %p4765_p1 = por %p4764_p11, %p4763_p12 }
  0x51   : > { %p4766_p2 = pnand %p4765_p1, %p4759_p5 }
  0x53   : > { %4769 = shalt.err (!%p4766_p2)
}
  0x54   : > { %s4770_s23 = scalar_lea.vmem %s5014_s27, 2048  ;;  %s4863_s11 = smov [#allocation2]  }
  0x55   : > { %p4771_p4 = scmp.ne.s32.totalorder %s5014_s27, %s4770_s23  ;;  %s4775_s25 = sshll.u32 %s4863_s11, 4  ;;  %s4776_s25 = int_to_ptr.vmem [resolvable:$false] %s4775_s25 }
  0x56   : > { %s4777_s17 = scalar_lea.vmem %s4776_s25, 4096  ;;  %p4778_p3 = scmp.lt.s32.totalorder %s5014_s27, %s4776_s25 }
  0x57   : > { %p4773_p8 = pnand %p4771_p4, %p4757_p0  ;;  %p4779_p7 = scmp.lt.s32.totalorder %s4777_s17, %s4770_s23 }
  0x59   : > { %p4774_p13 = pneg %p4773_p8  ;;  %p4780_p9 = por %p4779_p7, %p4778_p3 }
  0x5b   : > { %p4781_p12 = pnand %p4780_p9, %p4774_p13 }
  0x5d   : > { %4784 = shalt.err (!%p4781_p12)
}
  0x5e   : > { %4560 = dma.hbm_to_vmem [thread:$0]  (!%p5016_p10), %s5012_s24, 2048, %s5014_s27, %s159_s22  }
  0x5f   : > { %p5888_p5 = scmp.ne.s32.totalorder %s5883_s20, 0 }
  0x61   : > { %179 = sbr.rel (%p5888_p5) target bundleno = 6775 (0x1a77), region = 32 }
  0x68   : > { %s5048_s21 = sand.u32 1, %s4847_s13   ;;  %p5889_p0 = scmp.ne.s32.totalorder %s5881_s18, 0 }
  0x69   : > { %s4407_s26 = sshll.u32 %s5048_s21, 7  ;;  %s182_s29 = scalar_lea.sflag [#allocation3], %s5048_s21 }
  0x6a   : > { %s5054_s30 = scalar_lea.vmem [#allocation2], %s4407_s26 }
  0x6b   : > { %4830 = dma.done.wait (%p5889_p0), %s182_s29, 2048  }
  0x6c   : > { %4832 = vsyncadd (%p5889_p0), %s182_s29, 4294965248  ;;  %p5890_p10 = scmp.eq.s32.totalorder %s4908_s16, 0 }
  0x6e   : > { %4834 = dma.done.wait (%p5890_p10), [#allocation6], 18432   ;;  %p5891_p11 = pmov %p5890_p10 }
  0x6f   : > { %vm264_vm0 = vcmask 1041408   ;;  %vm755_vm1 = vcmask 1040384   ;;  %v4864_v0 = vmov 65535   ;;  %v5831_v3 = vmov 0   ;;  %v220_v6 = vld [vmem:[%s5054_s30 + $0x8] sm:$0x1f] }
  0x70   : > { %4836 = vsyncadd (%p5891_p11), [#allocation6], 4294948864  ;;  %v756_v1 = vsel %vm755_vm1, 4294967295, %v4864_v0  ;;  %312 = vmatprep.mubr.bf16.mxu0 %v5831_v3  ;;  %365 = vmatprep.mubr.bf16.mxu1 %v5831_v3  ;;  %vm265_vm2 = vcmask 1042432   ;;  %v266_v4 = vsel %vm264_vm0, 4294967295, %v4864_v0  ;;  %v244_v9 = vpack.c.bf16 %v220_v6, %v220_v6  ;;  %v4611_v17 = vld [vmem:[#allocation5] sm:$0xff]  }
  0x71   : > { %v5064_v2 = vsel %vm264_vm0, %v756_v1, 0  ;;  %v5068_v5 = vsel %vm265_vm2, %v266_v4, 0  ;;  %v222_v7 = vld [vmem:[%s5054_s30 + $0x18] sm:$0x1f]  ;;  %v219_v8 = vld [vmem:[%s5054_s30] sm:$0x1f] }
  0x72   : > { %v246_v10 = vpack.c.bf16 %v222_v7, %v222_v7  ;;  %v243_v11 = vpack.c.bf16 %v219_v8, %v219_v8  ;;  %v221_v12 = vld [vmem:[%s5054_s30 + $0x10] sm:$0x1f]  ;;  %v272_v14 = vand.u32 %v5068_v5, %v244_v9  ;;  %vm257_vm3 = vcmask 39936   ;;  %v4612_v19 = vld [vmem:[#allocation5 + $0x8] sm:$0xff]   ;;  %v5086_v20 = vld [vmem:[#allocation7] sm:$0xff]  ;;  %s5324_s18 = scalar_lea.vmem [#allocation8], %s4407_s26 }
  0x73   : > { %v245_v13 = vpack.c.bf16 %v221_v12, %v221_v12  ;;  %v5088_v21 = vld [vmem:[#allocation7 + $0x10] sm:$0xff]  ;;  %v5090_v22 = vld [vmem:[#allocation7 + $0x8] sm:$0xff]  ;;  %v5092_v23 = vld [vmem:[#allocation7 + $0x18] sm:$0xff]  ;;  %vm427_vm4 = vcmask 261120   ;;  %vm536_vm5 = vcmask 130048   ;;  %vm641_vm6 = vcmask 1043456  }
  0x74   : > { %v278_v15 = vand.u32 %v5068_v5, %v246_v10  ;;  %v269_v16 = vand.u32 %v5068_v5, %v243_v11  ;;  %280 = vmatprep.subr.bf16.mxu0 %v272_v14  ;;  %v5094_v26 = vld [vmem:[#allocation7 + $0x20] sm:$0xff]  ;;  %v5096_v27 = vld [vmem:[#allocation7 + $0x30] sm:$0xff]  ;;  %v5100_v32 = vld [vmem:[#allocation7 + $0x28] sm:$0xff]  ;;  %vm637_vm7 = vcmask 64512   ;;  %vm751_vm8 = vcmask 23552   ;;  %s4537_s20 = sshll.u32 %s4908_s16, 11 }
  0x75   : > { %v275_v18 = vand.u32 %v5068_v5, %v245_v13  ;;  %v5102_v33 = vld [vmem:[#allocation7 + $0x38] sm:$0xff]  ;;  %v5110_v52 = vld [vmem:[#allocation7 + $0x40] sm:$0xff]  ;;  %v5112_v53 = vld [vmem:[#allocation7 + $0x50] sm:$0xff]  ;;  %s4309_s24 = sshll.u32 %s5324_s18, 4  ;;  %s5779_s22 = scalar_lea.hbm %s5827_s3, %s4537_s20  ;;  %s5781_s24 = int_to_ptr.vmem [resolvable:$true] %s4309_s24 }
  0x76   : > { %333 = vmatprep.subr.bf16.mxu1 %v278_v15  ;;  %281 = vmatpush1.bf16.msra.mxu0 %v269_v16  ;;  %v5114_v56 = vld [vmem:[#allocation7 + $0x48] sm:$0xff]  ;;  %v5116_v57 = vld [vmem:[#allocation7 + $0x58] sm:$0xff]  ;;  %v5118_v62 = vld [vmem:[#allocation7 + $0x60] sm:$0xff]  ;;  %s4295_s16 = scalar_lea.sflag [#allocation4], %s5048_s21  ;;  %s4785_s4 = scalar_lea.vmem %s5781_s24, 2048 }
  0x77   : > { %334 = vmatpush1.bf16.msra.mxu1 %v275_v18  ;;  %v5120_v63 = vld [vmem:[#allocation7 + $0x70] sm:$0xff]  ;;  %v5124_v7 = vld [vmem:[#allocation7 + $0x68] sm:$0xff]  ;;  %v5126_v8 = vld [vmem:[#allocation7 + $0x78] sm:$0xff]  ;;  %p4786_p1 = scmp.ne.s32.totalorder %s5781_s24, %s4785_s4  ;;  %s4866_s5 = smov [#allocation8]  }
  0x78   : > { %s4789_s7 = sshll.u32 %s4866_s5, 4  ;;  %s4790_s7 = int_to_ptr.vmem [resolvable:$false] %s4789_s7 }
  0x79   : > { %4413 = vmatmul.mubr.msk.bf16.vlgmr.msra.gmra.mrb[0].mxu0 %vm257_vm3, %v4611_v17  ;;  %p4787_p2 = pnand %p4786_p1, %p5002_p6  ;;  %s4791_s8 = scalar_lea.vmem %s4790_s7, 4096 }
  0x7a   : > { %4415 = vmatmul.mubr.msk.bf16.vlgmr.msra.gmra.mrb[0].mxu1 %vm257_vm3, %v4611_v17  ;;  %322 = vmatprep.mubr.bf16.mxu0 %v5831_v3  ;;  %p4792_p8 = scmp.lt.s32.totalorder %s5781_s24, %s4790_s7  ;;  %p4793_p13 = scmp.lt.s32.totalorder %s4791_s8, %s4785_s4 }
  0x7b   : > { %375 = vmatprep.mubr.bf16.mxu1 %v5831_v3  ;;  %p4788_p4 = pneg %p4787_p2 }
  0x7c   : > { %p4794_p3 = por %p4793_p13, %p4792_p8 }
  0x7e   : > { %p4795_p7 = pnand %p4794_p3, %p4788_p4 }
  0x81   : > { %4414 = vmatmul.mubr.msk.bf16.gmra.mrb[4].mxu0 %vm257_vm3, %v4612_v19 }
  0x82   : > { %4416 = vmatmul.mubr.msk.bf16.gmra.mrb[4].mxu1 %vm257_vm3, %v4612_v19  ;;  %463 = vmatprep.mubr.bf16.mxu0 %v5831_v3 }
  0x83   : > { %506 = vmatprep.mubr.bf16.mxu1 %v5831_v3 }
 0x14c   : > { %v314_v24 = vpop.f32.mrb[0].mxu0 }
 0x14d   : > { %v367_v25 = vpop.f32.mrb[0].mxu1  ;;  %v315_v28 = vadd.f32 %v314_v24, %v5086_v20  ;;  %v316_v30 = vpop.f32.mrb[1].mxu0 }
 0x14e   : > { %v368_v29 = vadd.f32 %v367_v25, %v5088_v21  ;;  %v369_v31 = vpop.f32.mrb[1].mxu1  ;;  %v317_v34 = vadd.f32 %v316_v30, %v5090_v22  ;;  %v318_v36 = vpop.f32.mrb[2].mxu0 }
 0x14f   : > { %v370_v35 = vadd.f32 %v369_v31, %v5092_v23  ;;  %v371_v37 = vpop.f32.mrb[2].mxu1  ;;  %v319_v38 = vadd.f32 %v318_v36, %v5094_v26  ;;  %v320_v40 = vpop.f32.mrb[3].mxu0  ;;  %v386_v44 = vmax.f32 %v315_v28, 0.0 }
 0x150   : > { %v372_v39 = vadd.f32 %v371_v37, %v5096_v27  ;;  %v373_v41 = vpop.f32.mrb[3].mxu1  ;;  %v321_v42 = vadd.f32 %v320_v40, %v5100_v32  ;;  %v388_v45 = vmax.f32 %v368_v29, 0.0  ;;  %v387_v48 = vmax.f32 %v317_v34, 0.0  ;;  %v5138_v40 = vld [vmem:[#allocation7 + $0x80] sm:$0xff] }
 0x151   : > { %v374_v43 = vadd.f32 %v373_v41, %v5102_v33  ;;  %v390_v46 = vmax.f32 %v319_v38, 0.0  ;;  %v389_v49 = vmax.f32 %v370_v35, 0.0  ;;  %v5140_v41 = vld [vmem:[#allocation7 + $0x90] sm:$0xff] }
 0x152   : > { %v392_v47 = vmax.f32 %v372_v39, 0.0  ;;  %v391_v50 = vmax.f32 %v321_v42, 0.0  ;;  %v4613_v39 = vld [vmem:[#allocation5 + $0x10] sm:$0xff]   ;;  %v5142_v42 = vld [vmem:[#allocation7 + $0x88] sm:$0xff] }
 0x153   : > { %v393_v51 = vmax.f32 %v374_v43, 0.0  ;;  %v414_v54 = vpack.c.bf16 %v390_v46, %v386_v44  ;;  %v5144_v43 = vld [vmem:[#allocation7 + $0x98] sm:$0xff]  ;;  %v5146_v46 = vld [vmem:[#allocation7 + $0xa0] sm:$0xff] }
 0x154   : > { %v416_v55 = vpack.c.bf16 %v392_v47, %v388_v45  ;;  %v415_v58 = vpack.c.bf16 %v391_v50, %v387_v48  ;;  %v324_v60 = vpop.f32.mrb[4].mxu0  ;;  %v5148_v47 = vld [vmem:[#allocation7 + $0xb0] sm:$0xff] }
 0x155   : > { %v417_v59 = vpack.c.bf16 %v393_v51, %v389_v49  ;;  %v377_v61 = vpop.f32.mrb[4].mxu1  ;;  %v325_v0 = vadd.f32 %v324_v60, %v5110_v52  ;;  %v326_v4 = vpop.f32.mrb[5].mxu0 }
 0x156   : > { %v378_v1 = vadd.f32 %v377_v61, %v5112_v53  ;;  %v379_v6 = vpop.f32.mrb[5].mxu1  ;;  %v327_v9 = vadd.f32 %v326_v4, %v5114_v56  ;;  %v328_v11 = vpop.f32.mrb[6].mxu0  ;;  %431 = vmatprep.subr.bf16.mxu0 %v415_v58 }
 0x157   : > { %v380_v10 = vadd.f32 %v379_v6, %v5116_v57  ;;  %v381_v12 = vpop.f32.mrb[6].mxu1  ;;  %474 = vmatprep.subr.bf16.mxu1 %v417_v59  ;;  %v329_v13 = vadd.f32 %v328_v11, %v5118_v62  ;;  %v330_v15 = vpop.f32.mrb[7].mxu0  ;;  %432 = vmatpush1.bf16.msra.mxu0 %v414_v54  ;;  %v394_v19 = vmax.f32 %v325_v0, 0.0  ;;  %v5152_v54 = vld [vmem:[#allocation7 + $0xa8] sm:$0xff] }
 0x158   : > { %v382_v14 = vadd.f32 %v381_v12, %v5120_v63  ;;  %v383_v16 = vpop.f32.mrb[7].mxu1  ;;  %475 = vmatpush1.bf16.msra.mxu1 %v416_v55  ;;  %v331_v17 = vadd.f32 %v330_v15, %v5124_v7  ;;  %v396_v24 = vmax.f32 %v378_v1, 0.0  ;;  %v395_v29 = vmax.f32 %v327_v9, 0.0  ;;  %v5154_v55 = vld [vmem:[#allocation7 + $0xb8] sm:$0xff] }
 0x159   : > { %v384_v18 = vadd.f32 %v383_v16, %v5126_v8  ;;  %v398_v25 = vmax.f32 %v329_v13, 0.0  ;;  %v397_v30 = vmax.f32 %v380_v10, 0.0 }
 0x15a   : > { %v400_v28 = vmax.f32 %v382_v14, 0.0  ;;  %v399_v31 = vmax.f32 %v331_v17, 0.0 }
 0x15b   : > { %v401_v34 = vmax.f32 %v384_v18, 0.0  ;;  %v418_v35 = vpack.c.bf16 %v398_v25, %v394_v19 }
 0x15c   : > { %v420_v36 = vpack.c.bf16 %v400_v28, %v396_v24  ;;  %v419_v37 = vpack.c.bf16 %v399_v31, %v395_v29  ;;  %v526_v29 = vld [vmem:[#allocation5 + $0x20] sm:$0xf]  ;;  %v5168_v31 = vld [vmem:[#allocation7 + $0x110] sm:$0xff] }
 0x15d   : > { %v421_v38 = vpack.c.bf16 %v401_v34, %v397_v30  ;;  %v5166_v30 = vld [vmem:[#allocation7 + $0x100] sm:$0xff]  ;;  %v5170_v34 = vld [vmem:[#allocation7 + $0x108] sm:$0xff] }
 0x15e   : > { %433 = vmatprep.subr.bf16.mxu0 %v419_v37 }
 0x15f   : > { %476 = vmatprep.subr.bf16.mxu1 %v421_v38  ;;  %434 = vmatpush1.bf16.msra.mxu0 %v418_v35  ;;  %v5172_v35 = vld [vmem:[#allocation7 + $0x118] sm:$0xff] }
 0x160   : > { %477 = vmatpush1.bf16.msra.mxu1 %v420_v36 }
 0x162   : > { %4418 = vmatmul.mubr.msk.bf16.vlgmr.msra.gmra.mrb[8].mxu0 %vm427_vm4, %v4613_v39 }
 0x163   : > { %4419 = vmatmul.mubr.msk.bf16.vlgmr.msra.gmra.mrb[8].mxu1 %vm427_vm4, %v4613_v39  ;;  %572 = vmatprep.mubr.bf16.mxu0 %v5831_v3 }
 0x164   : > { %613 = vmatprep.mubr.bf16.mxu1 %v5831_v3 }
 0x235   : > { %v465_v44 = vpop.f32.mrb[8].mxu0 }
 0x236   : > { %v508_v45 = vpop.f32.mrb[8].mxu1  ;;  %v466_v48 = vadd.f32 %v465_v44, %v5138_v40  ;;  %v467_v50 = vpop.f32.mrb[9].mxu0 }
 0x237   : > { %v509_v49 = vadd.f32 %v508_v45, %v5140_v41  ;;  %v510_v51 = vpop.f32.mrb[9].mxu1  ;;  %v468_v58 = vadd.f32 %v467_v50, %v5142_v42  ;;  %v469_v60 = vpop.f32.mrb[10].mxu0 }
 0x238   : > { %v511_v59 = vadd.f32 %v510_v51, %v5144_v43  ;;  %v512_v61 = vpop.f32.mrb[10].mxu1  ;;  %v470_v0 = vadd.f32 %v469_v60, %v5146_v46  ;;  %v471_v4 = vpop.f32.mrb[11].mxu0  ;;  %v517_v11 = vmax.f32 %v466_v48, 0.0 }
 0x239   : > { %v513_v1 = vadd.f32 %v512_v61, %v5148_v47  ;;  %v514_v6 = vpop.f32.mrb[11].mxu1  ;;  %v472_v9 = vadd.f32 %v471_v4, %v5152_v54  ;;  %v519_v12 = vmax.f32 %v509_v49, 0.0  ;;  %v518_v15 = vmax.f32 %v468_v58, 0.0 }
 0x23a   : > { %v515_v10 = vadd.f32 %v514_v6, %v5154_v55  ;;  %v521_v13 = vmax.f32 %v470_v0, 0.0  ;;  %v520_v16 = vmax.f32 %v511_v59, 0.0 }
 0x23b   : > { %v523_v14 = vmax.f32 %v513_v1, 0.0  ;;  %v522_v17 = vmax.f32 %v472_v9, 0.0 }
 0x23c   : > { %v524_v18 = vmax.f32 %v515_v10, 0.0  ;;  %v532_v19 = vpack.c.bf16 %v521_v13, %v517_v11  ;;  %v627_v13 = vld [vmem:[#allocation5 + $0x30] sm:$0x3] }
 0x23d   : > { %v534_v24 = vpack.c.bf16 %v523_v14, %v519_v12  ;;  %v533_v25 = vpack.c.bf16 %v522_v17, %v518_v15  ;;  %v629_v14 = vld [vmem:[#allocation7 + $0x180] sm:$0x7]  ;;  %v631_v15 = vld [vmem:[#allocation7 + $0x190] sm:$0x7]  ;;  %v632_v17 = vld [vmem:[#allocation7 + $0x198] sm:$0x7] }
 0x23e   : > { %v535_v28 = vpack.c.bf16 %v524_v18, %v520_v16  ;;  %v630_v16 = vld [vmem:[#allocation7 + $0x188] sm:$0x7] }
 0x23f   : > { %540 = vmatprep.subr.bf16.mxu0 %v533_v25 }
 0x240   : > { %581 = vmatprep.subr.bf16.mxu1 %v535_v28  ;;  %541 = vmatpush1.bf16.msra.mxu0 %v532_v19 }
 0x241   : > { %582 = vmatpush1.bf16.msra.mxu1 %v534_v24 }
 0x243   : > { %4420 = vmatmul.mubr.msk.bf16.vlgmr.msra.gmra.mrb[12].mxu0 %vm536_vm5, %v526_v29 }
 0x244   : > { %4421 = vmatmul.mubr.msk.bf16.vlgmr.msra.gmra.mrb[12].mxu1 %vm536_vm5, %v526_v29  ;;  %686 = vmatprep.mubr.bf16.mxu0 %v5831_v3 }
 0x245   : > { %727 = vmatprep.mubr.bf16.mxu1 %v5831_v3 }
 0x316   : > { %v574_v36 = vpop.f32.mrb[12].mxu0 }
 0x317   : > { %v615_v37 = vpop.f32.mrb[12].mxu1  ;;  %v575_v38 = vadd.f32 %v574_v36, %v5166_v30  ;;  %v576_v44 = vpop.f32.mrb[13].mxu0 }
 0x318   : > { %v616_v39 = vadd.f32 %v615_v37, %v5168_v31  ;;  %v617_v45 = vpop.f32.mrb[13].mxu1  ;;  %v577_v48 = vadd.f32 %v576_v44, %v5170_v34  ;;  %v578_v50 = vpop.f32.mrb[14].mxu0 }
 0x319   : > { %v618_v49 = vadd.f32 %v617_v45, %v5172_v35  ;;  %v619_v51 = vpop.f32.mrb[14].mxu1  ;;  %v622_v58 = vmax.f32 %v575_v38, 0.0  ;;  %v579_v60 = vpop.f32.mrb[15].mxu0 }
 0x31a   : > { %v624_v59 = vmax.f32 %v616_v39, 0.0  ;;  %v620_v61 = vpop.f32.mrb[15].mxu1  ;;  %v623_v0 = vmax.f32 %v577_v48, 0.0 }
 0x31b   : > { %v625_v1 = vmax.f32 %v618_v49, 0.0  ;;  %v633_v4 = vpack.c.bf16 %v622_v58, %v622_v58 }
 0x31c   : > { %v635_v6 = vpack.c.bf16 %v624_v59, %v624_v59  ;;  %v634_v9 = vpack.c.bf16 %v623_v0, %v623_v0 }
 0x31d   : > { %v636_v10 = vpack.c.bf16 %v625_v1, %v625_v1  ;;  %v643_v11 = vsel %vm641_vm6, %v633_v4, 0 }
 0x31e   : > { %v649_v12 = vsel %vm641_vm6, %v635_v6, 0  ;;  %4422 = vmatprep.subr.msk.bf16.mxu0 %vm641_vm6, %v634_v9  ;;  %v741_v9 = vld [vmem:[#allocation5 + $0x40] sm:$0xf] }
 0x31f   : > { %4424 = vmatprep.subr.msk.bf16.mxu1 %vm641_vm6, %v636_v10  ;;  %655 = vmatpush1.bf16.msra.mxu0 %v643_v11  ;;  %v5194_v10 = vld [vmem:[#allocation7 + $0x200] sm:$0xff]  ;;  %v5196_v11 = vld [vmem:[#allocation7 + $0x210] sm:$0xff] }
 0x320   : > { %696 = vmatpush1.bf16.msra.mxu1 %v649_v12  ;;  %v5198_v12 = vld [vmem:[#allocation7 + $0x208] sm:$0xff] }
 0x322   : > { %4423 = vmatmul.mubr.msk.bf16.vlgmr.msra.gmra.mrb[16].mxu0 %vm637_vm7, %v627_v13 }
 0x323   : > { %4425 = vmatmul.mubr.msk.bf16.vlgmr.msra.gmra.mrb[16].mxu1 %vm637_vm7, %v627_v13  ;;  %802 = vmatprep.mubr.bf16.mxu0 %v5831_v3 }
 0x324   : > { %843 = vmatprep.mubr.bf16.mxu1 %v5831_v3 }
 0x3f5   : > { %v688_v18 = vpop.f32.mrb[16].mxu0 }
 0x3f6   : > { %v729_v19 = vpop.f32.mrb[16].mxu1  ;;  %v689_v24 = vadd.f32 %v688_v18, %v629_v14  ;;  %v690_v28 = vpop.f32.mrb[17].mxu0  ;;  %v5200_v14 = vld [vmem:[#allocation7 + $0x218] sm:$0xff] }
 0x3f7   : > { %v730_v25 = vadd.f32 %v729_v19, %v631_v15  ;;  %v731_v29 = vpop.f32.mrb[17].mxu1  ;;  %v691_v36 = vadd.f32 %v690_v28, %v630_v16  ;;  %v692_v38 = vpop.f32.mrb[18].mxu0  ;;  %5892 = vst [vmem:[#allocation12_spill] sm:$0xff] %v5200_v14 }
 0x3f8   : > { %v732_v37 = vadd.f32 %v731_v29, %v632_v17  ;;  %v733_v39 = vpop.f32.mrb[18].mxu1  ;;  %4635 = vtanh.f32 %v689_v24  ;;  %v693_v44 = vpop.f32.mrb[19].mxu0 }
 0x3f9   : > { %v734_v45 = vpop.f32.mrb[19].mxu1  ;;  %4637 = vtanh.f32 %v730_v25 }
 0x3fa   : > { %4639 = vtanh.f32 %v691_v36 }
 0x3fb   : > { %4641 = vtanh.f32 %v732_v37 }
 0x402   : > { %v4636_v48 = vpop.eup %4635 }
 0x403   : > { %v4638_v49 = vpop.eup %4637  ;;  %v747_v51 = vpack.c.bf16 %v4636_v48, %v4636_v48 }
 0x404   : > { %v4640_v50 = vpop.eup %4639  ;;  %v749_v59 = vpack.c.bf16 %v4638_v49, %v4638_v49 }
 0x405   : > { %v4642_v58 = vpop.eup %4641  ;;  %v748_v60 = vpack.c.bf16 %v4640_v50, %v4640_v50  ;;  %v759_v1 = vand.u32 %v5064_v2, %v747_v51 }
 0x406   : > { %v750_v61 = vpack.c.bf16 %v4642_v58, %v4642_v58  ;;  %v765_v6 = vand.u32 %v5064_v2, %v749_v59 }
 0x407   : > { %v762_v0 = vand.u32 %v5064_v2, %v748_v60  ;;  %v4614_v60 = vld [vmem:[#allocation5 + $0x50] sm:$0xff]  }
 0x408   : > { %v768_v4 = vand.u32 %v5064_v2, %v750_v61  ;;  %v5214_v61 = vld [vmem:[#allocation7 + $0x280] sm:$0xff] }
 0x409   : > { %770 = vmatprep.subr.bf16.mxu0 %v762_v0  ;;  %5893 = vst [vmem:[#allocation13_spill] sm:$0xff] %v5214_v61  ;;  %v5216_v0 = vld [vmem:[#allocation7 + $0x290] sm:$0xff] }
 0x40a   : > { %811 = vmatprep.subr.bf16.mxu1 %v768_v4  ;;  %771 = vmatpush1.bf16.msra.mxu0 %v759_v1  ;;  %5894 = vst [vmem:[#allocation14_spill] sm:$0xff] %v5216_v0  ;;  %v5218_v1 = vld [vmem:[#allocation7 + $0x288] sm:$0xff] }
 0x40b   : > { %812 = vmatpush1.bf16.msra.mxu1 %v765_v6  ;;  %5895 = vst [vmem:[#allocation15_spill] sm:$0xff] %v5218_v1  ;;  %v5220_v6 = vld [vmem:[#allocation7 + $0x298] sm:$0xff] }
 0x40c   : > { %5896 = vst [vmem:[#allocation16_spill] sm:$0xff] %v5220_v6 }
 0x40d   : > { %4426 = vmatmul.mubr.msk.bf16.vlgmr.msra.gmra.mrb[20].mxu0 %vm751_vm8, %v741_v9 }
 0x40e   : > { %4427 = vmatmul.mubr.msk.bf16.vlgmr.msra.gmra.mrb[20].mxu1 %vm751_vm8, %v741_v9  ;;  %924 = vmatprep.mubr.bf16.mxu0 %v5831_v3  ;;  %v5222_v9 = vld [vmem:[#allocation7 + $0x2a0] sm:$0xff] }
 0x40f   : > { %967 = vmatprep.mubr.bf16.mxu1 %v5831_v3  ;;  %5897 = vst [vmem:[#allocation17_spill] sm:$0xff] %v5222_v9 }
 0x4e0   : > { %v804_v13 = vpop.f32.mrb[20].mxu0 }
 0x4e1   : > { %v805_v15 = vadd.f32 %v804_v13, %v5194_v10  ;;  %v845_v16 = vpop.f32.mrb[20].mxu1  ;;  %v806_v17 = vpop.f32.mrb[21].mxu0 }
 0x4e2   : > { %v846_v18 = vadd.f32 %v845_v16, %v5196_v11  ;;  %v807_v19 = vadd.f32 %v806_v17, %v5198_v12  ;;  %v847_v24 = vpop.f32.mrb[21].mxu1  ;;  %v808_v25 = vpop.f32.mrb[22].mxu0  ;;  %v5225_v17 = vld [vmem:[#allocation7 + $0x2b0] sm:$0xff] }
 0x4e3   : > { %v852_v28 = vmax.f32 %v805_v15, 0.0  ;;  %v848_v29 = vadd.f32 %v847_v24, %v5200_v14  ;;  %v849_v36 = vpop.f32.mrb[22].mxu1  ;;  %v809_v37 = vpop.f32.mrb[23].mxu0  ;;  %5898 = vst [vmem:[#allocation18_spill] sm:$0xff] %v5225_v17 }
 0x4e4   : > { %v854_v38 = vmax.f32 %v846_v18, 0.0  ;;  %v853_v39 = vmax.f32 %v807_v19, 0.0  ;;  %v850_v44 = vpop.f32.mrb[23].mxu1  ;;  %v5227_v18 = vld [vmem:[#allocation7 + $0x2a8] sm:$0xff] }
 0x4e5   : > { %v868_v45 = vpack.c.bf16 %v852_v28, %v852_v28  ;;  %v855_v48 = vmax.f32 %v848_v29, 0.0  ;;  %5899 = vst [vmem:[#allocation19_spill] sm:$0xff] %v5227_v18  ;;  %v5231_v29 = vld [vmem:[#allocation7 + $0x2b8] sm:$0xff] }
 0x4e6   : > { %v870_v49 = vpack.c.bf16 %v854_v38, %v854_v38  ;;  %v869_v50 = vpack.c.bf16 %v853_v39, %v853_v39  ;;  %5900 = vst [vmem:[#allocation20_spill] sm:$0xff] %v5231_v29 }
 0x4e7   : > { %v871_v51 = vpack.c.bf16 %v855_v48, %v855_v48  ;;  %v881_v58 = vsel %vm641_vm6, %v868_v45, 0 }
 0x4e8   : > { %4429 = vmatprep.subr.msk.bf16.mxu0 %vm641_vm6, %v869_v50  ;;  %v887_v59 = vsel %vm641_vm6, %v870_v49, 0 }
 0x4e9   : > { %4431 = vmatprep.subr.msk.bf16.mxu1 %vm641_vm6, %v871_v51  ;;  %893 = vmatpush1.bf16.msra.mxu0 %v881_v58 }
 0x4ea   : > { %936 = vmatpush1.bf16.msra.mxu1 %v887_v59 }
 0x4ec   : > { %4430 = vmatmul.mubr.msk.bf16.vlgmr.msra.gmra.mrb[24].mxu0 %vm637_vm7, %v4614_v60 }
 0x4ed   : > { %4432 = vmatmul.mubr.msk.bf16.vlgmr.msra.gmra.mrb[24].mxu1 %vm637_vm7, %v4614_v60  ;;  %1060 = vmatprep.mubr.bf16.mxu0 %v5831_v3 }
 0x4ee   : > { %1113 = vmatprep.mubr.bf16.mxu1 %v5831_v3 }
 0x5bf   : > { %v926_v4 = vpop.f32.mrb[24].mxu0 }
 0x5c0   : > { %v927_v13 = vadd.f32 %v926_v4, %v5214_v61  ;;  %v969_v15 = vpop.f32.mrb[24].mxu1  ;;  %v928_v16 = vpop.f32.mrb[25].mxu0 }
 0x5c1   : > { %v970_v19 = vadd.f32 %v969_v15, %v5216_v0  ;;  %v929_v24 = vadd.f32 %v928_v16, %v5218_v1  ;;  %v971_v25 = vpop.f32.mrb[25].mxu1  ;;  %v930_v28 = vpop.f32.mrb[26].mxu0 }
 0x5c2   : > { %v972_v36 = vadd.f32 %v971_v25, %v5220_v6  ;;  %v931_v37 = vadd.f32 %v930_v28, %v5222_v9  ;;  %v973_v38 = vpop.f32.mrb[26].mxu1  ;;  %v932_v39 = vpop.f32.mrb[27].mxu0  ;;  %v978_v49 = vmax.f32 %v927_v13, 0.0  ;;  %v4615_v6 = vld [vmem:[#allocation5 + $0x60] sm:$0xff]   ;;  %v5901_v13 = vmov 0  }
 0x5c3   : > { %v974_v44 = vadd.f32 %v973_v38, %v5225_v17  ;;  %v933_v45 = vadd.f32 %v932_v39, %v5227_v18  ;;  %v975_v48 = vpop.f32.mrb[27].mxu1  ;;  %v980_v58 = vmax.f32 %v970_v19, 0.0  ;;  %v979_v59 = vmax.f32 %v929_v24, 0.0  ;;  %v4616_v19 = vld [vmem:[#allocation5 + $0x68] sm:$0xff]   ;;  %v5270_v18 = vld [vmem:[#allocation7 + $0x340] sm:$0xff] }
 0x5c4   : > { %v982_v50 = vmax.f32 %v931_v37, 0.0  ;;  %v976_v51 = vadd.f32 %v975_v48, %v5231_v29  ;;  %v981_v15 = vmax.f32 %v972_v36, 0.0  ;;  %v5250_v24 = vld [vmem:[#allocation7 + $0x308] sm:$0xff]  ;;  %v5252_v36 = vld [vmem:[#allocation7 + $0x318] sm:$0xff]  ;;  %v5254_v37 = vld [vmem:[#allocation7 + $0x320] sm:$0xff]  ;;  %5910 = vst [vmem:[#allocation29_spill] sm:$0xff] %v5270_v18 }
 0x5c5   : > { %v984_v60 = vmax.f32 %v974_v44, 0.0  ;;  %v983_v4 = vmax.f32 %v933_v45, 0.0  ;;  %5904 = vst [vmem:[#allocation23_spill] sm:$0xff] %v5250_v24  ;;  %5905 = vst [vmem:[#allocation24_spill] sm:$0xff] %v5252_v36  ;;  %v5257_v45 = vld [vmem:[#allocation7 + $0x330] sm:$0xff]  ;;  %v5259_v48 = vld [vmem:[#allocation7 + $0x328] sm:$0xff] }
 0x5c6   : > { %v1008_v16 = vpack.c.bf16 %v982_v50, %v978_v49  ;;  %v985_v25 = vmax.f32 %v976_v51, 0.0  ;;  %5906 = vst [vmem:[#allocation25_spill] sm:$0xff] %v5254_v37  ;;  %5907 = vst [vmem:[#allocation26_spill] sm:$0xff] %v5257_v45 }
 0x5c7   : > { %v1010_v3 = vpack.c.bf16 %v984_v60, %v980_v58  ;;  %v1009_v28 = vpack.c.bf16 %v983_v4, %v979_v59  ;;  %5908 = vst [vmem:[#allocation27_spill] sm:$0xff] %v5259_v48  ;;  %v5263_v59 = vld [vmem:[#allocation7 + $0x338] sm:$0xff] }
 0x5c8   : > { %v1011_v9 = vpack.c.bf16 %v985_v25, %v981_v15  ;;  %5909 = vst [vmem:[#allocation28_spill] sm:$0xff] %v5263_v59 }
 0x5c9   : > { %1028 = vmatprep.subr.bf16.mxu0 %v1009_v28 }
 0x5ca   : > { %1081 = vmatprep.subr.bf16.mxu1 %v1011_v9  ;;  %1029 = vmatpush1.bf16.msra.mxu0 %v1008_v16  ;;  %v5246_v9 = vld [vmem:[#allocation7 + $0x300] sm:$0xff] }
 0x5cb   : > { %1082 = vmatpush1.bf16.msra.mxu1 %v1010_v3  ;;  %5902 = vst [vmem:[#allocation21_spill] sm:$0xff] %v5246_v9  ;;  %v5248_v3 = vld [vmem:[#allocation7 + $0x310] sm:$0xff] }
 0x5cc   : > { %5903 = vst [vmem:[#allocation22_spill] sm:$0xff] %v5248_v3 }
 0x5cd   : > { %4435 = vmatmul.mubr.msk.bf16.vlgmr.msra.gmra.mrb[28].mxu0 %vm536_vm5, %v4615_v6 }
 0x5ce   : > { %4437 = vmatmul.mubr.msk.bf16.vlgmr.msra.gmra.mrb[28].mxu1 %vm536_vm5, %v4615_v6  ;;  %1070 = vmatprep.mubr.bf16.mxu0 %v5901_v13 }
 0x5cf   : > { %1123 = vmatprep.mubr.bf16.mxu1 %v5901_v13 }
 0x5d5   : > { %4436 = vmatmul.mubr.msk.bf16.gmra.mrb[32].mxu0 %vm536_vm5, %v4616_v19 }
 0x5d6   : > { %4438 = vmatmul.mubr.msk.bf16.gmra.mrb[32].mxu1 %vm536_vm5, %v4616_v19  ;;  %1200 = vmatprep.mubr.bf16.mxu0 %v5901_v13 }
 0x5d7   : > { %1241 = vmatprep.mubr.bf16.mxu1 %v5901_v13 }
 0x6a0   : > { %v1062_v6 = vpop.f32.mrb[28].mxu0 }
 0x6a1   : > { %v1063_v38 = vadd.f32 %v1062_v6, %v5246_v9  ;;  %v1115_v39 = vpop.f32.mrb[28].mxu1  ;;  %v1064_v44 = vpop.f32.mrb[29].mxu0 }
 0x6a2   : > { %v1116_v49 = vadd.f32 %v1115_v39, %v5248_v3  ;;  %v1065_v50 = vadd.f32 %v1064_v44, %v5250_v24  ;;  %v1117_v51 = vpop.f32.mrb[29].mxu1  ;;  %v1066_v58 = vpop.f32.mrb[30].mxu0 }
 0x6a3   : > { %v1118_v60 = vadd.f32 %v1117_v51, %v5252_v36  ;;  %v1067_v4 = vadd.f32 %v1066_v58, %v5254_v37  ;;  %v1119_v15 = vpop.f32.mrb[30].mxu1  ;;  %v1068_v16 = vpop.f32.mrb[31].mxu0  ;;  %v1134_v6 = vmax.f32 %v1063_v38, 0.0  ;;  %v5272_v36 = vld [vmem:[#allocation7 + $0x350] sm:$0xff] }
 0x6a4   : > { %v1120_v25 = vadd.f32 %v1119_v15, %v5257_v45  ;;  %v1069_v28 = vadd.f32 %v1068_v16, %v5259_v48  ;;  %v1121_v19 = vpop.f32.mrb[31].mxu1  ;;  %v1136_v44 = vmax.f32 %v1116_v49, 0.0  ;;  %v1135_v24 = vmax.f32 %v1065_v50, 0.0  ;;  %5911 = vst [vmem:[#allocation30_spill] sm:$0xff] %v5272_v36  ;;  %v5274_v15 = vld [vmem:[#allocation7 + $0x348] sm:$0xff]  ;;  %v5278_v49 = vld [vmem:[#allocation7 + $0x360] sm:$0xff] }
 0x6a5   : > { %v1138_v9 = vmax.f32 %v1067_v4, 0.0  ;;  %v1122_v39 = vadd.f32 %v1121_v19, %v5263_v59  ;;  %v1137_v51 = vmax.f32 %v1118_v60, 0.0  ;;  %5912 = vst [vmem:[#allocation31_spill] sm:$0xff] %v5274_v15  ;;  %v5276_v4 = vld [vmem:[#allocation7 + $0x358] sm:$0xff]  ;;  %5914 = vst [vmem:[#allocation33_spill] sm:$0xff] %v5278_v49  ;;  %v5281_v19 = vld [vmem:[#allocation7 + $0x370] sm:$0xff] }
 0x6a6   : > { %v1140_v3 = vmax.f32 %v1120_v25, 0.0  ;;  %v1139_v29 = vmax.f32 %v1069_v28, 0.0  ;;  %5913 = vst [vmem:[#allocation32_spill] sm:$0xff] %v5276_v4  ;;  %5915 = vst [vmem:[#allocation34_spill] sm:$0xff] %v5281_v19 }
 0x6a7   : > { %v1157_v58 = vpack.c.bf16 %v1138_v9, %v1134_v6  ;;  %v1141_v37 = vmax.f32 %v1122_v39, 0.0  ;;  %v5283_v9 = vld [vmem:[#allocation7 + $0x368] sm:$0xff] }
 0x6a8   : > { %v1159_v16 = vpack.c.bf16 %v1140_v3, %v1136_v44  ;;  %v1158_v48 = vpack.c.bf16 %v1139_v29, %v1135_v24  ;;  %v1072_v38 = vpop.f32.mrb[32].mxu0  ;;  %5916 = vst [vmem:[#allocation35_spill] sm:$0xff] %v5283_v9  ;;  %v1259_v6 = vld [vmem:[%s5054_s30 + $0x28] sm:$0x1f]  ;;  %v5288_v44 = vld [vmem:[#allocation7 + $0x378] sm:$0xff] }
 0x6a9   : > { %v1160_v50 = vpack.c.bf16 %v1141_v37, %v1137_v51  ;;  %v1073_v25 = vadd.f32 %v1072_v38, %v5270_v18  ;;  %v1125_v28 = vpop.f32.mrb[32].mxu1  ;;  %v1074_v60 = vpop.f32.mrb[33].mxu0  ;;  %v1261_v37 = vld [vmem:[%s5054_s30 + $0x38] sm:$0x1f] }
 0x6aa   : > { %v1126_v39 = vadd.f32 %v1125_v28, %v5272_v36  ;;  %v1075_v29 = vadd.f32 %v1074_v60, %v5274_v15  ;;  %v1127_v3 = vpop.f32.mrb[33].mxu1  ;;  %v1076_v24 = vpop.f32.mrb[34].mxu0  ;;  %1168 = vmatprep.subr.bf16.mxu0 %v1158_v48  ;;  %v1283_v36 = vpack.c.bf16 %v1259_v6, %v1259_v6  ;;  %v1258_v48 = vld [vmem:[%s5054_s30 + $0x20] sm:$0x1f] }
 0x6ab   : > { %v1128_v51 = vadd.f32 %v1127_v3, %v5276_v4  ;;  %v1077_v38 = vadd.f32 %v1076_v24, %v5278_v49  ;;  %v1129_v18 = vpop.f32.mrb[34].mxu1  ;;  %1209 = vmatprep.subr.bf16.mxu1 %v1160_v50  ;;  %v1078_v59 = vpop.f32.mrb[35].mxu0  ;;  %1169 = vmatpush1.bf16.msra.mxu0 %v1157_v58  ;;  %v1142_v45 = vmax.f32 %v1073_v25, 0.0  ;;  %v1285_v3 = vpack.c.bf16 %v1261_v37, %v1261_v37  ;;  %v1260_v4 = vld [vmem:[%s5054_s30 + $0x30] sm:$0x1f] }
 0x6ac   : > { %v1130_v28 = vadd.f32 %v1129_v18, %v5281_v19  ;;  %v1079_v60 = vadd.f32 %v1078_v59, %v5283_v9  ;;  %v1131_v15 = vpop.f32.mrb[35].mxu1  ;;  %1210 = vmatpush1.bf16.msra.mxu1 %v1159_v16  ;;  %v1144_v0 = vmax.f32 %v1126_v39, 0.0  ;;  %v1143_v24 = vmax.f32 %v1075_v29, 0.0 }
 0x6ad   : > { %v1146_v17 = vmax.f32 %v1077_v38, 0.0  ;;  %v1132_v1 = vadd.f32 %v1131_v15, %v5288_v44  ;;  %v1145_v61 = vmax.f32 %v1128_v51, 0.0  ;;  %v1282_v18 = vpack.c.bf16 %v1258_v48, %v1258_v48  ;;  %v1151_v15 = vld [vmem:[#allocation5 + $0x70] sm:$0x7] }
 0x6ae   : > { %v1148_v49 = vmax.f32 %v1130_v28, 0.0  ;;  %v1147_v50 = vmax.f32 %v1079_v60, 0.0  ;;  %v1306_v16 = vand.u32 %v1283_v36, %v5068_v5  ;;  %v1284_v6 = vpack.c.bf16 %v1260_v4, %v1260_v4  ;;  %v1154_v36 = vld [vmem:[#allocation7 + $0x388] sm:$0x1f]  ;;  %v1156_v4 = vld [vmem:[#allocation7 + $0x398] sm:$0x1f] }
 0x6af   : > { %v1161_v58 = vpack.c.bf16 %v1146_v17, %v1142_v45  ;;  %v1149_v14 = vmax.f32 %v1132_v1, 0.0  ;;  %v1312_v25 = vand.u32 %v1285_v3, %v5068_v5  ;;  %v1303_v39 = vand.u32 %v1282_v18, %v5068_v5  ;;  %v1155_v1 = vld [vmem:[#allocation7 + $0x390] sm:$0x1f] }
 0x6b0   : > { %v1163_v19 = vpack.c.bf16 %v1148_v49, %v1144_v0  ;;  %v1162_v59 = vpack.c.bf16 %v1147_v50, %v1143_v24  ;;  %v1309_v17 = vand.u32 %v1284_v6, %v5068_v5  ;;  %v1153_v0 = vld [vmem:[#allocation7 + $0x380] sm:$0x1f] }
 0x6b1   : > { %v1164_v9 = vpack.c.bf16 %v1149_v14, %v1145_v61  ;;  %v4617_v14 = vld [vmem:[#allocation5] sm:$0xff]   ;;  %v4618_v61 = vld [vmem:[#allocation5 + $0x8] sm:$0xff]  }
 0x6b2   : > { %1170 = vmatprep.subr.bf16.mxu0 %v1162_v59 }
 0x6b3   : > { %1211 = vmatprep.subr.bf16.mxu1 %v1164_v9  ;;  %1171 = vmatpush1.bf16.msra.mxu0 %v1161_v58 }
 0x6b4   : > { %1212 = vmatpush1.bf16.msra.mxu1 %v1163_v19  ;;  %1314 = vmatprep.subr.bf16.mxu0 %v1306_v16 }
 0x6b5   : > { %1367 = vmatprep.subr.bf16.mxu1 %v1312_v25 }
 0x6b6   : > { %4439 = vmatmul.mubr.msk.bf16.vlgmr.msra.gmra.mrb[36].mxu0 %vm427_vm4, %v1151_v15 }
 0x6b7   : > { %4440 = vmatmul.mubr.msk.bf16.vlgmr.msra.gmra.mrb[36].mxu1 %vm427_vm4, %v1151_v15  ;;  %1315 = vmatpush1.bf16.msra.mxu0 %v1303_v39 }
 0x6b8   : > { %1368 = vmatpush1.bf16.msra.mxu1 %v1309_v17  ;;  %1346 = vmatprep.mubr.bf16.mxu0 %v5901_v13 }
 0x6b9   : > { %1399 = vmatprep.mubr.bf16.mxu1 %v5901_v13 }
 0x6be   : > { %4443 = vmatmul.mubr.msk.bf16.vlgmr.msra.gmra.mrb[40].mxu0 %vm257_vm3, %v4617_v14 }
 0x6bf   : > { %4445 = vmatmul.mubr.msk.bf16.vlgmr.msra.gmra.mrb[40].mxu1 %vm257_vm3, %v4617_v14  ;;  %1356 = vmatprep.mubr.bf16.mxu0 %v5901_v13 }
 0x6c0   : > { %1409 = vmatprep.mubr.bf16.mxu1 %v5901_v13 }
 0x6c6   : > { %4444 = vmatmul.mubr.msk.bf16.gmra.mrb[44].mxu0 %vm257_vm3, %v4618_v61 }
 0x6c7   : > { %4446 = vmatmul.mubr.msk.bf16.gmra.mrb[44].mxu1 %vm257_vm3, %v4618_v61  ;;  %1494 = vmatprep.mubr.bf16.mxu0 %v5901_v13 }
 0x6c8   : > { %1537 = vmatprep.mubr.bf16.mxu1 %v5901_v13 }
 0x789   : > { %v1202_v45 = vpop.f32.mrb[36].mxu0 }
 0x78a   : > { %v1203_v49 = vadd.f32 %v1202_v45, %v1153_v0  ;;  %v1243_v19 = vpop.f32.mrb[36].mxu1  ;;  %v1204_v9 = vpop.f32.mrb[37].mxu0 }
 0x78b   : > { %v1244_v29 = vadd.f32 %v1243_v19, %v1155_v1  ;;  %v1205_v37 = vadd.f32 %v1204_v9, %v1154_v36  ;;  %v1245_v51 = vpop.f32.mrb[37].mxu1  ;;  %v1206_v38 = vpop.f32.mrb[38].mxu0 }
 0x78c   : > { %4643 = vtanh.f32 %v1203_v49  ;;  %v1246_v28 = vadd.f32 %v1245_v51, %v1156_v4  ;;  %v1247_v60 = vpop.f32.mrb[38].mxu1  ;;  %v1207_v48 = vpop.f32.mrb[39].mxu0 }
 0x78d   : > { %4645 = vtanh.f32 %v1244_v29  ;;  %v1248_v3 = vpop.f32.mrb[39].mxu1 }
 0x78e   : > { %4647 = vtanh.f32 %v1205_v37 }
 0x78f   : > { %4649 = vtanh.f32 %v1246_v28 }
 0x791   : > { %v1348_v24 = vpop.f32.mrb[40].mxu0 }
 0x792   : > { %v1349_v50 = vadd.f32 %v1348_v24, %v5086_v20  ;;  %v1401_v58 = vpop.f32.mrb[40].mxu1  ;;  %v1350_v18 = vpop.f32.mrb[41].mxu0 }
 0x793   : > { %v1402_v59 = vadd.f32 %v1401_v58, %v5088_v21  ;;  %v1351_v16 = vadd.f32 %v1350_v18, %v5090_v22  ;;  %v1403_v6 = vpop.f32.mrb[41].mxu1  ;;  %v1352_v25 = vpop.f32.mrb[42].mxu0 }
 0x794   : > { %v1404_v15 = vadd.f32 %v1403_v6, %v5092_v23  ;;  %v1353_v39 = vadd.f32 %v1352_v25, %v5094_v26  ;;  %v1405_v17 = vpop.f32.mrb[42].mxu1  ;;  %v1354_v14 = vpop.f32.mrb[43].mxu0  ;;  %v1420_v36 = vmax.f32 %v1349_v50, 0.0 }
 0x795   : > { %v1406_v61 = vadd.f32 %v1405_v17, %v5096_v27  ;;  %v1355_v0 = vadd.f32 %v1354_v14, %v5100_v32  ;;  %v1407_v20 = vpop.f32.mrb[43].mxu1  ;;  %v1422_v22 = vmax.f32 %v1402_v59, 0.0  ;;  %v1421_v23 = vmax.f32 %v1351_v16, 0.0 }
 0x796   : > { %v4644_v1 = vpop.eup %4643  ;;  %v1424_v45 = vmax.f32 %v1353_v39, 0.0  ;;  %v1408_v21 = vadd.f32 %v1407_v20, %v5102_v33  ;;  %v1423_v49 = vmax.f32 %v1404_v15, 0.0 }
 0x797   : > { %v4646_v4 = vpop.eup %4645  ;;  %1254 = vst [vmem:[%s5324_s18] sm:$0x1f] %v4644_v1  ;;  %v1426_v26 = vmax.f32 %v1406_v61, 0.0  ;;  %v1425_v27 = vmax.f32 %v1355_v0, 0.0 }
 0x798   : > { %v4648_v32 = vpop.eup %4647  ;;  %1256 = vst [vmem:[%s5324_s18 + $0x10] sm:$0x1f] %v4646_v4  ;;  %v1446_v19 = vpack.c.bf16 %v1424_v45, %v1420_v36  ;;  %v1427_v9 = vmax.f32 %v1408_v21, 0.0 }
 0x799   : > { %v4650_v29 = vpop.eup %4649  ;;  %1255 = vst [vmem:[%s5324_s18 + $0x8] sm:$0x1f] %v4648_v32  ;;  %v1448_v33 = vpack.c.bf16 %v1426_v26, %v1422_v22  ;;  %v1447_v37 = vpack.c.bf16 %v1425_v27, %v1421_v23  ;;  %v1358_v51 = vpop.f32.mrb[44].mxu0 }
 0x79a   : > { %1257 = vst [vmem:[%s5324_s18 + $0x18] sm:$0x1f] %v4650_v29  ;;  %v1449_v38 = vpack.c.bf16 %v1427_v9, %v1423_v49  ;;  %v1359_v28 = vadd.f32 %v1358_v51, %v5110_v52  ;;  %v1411_v60 = vpop.f32.mrb[44].mxu1  ;;  %v1360_v48 = vpop.f32.mrb[45].mxu0 }
 0x79b   : > { %v1412_v3 = vadd.f32 %v1411_v60, %v5112_v53  ;;  %v1361_v24 = vadd.f32 %v1360_v48, %v5114_v56  ;;  %v1413_v50 = vpop.f32.mrb[45].mxu1  ;;  %v1362_v58 = vpop.f32.mrb[46].mxu0  ;;  %1462 = vmatprep.subr.bf16.mxu0 %v1447_v37 }
 0x79c   : > { %v1414_v18 = vadd.f32 %v1413_v50, %v5116_v57  ;;  %v1363_v59 = vadd.f32 %v1362_v58, %v5118_v62  ;;  %v1415_v16 = vpop.f32.mrb[46].mxu1  ;;  %1505 = vmatprep.subr.bf16.mxu1 %v1449_v38  ;;  %v1364_v6 = vpop.f32.mrb[47].mxu0  ;;  %1463 = vmatpush1.bf16.msra.mxu0 %v1446_v19  ;;  %v1428_v53 = vmax.f32 %v1359_v28, 0.0 }
 0x79d   : > { %v1416_v25 = vadd.f32 %v1415_v16, %v5120_v63  ;;  %v1365_v52 = vadd.f32 %v1364_v6, %v5124_v7  ;;  %v1417_v15 = vpop.f32.mrb[47].mxu1  ;;  %1506 = vmatpush1.bf16.msra.mxu1 %v1448_v33  ;;  %v1430_v17 = vmax.f32 %v1412_v3, 0.0  ;;  %v1429_v14 = vmax.f32 %v1361_v24, 0.0  ;;  %v4619_v63 = vld [vmem:[#allocation5 + $0x10] sm:$0xff]  }
 0x79e   : > { %v1432_v39 = vmax.f32 %v1363_v59, 0.0  ;;  %v1418_v56 = vadd.f32 %v1417_v15, %v5126_v8  ;;  %v1431_v0 = vmax.f32 %v1414_v18, 0.0 }
 0x79f   : > { %v1434_v61 = vmax.f32 %v1416_v25, 0.0  ;;  %v1433_v57 = vmax.f32 %v1365_v52, 0.0 }
 0x7a0   : > { %v1450_v62 = vpack.c.bf16 %v1432_v39, %v1428_v53  ;;  %v1435_v20 = vmax.f32 %v1418_v56, 0.0 }
 0x7a1   : > { %v1452_v1 = vpack.c.bf16 %v1434_v61, %v1430_v17  ;;  %v1451_v36 = vpack.c.bf16 %v1433_v57, %v1429_v14 }
 0x7a2   : > { %v1453_v45 = vpack.c.bf16 %v1435_v20, %v1431_v0 }
 0x7a3   : > { %1464 = vmatprep.subr.bf16.mxu0 %v1451_v36  ;;  %v1656_v36 = vld [vmem:[#allocation7 + $0x188] sm:$0x7] }
 0x7a4   : > { %1507 = vmatprep.subr.bf16.mxu1 %v1453_v45  ;;  %1465 = vmatpush1.bf16.msra.mxu0 %v1450_v62 }
 0x7a5   : > { %1508 = vmatpush1.bf16.msra.mxu1 %v1452_v1  ;;  %v1657_v1 = vld [vmem:[#allocation7 + $0x190] sm:$0x7] }
 0x7a7   : > { %4448 = vmatmul.mubr.msk.bf16.vlgmr.msra.gmra.mrb[48].mxu0 %vm427_vm4, %v4619_v63 }
 0x7a8   : > { %4449 = vmatmul.mubr.msk.bf16.vlgmr.msra.gmra.mrb[48].mxu1 %vm427_vm4, %v4619_v63  ;;  %1600 = vmatprep.mubr.bf16.mxu0 %v5901_v13  ;;  %v1658_v63 = vld [vmem:[#allocation7 + $0x198] sm:$0x7] }
 0x7a9   : > { %1641 = vmatprep.mubr.bf16.mxu1 %v5901_v13 }
 0x87a   : > { %v1496_v7 = vpop.f32.mrb[48].mxu0 }
 0x87b   : > { %v1497_v8 = vadd.f32 %v1496_v7, %v5138_v40  ;;  %v1539_v21 = vpop.f32.mrb[48].mxu1  ;;  %v1498_v4 = vpop.f32.mrb[49].mxu0 }
 0x87c   : > { %v1540_v22 = vadd.f32 %v1539_v21, %v5140_v41  ;;  %v1499_v23 = vadd.f32 %v1498_v4, %v5142_v42  ;;  %v1541_v26 = vpop.f32.mrb[49].mxu1  ;;  %v1500_v27 = vpop.f32.mrb[50].mxu0 }
 0x87d   : > { %v1542_v32 = vadd.f32 %v1541_v26, %v5144_v43  ;;  %v1501_v49 = vadd.f32 %v1500_v27, %v5146_v46  ;;  %v1543_v19 = vpop.f32.mrb[50].mxu1  ;;  %v1502_v9 = vpop.f32.mrb[51].mxu0  ;;  %v1548_v40 = vmax.f32 %v1497_v8, 0.0 }
 0x87e   : > { %v1544_v29 = vadd.f32 %v1543_v19, %v5148_v47  ;;  %v1503_v33 = vadd.f32 %v1502_v9, %v5152_v54  ;;  %v1545_v37 = vpop.f32.mrb[51].mxu1  ;;  %v1550_v41 = vmax.f32 %v1540_v22, 0.0  ;;  %v1549_v28 = vmax.f32 %v1499_v23, 0.0  ;;  %v1556_v47 = vld [vmem:[#allocation5 + $0x20] sm:$0xf] }
 0x87f   : > { %v1552_v51 = vmax.f32 %v1501_v49, 0.0  ;;  %v1546_v38 = vadd.f32 %v1545_v37, %v5154_v55  ;;  %v1551_v48 = vmax.f32 %v1542_v32, 0.0 }
 0x880   : > { %v1554_v42 = vmax.f32 %v1544_v29, 0.0  ;;  %v1553_v60 = vmax.f32 %v1503_v33, 0.0 }
 0x881   : > { %v1561_v3 = vpack.c.bf16 %v1552_v51, %v1548_v40  ;;  %v1555_v43 = vmax.f32 %v1546_v38, 0.0 }
 0x882   : > { %v1563_v24 = vpack.c.bf16 %v1554_v42, %v1550_v41  ;;  %v1562_v46 = vpack.c.bf16 %v1553_v60, %v1549_v28 }
 0x883   : > { %v1564_v50 = vpack.c.bf16 %v1555_v43, %v1551_v48 }
 0x884   : > { %1568 = vmatprep.subr.bf16.mxu0 %v1562_v46 }
 0x885   : > { %1609 = vmatprep.subr.bf16.mxu1 %v1564_v50  ;;  %1569 = vmatpush1.bf16.msra.mxu0 %v1561_v3  ;;  %v1764_v3 = vld [vmem:[#allocation5 + $0x40] sm:$0xf] }
 0x886   : > { %1610 = vmatpush1.bf16.msra.mxu1 %v1563_v24 }
 0x888   : > { %4450 = vmatmul.mubr.msk.bf16.vlgmr.msra.gmra.mrb[52].mxu0 %vm536_vm5, %v1556_v47 }
 0x889   : > { %4451 = vmatmul.mubr.msk.bf16.vlgmr.msra.gmra.mrb[52].mxu1 %vm536_vm5, %v1556_v47  ;;  %1710 = vmatprep.mubr.bf16.mxu0 %v5901_v13 }
 0x88a   : > { %1751 = vmatprep.mubr.bf16.mxu1 %v5901_v13 }
 0x95b   : > { %v1602_v54 = vpop.f32.mrb[52].mxu0 }
 0x95c   : > { %v1603_v55 = vadd.f32 %v1602_v54, %v5166_v30  ;;  %v1643_v58 = vpop.f32.mrb[52].mxu1  ;;  %v1604_v18 = vpop.f32.mrb[53].mxu0 }
 0x95d   : > { %v1644_v59 = vadd.f32 %v1643_v58, %v5168_v31  ;;  %v1605_v16 = vadd.f32 %v1604_v18, %v5170_v34  ;;  %v1645_v6 = vpop.f32.mrb[53].mxu1  ;;  %v1606_v25 = vpop.f32.mrb[54].mxu0  ;;  %v1654_v34 = vld [vmem:[#allocation5 + $0x30] sm:$0x3] }
 0x95e   : > { %v1650_v52 = vmax.f32 %v1603_v55, 0.0  ;;  %v1646_v15 = vadd.f32 %v1645_v6, %v5172_v35  ;;  %v1647_v53 = vpop.f32.mrb[54].mxu1  ;;  %v1607_v39 = vpop.f32.mrb[55].mxu0  ;;  %v1655_v35 = vld [vmem:[#allocation7 + $0x180] sm:$0x7] }
 0x95f   : > { %v1652_v56 = vmax.f32 %v1644_v59, 0.0  ;;  %v1651_v17 = vmax.f32 %v1605_v16, 0.0  ;;  %v1648_v14 = vpop.f32.mrb[55].mxu1  ;;  %v5917_v59 = vld [vmem:[#allocation12_spill] sm:$0xff] }
 0x960   : > { %v1659_v61 = vpack.c.bf16 %v1650_v52, %v1650_v52  ;;  %v1653_v57 = vmax.f32 %v1646_v15, 0.0 }
 0x961   : > { %v1661_v0 = vpack.c.bf16 %v1652_v56, %v1652_v56  ;;  %v1660_v30 = vpack.c.bf16 %v1651_v17, %v1651_v17 }
 0x962   : > { %v1662_v62 = vpack.c.bf16 %v1653_v57, %v1653_v57  ;;  %v1667_v20 = vsel %vm641_vm6, %v1659_v61, 0 }
 0x963   : > { %4452 = vmatprep.subr.msk.bf16.mxu0 %vm641_vm6, %v1660_v30  ;;  %v1673_v31 = vsel %vm641_vm6, %v1661_v0, 0  ;;  %v5918_v0 = vld [vmem:[#allocation13_spill] sm:$0xff] }
 0x964   : > { %4454 = vmatprep.subr.msk.bf16.mxu1 %vm641_vm6, %v1662_v62  ;;  %1679 = vmatpush1.bf16.msra.mxu0 %v1667_v20 }
 0x965   : > { %1720 = vmatpush1.bf16.msra.mxu1 %v1673_v31  ;;  %v5919_v31 = vld [vmem:[#allocation14_spill] sm:$0xff] }
 0x967   : > { %4453 = vmatmul.mubr.msk.bf16.vlgmr.msra.gmra.mrb[56].mxu0 %vm637_vm7, %v1654_v34 }
 0x968   : > { %4455 = vmatmul.mubr.msk.bf16.vlgmr.msra.gmra.mrb[56].mxu1 %vm637_vm7, %v1654_v34  ;;  %1820 = vmatprep.mubr.bf16.mxu0 %v5901_v13 }
 0x969   : > { %1861 = vmatprep.mubr.bf16.mxu1 %v5901_v13 }
 0xa3a   : > { %v1712_v45 = vpop.f32.mrb[56].mxu0 }
 0xa3b   : > { %v1713_v7 = vadd.f32 %v1712_v45, %v1655_v35  ;;  %v1753_v8 = vpop.f32.mrb[56].mxu1  ;;  %v1714_v21 = vpop.f32.mrb[57].mxu0  ;;  %v5920_v35 = vld [vmem:[#allocation15_spill] sm:$0xff] }
 0xa3c   : > { %v1754_v4 = vadd.f32 %v1753_v8, %v1657_v1  ;;  %v1715_v22 = vadd.f32 %v1714_v21, %v1656_v36  ;;  %v1755_v23 = vpop.f32.mrb[57].mxu1  ;;  %v1716_v26 = vpop.f32.mrb[58].mxu0  ;;  %v5922_v8 = vld [vmem:[#allocation17_spill] sm:$0xff] }
 0xa3d   : > { %4651 = vtanh.f32 %v1713_v7  ;;  %v1756_v27 = vadd.f32 %v1755_v23, %v1658_v63  ;;  %v1757_v32 = vpop.f32.mrb[58].mxu1  ;;  %v1717_v49 = vpop.f32.mrb[59].mxu0  ;;  %v5921_v63 = vld [vmem:[#allocation16_spill] sm:$0xff]  ;;  %v5923_v23 = vld [vmem:[#allocation18_spill] sm:$0xff] }
 0xa3e   : > { %4653 = vtanh.f32 %v1754_v4  ;;  %v1758_v19 = vpop.f32.mrb[59].mxu1 }
 0xa3f   : > { %4655 = vtanh.f32 %v1715_v22 }
 0xa40   : > { %4657 = vtanh.f32 %v1756_v27  ;;  %v5924_v27 = vld [vmem:[#allocation19_spill] sm:$0xff] }
 0xa47   : > { %v4652_v9 = vpop.eup %4651 }
 0xa48   : > { %v4654_v29 = vpop.eup %4653  ;;  %v1769_v37 = vpack.c.bf16 %v4652_v9, %v4652_v9 }
 0xa49   : > { %v4656_v33 = vpop.eup %4655  ;;  %v1771_v51 = vpack.c.bf16 %v4654_v29, %v4654_v29  ;;  %v5925_v29 = vld [vmem:[#allocation20_spill] sm:$0xff] }
 0xa4a   : > { %v4658_v40 = vpop.eup %4657  ;;  %v1770_v38 = vpack.c.bf16 %v4656_v33, %v4656_v33  ;;  %v1777_v42 = vand.u32 %v1769_v37, %v5064_v2 }
 0xa4b   : > { %v1772_v41 = vpack.c.bf16 %v4658_v40, %v4658_v40  ;;  %v1783_v48 = vand.u32 %v1771_v51, %v5064_v2 }
 0xa4c   : > { %v1780_v28 = vand.u32 %v1770_v38, %v5064_v2 }
 0xa4d   : > { %v1786_v60 = vand.u32 %v1772_v41, %v5064_v2 }
 0xa4e   : > { %1788 = vmatprep.subr.bf16.mxu0 %v1780_v28 }
 0xa4f   : > { %1829 = vmatprep.subr.bf16.mxu1 %v1786_v60  ;;  %1789 = vmatpush1.bf16.msra.mxu0 %v1777_v42 }
 0xa50   : > { %1830 = vmatpush1.bf16.msra.mxu1 %v1783_v48 }
 0xa52   : > { %4456 = vmatmul.mubr.msk.bf16.vlgmr.msra.gmra.mrb[60].mxu0 %vm751_vm8, %v1764_v3 }
 0xa53   : > { %4457 = vmatmul.mubr.msk.bf16.vlgmr.msra.gmra.mrb[60].mxu1 %vm751_vm8, %v1764_v3  ;;  %1940 = vmatprep.mubr.bf16.mxu0 %v5901_v13 }
 0xa54   : > { %1983 = vmatprep.mubr.bf16.mxu1 %v5901_v13 }
 0xb25   : > { %v1822_v43 = vpop.f32.mrb[60].mxu0 }
 0xb26   : > { %v1823_v24 = vadd.f32 %v1822_v43, %v5194_v10  ;;  %v1863_v46 = vpop.f32.mrb[60].mxu1  ;;  %v1824_v50 = vpop.f32.mrb[61].mxu0  ;;  %v4621_v43 = vld [vmem:[#allocation5 + $0x60] sm:$0xff]  }
 0xb27   : > { %v1864_v47 = vadd.f32 %v1863_v46, %v5196_v11  ;;  %v1825_v54 = vadd.f32 %v1824_v50, %v5198_v12  ;;  %v1865_v55 = vpop.f32.mrb[61].mxu1  ;;  %v1826_v58 = vpop.f32.mrb[62].mxu0  ;;  %v4620_v12 = vld [vmem:[#allocation5 + $0x50] sm:$0xff]   ;;  %v5926_v50 = vld [vmem:[#allocation21_spill] sm:$0xff] }
 0xb28   : > { %v1870_v18 = vmax.f32 %v1823_v24, 0.0  ;;  %v1866_v16 = vadd.f32 %v1865_v55, %v5917_v59  ;;  %v1867_v6 = vpop.f32.mrb[62].mxu1  ;;  %v1827_v25 = vpop.f32.mrb[63].mxu0  ;;  %v4622_v24 = vld [vmem:[#allocation5 + $0x68] sm:$0xff]   ;;  %v5927_v58 = vld [vmem:[#allocation22_spill] sm:$0xff]  ;;  %v5928_v59 = vld [vmem:[#allocation23_spill] sm:$0xff] }
 0xb29   : > { %v1872_v52 = vmax.f32 %v1864_v47, 0.0  ;;  %v1871_v15 = vmax.f32 %v1825_v54, 0.0  ;;  %v1868_v53 = vpop.f32.mrb[63].mxu1 }
 0xb2a   : > { %v1884_v39 = vpack.c.bf16 %v1870_v18, %v1870_v18  ;;  %v1873_v56 = vmax.f32 %v1866_v16, 0.0  ;;  %v5930_v53 = vld [vmem:[#allocation25_spill] sm:$0xff] }
 0xb2b   : > { %v1886_v17 = vpack.c.bf16 %v1872_v52, %v1872_v52  ;;  %v1885_v10 = vpack.c.bf16 %v1871_v15, %v1871_v15  ;;  %v5929_v52 = vld [vmem:[#allocation24_spill] sm:$0xff] }
 0xb2c   : > { %v1887_v14 = vpack.c.bf16 %v1873_v56, %v1873_v56  ;;  %v1897_v61 = vsel %vm641_vm6, %v1884_v39, 0 }
 0xb2d   : > { %4459 = vmatprep.subr.msk.bf16.mxu0 %vm641_vm6, %v1885_v10  ;;  %v1903_v11 = vsel %vm641_vm6, %v1886_v17, 0  ;;  %v5931_v10 = vld [vmem:[#allocation26_spill] sm:$0xff] }
 0xb2e   : > { %4461 = vmatprep.subr.msk.bf16.mxu1 %vm641_vm6, %v1887_v14  ;;  %1909 = vmatpush1.bf16.msra.mxu0 %v1897_v61  ;;  %v5932_v61 = vld [vmem:[#allocation27_spill] sm:$0xff] }
 0xb2f   : > { %1952 = vmatpush1.bf16.msra.mxu1 %v1903_v11 }
 0xb31   : > { %4460 = vmatmul.mubr.msk.bf16.vlgmr.msra.gmra.mrb[64].mxu0 %vm637_vm7, %v4620_v12 }
 0xb32   : > { %4462 = vmatmul.mubr.msk.bf16.vlgmr.msra.gmra.mrb[64].mxu1 %vm637_vm7, %v4620_v12  ;;  %2074 = vmatprep.mubr.bf16.mxu0 %v5901_v13 }
 0xb33   : > { %2127 = vmatprep.mubr.bf16.mxu1 %v5901_v13 }
 0xc04   : > { %v1942_v57 = vpop.f32.mrb[64].mxu0 }
 0xc05   : > { %v1943_v30 = vadd.f32 %v1942_v57, %v5918_v0  ;;  %v1985_v62 = vpop.f32.mrb[64].mxu1  ;;  %v1944_v20 = vpop.f32.mrb[65].mxu0 }
 0xc06   : > { %v1986_v34 = vadd.f32 %v1985_v62, %v5919_v31  ;;  %v1945_v1 = vadd.f32 %v1944_v20, %v5920_v35  ;;  %v1987_v36 = vpop.f32.mrb[65].mxu1  ;;  %v1946_v45 = vpop.f32.mrb[66].mxu0 }
 0xc07   : > { %v1988_v7 = vadd.f32 %v1987_v36, %v5921_v63  ;;  %v1947_v21 = vadd.f32 %v1946_v45, %v5922_v8  ;;  %v1989_v4 = vpop.f32.mrb[66].mxu1  ;;  %v1948_v22 = vpop.f32.mrb[67].mxu0  ;;  %v1994_v19 = vmax.f32 %v1943_v30, 0.0  ;;  %v5933_v30 = vld [vmem:[#allocation28_spill] sm:$0xff] }
 0xc08   : > { %v1990_v26 = vadd.f32 %v1989_v4, %v5923_v23  ;;  %v1949_v32 = vadd.f32 %v1948_v22, %v5924_v27  ;;  %v1991_v49 = vpop.f32.mrb[67].mxu1  ;;  %v1996_v37 = vmax.f32 %v1986_v34, 0.0  ;;  %v1995_v40 = vmax.f32 %v1945_v1, 0.0  ;;  %v5934_v4 = vld [vmem:[#allocation29_spill] sm:$0xff] }
 0xc09   : > { %v1998_v9 = vmax.f32 %v1947_v21, 0.0  ;;  %v1992_v33 = vadd.f32 %v1991_v49, %v5925_v29  ;;  %v1997_v41 = vmax.f32 %v1988_v7, 0.0  ;;  %v2271_v27 = vld [vmem:[%s5054_s30 + $0x48] sm:$0x1f] }
 0xc0a   : > { %v2000_v51 = vmax.f32 %v1990_v26, 0.0  ;;  %v1999_v38 = vmax.f32 %v1949_v32, 0.0  ;;  %v5935_v32 = vld [vmem:[#allocation30_spill] sm:$0xff] }
 0xc0b   : > { %v2022_v28 = vpack.c.bf16 %v1998_v9, %v1994_v19  ;;  %v2001_v42 = vmax.f32 %v1992_v33, 0.0  ;;  %v5936_v19 = vld [vmem:[#allocation31_spill] sm:$0xff] }
 0xc0c   : > { %v2024_v60 = vpack.c.bf16 %v2000_v51, %v1996_v37  ;;  %v2023_v48 = vpack.c.bf16 %v1999_v38, %v1995_v40  ;;  %v2273_v37 = vld [vmem:[%s5054_s30 + $0x58] sm:$0x1f]  ;;  %v5937_v40 = vld [vmem:[#allocation32_spill] sm:$0xff]  ;;  %v5938_v38 = vld [vmem:[#allocation33_spill] sm:$0xff] }
 0xc0d   : > { %v2025_v3 = vpack.c.bf16 %v2001_v42, %v1997_v41 }
 0xc0e   : > { %2042 = vmatprep.subr.bf16.mxu0 %v2023_v48 }
 0xc0f   : > { %2095 = vmatprep.subr.bf16.mxu1 %v2025_v3  ;;  %2043 = vmatpush1.bf16.msra.mxu0 %v2022_v28  ;;  %v5940_v3 = vld [vmem:[#allocation35_spill] sm:$0xff] }
 0xc10   : > { %2096 = vmatpush1.bf16.msra.mxu1 %v2024_v60  ;;  %v5939_v60 = vld [vmem:[#allocation34_spill] sm:$0xff] }
 0xc12   : > { %4465 = vmatmul.mubr.msk.bf16.vlgmr.msra.gmra.mrb[68].mxu0 %vm536_vm5, %v4621_v43 }
 0xc13   : > { %4467 = vmatmul.mubr.msk.bf16.vlgmr.msra.gmra.mrb[68].mxu1 %vm536_vm5, %v4621_v43  ;;  %2084 = vmatprep.mubr.bf16.mxu0 %v5901_v13 }
 0xc14   : > { %2137 = vmatprep.mubr.bf16.mxu1 %v5901_v13 }
 0xc1a   : > { %4466 = vmatmul.mubr.msk.bf16.gmra.mrb[72].mxu0 %vm536_vm5, %v4622_v24 }
 0xc1b   : > { %4468 = vmatmul.mubr.msk.bf16.gmra.mrb[72].mxu1 %vm536_vm5, %v4622_v24  ;;  %2212 = vmatprep.mubr.bf16.mxu0 %v5901_v13 }
 0xc1c   : > { %2253 = vmatprep.mubr.bf16.mxu1 %v5901_v13 }
 0xce5   : > { %v2076_v46 = vpop.f32.mrb[68].mxu0 }
 0xce6   : > { %v2077_v47 = vadd.f32 %v2076_v46, %v5926_v50  ;;  %v2129_v54 = vpop.f32.mrb[68].mxu1  ;;  %v2078_v55 = vpop.f32.mrb[69].mxu0  ;;  %v2295_v46 = vpack.c.bf16 %v2271_v27, %v2271_v27  ;;  %v2270_v50 = vld [vmem:[%s5054_s30 + $0x40] sm:$0x1f] }
 0xce7   : > { %v2130_v18 = vadd.f32 %v2129_v54, %v5927_v58  ;;  %v2079_v16 = vadd.f32 %v2078_v55, %v5928_v59  ;;  %v2131_v6 = vpop.f32.mrb[69].mxu1  ;;  %v2080_v25 = vpop.f32.mrb[70].mxu0  ;;  %v2297_v58 = vpack.c.bf16 %v2273_v37, %v2273_v37  ;;  %v5438_v27 = vld [vmem:[#allocation7] sm:$0xff] }
 0xce8   : > { %v2132_v15 = vadd.f32 %v2131_v6, %v5929_v52  ;;  %v2081_v39 = vadd.f32 %v2080_v25, %v5930_v53  ;;  %v2133_v56 = vpop.f32.mrb[70].mxu1  ;;  %v2082_v17 = vpop.f32.mrb[71].mxu0  ;;  %v2148_v57 = vmax.f32 %v2077_v47, 0.0 }
 0xce9   : > { %v2134_v14 = vadd.f32 %v2133_v56, %v5931_v10  ;;  %v2083_v11 = vadd.f32 %v2082_v17, %v5932_v61  ;;  %v2135_v12 = vpop.f32.mrb[71].mxu1  ;;  %v2150_v20 = vmax.f32 %v2130_v18, 0.0  ;;  %v2149_v31 = vmax.f32 %v2079_v16, 0.0  ;;  %v2272_v18 = vld [vmem:[%s5054_s30 + $0x50] sm:$0x1f] }
 0xcea   : > { %v2152_v0 = vmax.f32 %v2081_v39, 0.0  ;;  %v2136_v62 = vadd.f32 %v2135_v12, %v5933_v30  ;;  %v2151_v1 = vmax.f32 %v2132_v15, 0.0  ;;  %v2294_v39 = vpack.c.bf16 %v2270_v50, %v2270_v50  ;;  %v4624_v30 = vld [vmem:[#allocation5 + $0x8] sm:$0xff]  }
 0xceb   : > { %v2154_v34 = vmax.f32 %v2134_v14, 0.0  ;;  %v2153_v35 = vmax.f32 %v2083_v11, 0.0  ;;  %v2318_v10 = vand.u32 %v2295_v46, %v5068_v5  ;;  %v2296_v14 = vpack.c.bf16 %v2272_v18, %v2272_v18 }
 0xcec   : > { %v2169_v36 = vpack.c.bf16 %v2152_v0, %v2148_v57  ;;  %v2155_v45 = vmax.f32 %v2136_v62, 0.0  ;;  %v2324_v11 = vand.u32 %v2297_v58, %v5068_v5  ;;  %v2315_v12 = vand.u32 %v2294_v39, %v5068_v5  ;;  %v4623_v0 = vld [vmem:[#allocation5] sm:$0xff]  }
 0xced   : > { %v2171_v63 = vpack.c.bf16 %v2154_v34, %v2150_v20  ;;  %v2170_v7 = vpack.c.bf16 %v2153_v35, %v2149_v31  ;;  %v2086_v8 = vpop.f32.mrb[72].mxu0  ;;  %v2321_v57 = vand.u32 %v2296_v14, %v5068_v5  ;;  %v2165_v62 = vld [vmem:[#allocation7 + $0x380] sm:$0x1f]  ;;  %v2167_v20 = vld [vmem:[#allocation7 + $0x390] sm:$0x1f] }
 0xcee   : > { %v2172_v21 = vpack.c.bf16 %v2155_v45, %v2151_v1  ;;  %v2087_v22 = vadd.f32 %v2086_v8, %v5934_v4  ;;  %v2139_v23 = vpop.f32.mrb[72].mxu1  ;;  %v2088_v26 = vpop.f32.mrb[73].mxu0  ;;  %v2166_v31 = vld [vmem:[#allocation7 + $0x388] sm:$0x1f]  ;;  %v2168_v35 = vld [vmem:[#allocation7 + $0x398] sm:$0x1f] }
 0xcef   : > { %v2140_v49 = vadd.f32 %v2139_v23, %v5935_v32  ;;  %v2089_v9 = vadd.f32 %v2088_v26, %v5936_v19  ;;  %v2141_v29 = vpop.f32.mrb[73].mxu1  ;;  %v2090_v33 = vpop.f32.mrb[74].mxu0  ;;  %2180 = vmatprep.subr.bf16.mxu0 %v2170_v7  ;;  %v5440_v32 = vld [vmem:[#allocation7 + $0x10] sm:$0xff] }
 0xcf0   : > { %v2142_v51 = vadd.f32 %v2141_v29, %v5937_v40  ;;  %v2091_v41 = vadd.f32 %v2090_v33, %v5938_v38  ;;  %v2143_v28 = vpop.f32.mrb[74].mxu1  ;;  %2221 = vmatprep.subr.bf16.mxu1 %v2172_v21  ;;  %v2092_v42 = vpop.f32.mrb[75].mxu0  ;;  %2181 = vmatpush1.bf16.msra.mxu0 %v2169_v36  ;;  %v2156_v47 = vmax.f32 %v2087_v22, 0.0  ;;  %v5446_v29 = vld [vmem:[#allocation7 + $0x20] sm:$0xff]  ;;  %v5451_v38 = vld [vmem:[#allocation7 + $0x28] sm:$0xff]  ;;  %v5466_v14 = vld [vmem:[#allocation7 + $0x50] sm:$0xff] }
 0xcf1   : > { %v2144_v48 = vadd.f32 %v2143_v28, %v5939_v60  ;;  %v2093_v43 = vadd.f32 %v2092_v42, %v5940_v3  ;;  %v2145_v24 = vpop.f32.mrb[75].mxu1  ;;  %2222 = vmatpush1.bf16.msra.mxu1 %v2171_v63  ;;  %v2158_v59 = vmax.f32 %v2140_v49, 0.0  ;;  %v2157_v16 = vmax.f32 %v2089_v9, 0.0  ;;  %v5442_v49 = vld [vmem:[#allocation7 + $0x8] sm:$0xff]  ;;  %v5444_v9 = vld [vmem:[#allocation7 + $0x18] sm:$0xff] }
 0xcf2   : > { %v2160_v54 = vmax.f32 %v2091_v41, 0.0  ;;  %v2146_v55 = vadd.f32 %v2145_v24, %v5288_v44  ;;  %v2159_v52 = vmax.f32 %v2142_v51, 0.0  ;;  %v2164_v44 = vld [vmem:[#allocation5 + $0x70] sm:$0x7] }
 0xcf3   : > { %v2162_v6 = vmax.f32 %v2144_v48, 0.0  ;;  %v2161_v25 = vmax.f32 %v2093_v43, 0.0  ;;  %v5449_v51 = vld [vmem:[#allocation7 + $0x30] sm:$0xff]  ;;  %v5455_v48 = vld [vmem:[#allocation7 + $0x38] sm:$0xff] }
 0xcf4   : > { %v2173_v15 = vpack.c.bf16 %v2160_v54, %v2156_v47  ;;  %v2163_v53 = vmax.f32 %v2146_v55, 0.0 }
 0xcf5   : > { %v2175_v56 = vpack.c.bf16 %v2162_v6, %v2158_v59  ;;  %v2174_v17 = vpack.c.bf16 %v2161_v25, %v2157_v16 }
 0xcf6   : > { %v2176_v61 = vpack.c.bf16 %v2163_v53, %v2159_v52  ;;  %v5463_v53 = vld [vmem:[#allocation7 + $0x40] sm:$0xff] }
 0xcf7   : > { %2182 = vmatprep.subr.bf16.mxu0 %v2174_v17 }
 0xcf8   : > { %2223 = vmatprep.subr.bf16.mxu1 %v2176_v61  ;;  %2183 = vmatpush1.bf16.msra.mxu0 %v2173_v15  ;;  %v5468_v61 = vld [vmem:[#allocation7 + $0x48] sm:$0xff] }
 0xcf9   : > { %2224 = vmatpush1.bf16.msra.mxu1 %v2175_v56  ;;  %2326 = vmatprep.subr.bf16.mxu0 %v2318_v10 }
 0xcfa   : > { %2379 = vmatprep.subr.bf16.mxu1 %v2324_v11 }
 0xcfb   : > { %4469 = vmatmul.mubr.msk.bf16.vlgmr.msra.gmra.mrb[76].mxu0 %vm427_vm4, %v2164_v44 }
 0xcfc   : > { %4470 = vmatmul.mubr.msk.bf16.vlgmr.msra.gmra.mrb[76].mxu1 %vm427_vm4, %v2164_v44  ;;  %2327 = vmatpush1.bf16.msra.mxu0 %v2315_v12 }
 0xcfd   : > { %2380 = vmatpush1.bf16.msra.mxu1 %v2321_v57  ;;  %2358 = vmatprep.mubr.bf16.mxu0 %v5901_v13 }
 0xcfe   : > { %2411 = vmatprep.mubr.bf16.mxu1 %v5901_v13 }
 0xd03   : > { %4473 = vmatmul.mubr.msk.bf16.vlgmr.msra.gmra.mrb[80].mxu0 %vm257_vm3, %v4623_v0 }
 0xd04   : > { %4475 = vmatmul.mubr.msk.bf16.vlgmr.msra.gmra.mrb[80].mxu1 %vm257_vm3, %v4623_v0  ;;  %2368 = vmatprep.mubr.bf16.mxu0 %v5901_v13  ;;  %v5471_v0 = vld [vmem:[#allocation7 + $0x58] sm:$0xff] }
 0xd05   : > { %2421 = vmatprep.mubr.bf16.mxu1 %v5901_v13 }
 0xd0b   : > { %4474 = vmatmul.mubr.msk.bf16.gmra.mrb[84].mxu0 %vm257_vm3, %v4624_v30 }
 0xd0c   : > { %4476 = vmatmul.mubr.msk.bf16.gmra.mrb[84].mxu1 %vm257_vm3, %v4624_v30  ;;  %2506 = vmatprep.mubr.bf16.mxu0 %v5901_v13  ;;  %v5473_v30 = vld [vmem:[#allocation7 + $0x60] sm:$0xff] }
 0xd0d   : > { %2549 = vmatprep.mubr.bf16.mxu1 %v5901_v13 }
 0xdce   : > { %v2214_v34 = vpop.f32.mrb[76].mxu0 }
 0xdcf   : > { %v2215_v1 = vadd.f32 %v2214_v34, %v2165_v62  ;;  %v2255_v36 = vpop.f32.mrb[76].mxu1  ;;  %v2216_v45 = vpop.f32.mrb[77].mxu0 }
 0xdd0   : > { %v2256_v63 = vadd.f32 %v2255_v36, %v2167_v20  ;;  %v2217_v7 = vadd.f32 %v2216_v45, %v2166_v31  ;;  %v2257_v8 = vpop.f32.mrb[77].mxu1  ;;  %v2218_v21 = vpop.f32.mrb[78].mxu0 }
 0xdd1   : > { %4659 = vtanh.f32 %v2215_v1  ;;  %v2258_v4 = vadd.f32 %v2257_v8, %v2168_v35  ;;  %v2259_v22 = vpop.f32.mrb[78].mxu1  ;;  %v2219_v23 = vpop.f32.mrb[79].mxu0  ;;  %v5477_v35 = vld [vmem:[#allocation7 + $0x70] sm:$0xff]  ;;  %v5479_v1 = vld [vmem:[#allocation7 + $0x68] sm:$0xff]  ;;  %v5483_v8 = vld [vmem:[#allocation7 + $0x78] sm:$0xff] }
 0xdd2   : > { %4661 = vtanh.f32 %v2256_v63  ;;  %v2260_v26 = vpop.f32.mrb[79].mxu1 }
 0xdd3   : > { %4663 = vtanh.f32 %v2217_v7 }
 0xdd4   : > { %4665 = vtanh.f32 %v2258_v4 }
 0xdd6   : > { %v2360_v19 = vpop.f32.mrb[80].mxu0 }
 0xdd7   : > { %v2361_v33 = vadd.f32 %v2360_v19, %v5438_v27  ;;  %v2413_v37 = vpop.f32.mrb[80].mxu1  ;;  %v2362_v40 = vpop.f32.mrb[81].mxu0 }
 0xdd8   : > { %v2414_v41 = vadd.f32 %v2413_v37, %v5440_v32  ;;  %v2363_v28 = vadd.f32 %v2362_v40, %v5442_v49  ;;  %v2415_v42 = vpop.f32.mrb[81].mxu1  ;;  %v2364_v60 = vpop.f32.mrb[82].mxu0 }
 0xdd9   : > { %v2416_v3 = vadd.f32 %v2415_v42, %v5444_v9  ;;  %v2365_v43 = vadd.f32 %v2364_v60, %v5446_v29  ;;  %v2417_v24 = vpop.f32.mrb[82].mxu1  ;;  %v2366_v46 = vpop.f32.mrb[83].mxu0  ;;  %v2432_v58 = vmax.f32 %v2361_v33, 0.0 }
 0xdda   : > { %v2418_v50 = vadd.f32 %v2417_v24, %v5449_v51  ;;  %v2367_v47 = vadd.f32 %v2366_v46, %v5451_v38  ;;  %v2419_v54 = vpop.f32.mrb[83].mxu1  ;;  %v2434_v6 = vmax.f32 %v2414_v41, 0.0  ;;  %v2433_v25 = vmax.f32 %v2363_v28, 0.0 }
 0xddb   : > { %v4660_v55 = vpop.eup %4659  ;;  %v2436_v18 = vmax.f32 %v2365_v43, 0.0  ;;  %v2420_v59 = vadd.f32 %v2419_v54, %v5455_v48  ;;  %v2435_v56 = vmax.f32 %v2416_v3, 0.0 }
 0xddc   : > { %v4662_v16 = vpop.eup %4661  ;;  %2266 = vst [vmem:[%s5324_s18 + $0x20] sm:$0x1f] %v4660_v55  ;;  %v2438_v52 = vmax.f32 %v2418_v50, 0.0  ;;  %v2437_v15 = vmax.f32 %v2367_v47, 0.0  ;;  %v4625_v55 = vld [vmem:[#allocation5 + $0x10] sm:$0xff]  }
 0xddd   : > { %v4664_v39 = vpop.eup %4663  ;;  %2268 = vst [vmem:[%s5324_s18 + $0x30] sm:$0x1f] %v4662_v16  ;;  %v2458_v17 = vpack.c.bf16 %v2436_v18, %v2432_v58  ;;  %v2439_v10 = vmax.f32 %v2420_v59, 0.0  ;;  %v5494_v58 = vld [vmem:[#allocation7 + $0x80] sm:$0xff]  ;;  %v5496_v18 = vld [vmem:[#allocation7 + $0x90] sm:$0xff]  ;;  %v5498_v59 = vld [vmem:[#allocation7 + $0x88] sm:$0xff] }
 0xdde   : > { %v4666_v11 = vpop.eup %4665  ;;  %2267 = vst [vmem:[%s5324_s18 + $0x28] sm:$0x1f] %v4664_v39  ;;  %v2460_v44 = vpack.c.bf16 %v2438_v52, %v2434_v6  ;;  %v2459_v12 = vpack.c.bf16 %v2437_v15, %v2433_v25  ;;  %v2370_v57 = vpop.f32.mrb[84].mxu0  ;;  %v5500_v6 = vld [vmem:[#allocation7 + $0x98] sm:$0xff]  ;;  %v5502_v25 = vld [vmem:[#allocation7 + $0xa0] sm:$0xff] }
 0xddf   : > { %2269 = vst [vmem:[%s5324_s18 + $0x38] sm:$0x1f] %v4666_v11  ;;  %v2461_v62 = vpack.c.bf16 %v2439_v10, %v2435_v56  ;;  %v2371_v20 = vadd.f32 %v2370_v57, %v5463_v53  ;;  %v2423_v31 = vpop.f32.mrb[84].mxu1  ;;  %v2372_v34 = vpop.f32.mrb[85].mxu0  ;;  %v5505_v56 = vld [vmem:[#allocation7 + $0xb0] sm:$0xff]  ;;  %v5511_v57 = vld [vmem:[#allocation7 + $0xb8] sm:$0xff] }
 0xde0   : > { %v2424_v36 = vadd.f32 %v2423_v31, %v5466_v14  ;;  %v2373_v45 = vadd.f32 %v2372_v34, %v5468_v61  ;;  %v2425_v63 = vpop.f32.mrb[85].mxu1  ;;  %v2374_v7 = vpop.f32.mrb[86].mxu0  ;;  %2474 = vmatprep.subr.bf16.mxu0 %v2459_v12 }
 0xde1   : > { %v2426_v21 = vadd.f32 %v2425_v63, %v5471_v0  ;;  %v2375_v4 = vadd.f32 %v2374_v7, %v5473_v30  ;;  %v2427_v22 = vpop.f32.mrb[86].mxu1  ;;  %2517 = vmatprep.subr.bf16.mxu1 %v2461_v62  ;;  %v2376_v23 = vpop.f32.mrb[87].mxu0  ;;  %2475 = vmatpush1.bf16.msra.mxu0 %v2458_v17  ;;  %v2440_v37 = vmax.f32 %v2371_v20, 0.0  ;;  %v5507_v17 = vld [vmem:[#allocation7 + $0xa8] sm:$0xff] }
 0xde2   : > { %v2428_v26 = vadd.f32 %v2427_v22, %v5477_v35  ;;  %v2377_v19 = vadd.f32 %v2376_v23, %v5479_v1  ;;  %v2429_v33 = vpop.f32.mrb[87].mxu1  ;;  %2518 = vmatpush1.bf16.msra.mxu1 %v2460_v44  ;;  %v2442_v28 = vmax.f32 %v2424_v36, 0.0  ;;  %v2441_v42 = vmax.f32 %v2373_v45, 0.0 }
 0xde3   : > { %v2444_v40 = vmax.f32 %v2375_v4, 0.0  ;;  %v2430_v41 = vadd.f32 %v2429_v33, %v5483_v8  ;;  %v2443_v43 = vmax.f32 %v2426_v21, 0.0 }
 0xde4   : > { %v2446_v60 = vmax.f32 %v2428_v26, 0.0  ;;  %v2445_v3 = vmax.f32 %v2377_v19, 0.0 }
 0xde5   : > { %v2462_v24 = vpack.c.bf16 %v2444_v40, %v2440_v37  ;;  %v2447_v46 = vmax.f32 %v2430_v41, 0.0 }
 0xde6   : > { %v2464_v50 = vpack.c.bf16 %v2446_v60, %v2442_v28  ;;  %v2463_v47 = vpack.c.bf16 %v2445_v3, %v2441_v42  ;;  %v2568_v60 = vld [vmem:[#allocation5 + $0x20] sm:$0xf] }
 0xde7   : > { %v2465_v54 = vpack.c.bf16 %v2447_v46, %v2443_v43  ;;  %v5522_v3 = vld [vmem:[#allocation7 + $0x100] sm:$0xff]  ;;  %v5524_v43 = vld [vmem:[#allocation7 + $0x110] sm:$0xff] }
 0xde8   : > { %2476 = vmatprep.subr.bf16.mxu0 %v2463_v47 }
 0xde9   : > { %2519 = vmatprep.subr.bf16.mxu1 %v2465_v54  ;;  %2477 = vmatpush1.bf16.msra.mxu0 %v2462_v24  ;;  %v5526_v24 = vld [vmem:[#allocation7 + $0x108] sm:$0xff] }
 0xdea   : > { %2520 = vmatpush1.bf16.msra.mxu1 %v2464_v50  ;;  %v5528_v50 = vld [vmem:[#allocation7 + $0x118] sm:$0xff] }
 0xdec   : > { %4478 = vmatmul.mubr.msk.bf16.vlgmr.msra.gmra.mrb[88].mxu0 %vm427_vm4, %v4625_v55 }
 0xded   : > { %4479 = vmatmul.mubr.msk.bf16.vlgmr.msra.gmra.mrb[88].mxu1 %vm427_vm4, %v4625_v55  ;;  %2612 = vmatprep.mubr.bf16.mxu0 %v5901_v13 }
 0xdee   : > { %2653 = vmatprep.mubr.bf16.mxu1 %v5901_v13 }
 0xebf   : > { %v2508_v16 = vpop.f32.mrb[88].mxu0 }
 0xec0   : > { %v2509_v52 = vadd.f32 %v2508_v16, %v5494_v58  ;;  %v2551_v15 = vpop.f32.mrb[88].mxu1  ;;  %v2510_v39 = vpop.f32.mrb[89].mxu0 }
 0xec1   : > { %v2552_v10 = vadd.f32 %v2551_v15, %v5496_v18  ;;  %v2511_v11 = vadd.f32 %v2510_v39, %v5498_v59  ;;  %v2553_v44 = vpop.f32.mrb[89].mxu1  ;;  %v2512_v12 = vpop.f32.mrb[90].mxu0 }
 0xec2   : > { %v2554_v62 = vadd.f32 %v2553_v44, %v5500_v6  ;;  %v2513_v20 = vadd.f32 %v2512_v12, %v5502_v25  ;;  %v2555_v31 = vpop.f32.mrb[90].mxu1  ;;  %v2514_v34 = vpop.f32.mrb[91].mxu0  ;;  %v2560_v7 = vmax.f32 %v2509_v52, 0.0 }
 0xec3   : > { %v2556_v36 = vadd.f32 %v2555_v31, %v5505_v56  ;;  %v2515_v45 = vadd.f32 %v2514_v34, %v5507_v17  ;;  %v2557_v63 = vpop.f32.mrb[91].mxu1  ;;  %v2562_v22 = vmax.f32 %v2552_v10, 0.0  ;;  %v2561_v23 = vmax.f32 %v2511_v11, 0.0 }
 0xec4   : > { %v2564_v21 = vmax.f32 %v2513_v20, 0.0  ;;  %v2558_v4 = vadd.f32 %v2557_v63, %v5511_v57  ;;  %v2563_v33 = vmax.f32 %v2554_v62, 0.0 }
 0xec5   : > { %v2566_v26 = vmax.f32 %v2556_v36, 0.0  ;;  %v2565_v19 = vmax.f32 %v2515_v45, 0.0 }
 0xec6   : > { %v2573_v37 = vpack.c.bf16 %v2564_v21, %v2560_v7  ;;  %v2567_v40 = vmax.f32 %v2558_v4, 0.0 }
 0xec7   : > { %v2575_v41 = vpack.c.bf16 %v2566_v26, %v2562_v22  ;;  %v2574_v28 = vpack.c.bf16 %v2565_v19, %v2561_v23  ;;  %v2666_v22 = vld [vmem:[#allocation5 + $0x30] sm:$0x3]  ;;  %v2667_v23 = vld [vmem:[#allocation7 + $0x180] sm:$0x7]  ;;  %v2668_v19 = vld [vmem:[#allocation7 + $0x188] sm:$0x7] }
 0xec8   : > { %v2576_v42 = vpack.c.bf16 %v2567_v40, %v2563_v33  ;;  %v2669_v26 = vld [vmem:[#allocation7 + $0x190] sm:$0x7] }
 0xec9   : > { %2580 = vmatprep.subr.bf16.mxu0 %v2574_v28 }
 0xeca   : > { %2621 = vmatprep.subr.bf16.mxu1 %v2576_v42  ;;  %2581 = vmatpush1.bf16.msra.mxu0 %v2573_v37  ;;  %v2670_v37 = vld [vmem:[#allocation7 + $0x198] sm:$0x7] }
 0xecb   : > { %2622 = vmatpush1.bf16.msra.mxu1 %v2575_v41 }
 0xecd   : > { %4480 = vmatmul.mubr.msk.bf16.vlgmr.msra.gmra.mrb[92].mxu0 %vm536_vm5, %v2568_v60 }
 0xece   : > { %4481 = vmatmul.mubr.msk.bf16.vlgmr.msra.gmra.mrb[92].mxu1 %vm536_vm5, %v2568_v60  ;;  %2722 = vmatprep.mubr.bf16.mxu0 %v5901_v13 }
 0xecf   : > { %2763 = vmatprep.mubr.bf16.mxu1 %v5901_v13 }
 0xfa0   : > { %v2614_v46 = vpop.f32.mrb[92].mxu0 }
 0xfa1   : > { %v2615_v47 = vadd.f32 %v2614_v46, %v5522_v3  ;;  %v2655_v54 = vpop.f32.mrb[92].mxu1  ;;  %v2616_v55 = vpop.f32.mrb[93].mxu0 }
 0xfa2   : > { %v2656_v16 = vadd.f32 %v2655_v54, %v5524_v43  ;;  %v2617_v52 = vadd.f32 %v2616_v55, %v5526_v24  ;;  %v2657_v15 = vpop.f32.mrb[93].mxu1  ;;  %v2618_v39 = vpop.f32.mrb[94].mxu0 }
 0xfa3   : > { %v2662_v10 = vmax.f32 %v2615_v47, 0.0  ;;  %v2658_v11 = vadd.f32 %v2657_v15, %v5528_v50  ;;  %v2659_v44 = vpop.f32.mrb[94].mxu1  ;;  %v2619_v12 = vpop.f32.mrb[95].mxu0 }
 0xfa4   : > { %v2664_v62 = vmax.f32 %v2656_v16, 0.0  ;;  %v2663_v20 = vmax.f32 %v2617_v52, 0.0  ;;  %v2660_v31 = vpop.f32.mrb[95].mxu1 }
 0xfa5   : > { %v2671_v34 = vpack.c.bf16 %v2662_v10, %v2662_v10  ;;  %v2665_v36 = vmax.f32 %v2658_v11, 0.0 }
 0xfa6   : > { %v2673_v45 = vpack.c.bf16 %v2664_v62, %v2664_v62  ;;  %v2672_v63 = vpack.c.bf16 %v2663_v20, %v2663_v20 }
 0xfa7   : > { %v2674_v7 = vpack.c.bf16 %v2665_v36, %v2665_v36  ;;  %v2679_v21 = vsel %vm641_vm6, %v2671_v34, 0 }
 0xfa8   : > { %4482 = vmatprep.subr.msk.bf16.mxu0 %vm641_vm6, %v2672_v63  ;;  %v2685_v4 = vsel %vm641_vm6, %v2673_v45, 0  ;;  %v2776_v63 = vld [vmem:[#allocation5 + $0x40] sm:$0xf] }
 0xfa9   : > { %4484 = vmatprep.subr.msk.bf16.mxu1 %vm641_vm6, %v2674_v7  ;;  %2691 = vmatpush1.bf16.msra.mxu0 %v2679_v21  ;;  %v5550_v7 = vld [vmem:[#allocation7 + $0x200] sm:$0xff]  ;;  %v5552_v21 = vld [vmem:[#allocation7 + $0x210] sm:$0xff] }
 0xfaa   : > { %2732 = vmatpush1.bf16.msra.mxu1 %v2685_v4  ;;  %v5554_v4 = vld [vmem:[#allocation7 + $0x208] sm:$0xff] }
 0xfac   : > { %4483 = vmatmul.mubr.msk.bf16.vlgmr.msra.gmra.mrb[96].mxu0 %vm637_vm7, %v2666_v22 }
 0xfad   : > { %4485 = vmatmul.mubr.msk.bf16.vlgmr.msra.gmra.mrb[96].mxu1 %vm637_vm7, %v2666_v22  ;;  %2832 = vmatprep.mubr.bf16.mxu0 %v5901_v13 }
 0xfae   : > { %2873 = vmatprep.mubr.bf16.mxu1 %v5901_v13 }
0x107f   : > { %v2724_v33 = vpop.f32.mrb[96].mxu0 }
0x1080   : > { %v2725_v40 = vadd.f32 %v2724_v33, %v2667_v23  ;;  %v2765_v41 = vpop.f32.mrb[96].mxu1  ;;  %v2726_v28 = vpop.f32.mrb[97].mxu0  ;;  %v5556_v23 = vld [vmem:[#allocation7 + $0x218] sm:$0xff] }
0x1081   : > { %v2766_v42 = vadd.f32 %v2765_v41, %v2669_v26  ;;  %v2727_v60 = vadd.f32 %v2726_v28, %v2668_v19  ;;  %v2767_v46 = vpop.f32.mrb[97].mxu1  ;;  %v2728_v47 = vpop.f32.mrb[98].mxu0  ;;  %5941 = vst [vmem:[#allocation12_spill] sm:$0xff] %v5556_v23 }
0x1082   : > { %4667 = vtanh.f32 %v2725_v40  ;;  %v2768_v54 = vadd.f32 %v2767_v46, %v2670_v37  ;;  %v2769_v55 = vpop.f32.mrb[98].mxu1  ;;  %v2729_v16 = vpop.f32.mrb[99].mxu0 }
0x1083   : > { %4669 = vtanh.f32 %v2766_v42  ;;  %v2770_v52 = vpop.f32.mrb[99].mxu1 }
0x1084   : > { %4671 = vtanh.f32 %v2727_v60 }
0x1085   : > { %4673 = vtanh.f32 %v2768_v54 }
0x108c   : > { %v4668_v15 = vpop.eup %4667 }
0x108d   : > { %v4670_v39 = vpop.eup %4669  ;;  %v2781_v11 = vpack.c.bf16 %v4668_v15, %v4668_v15 }
0x108e   : > { %v4672_v10 = vpop.eup %4671  ;;  %v2783_v12 = vpack.c.bf16 %v4670_v39, %v4670_v39 }
0x108f   : > { %v4674_v44 = vpop.eup %4673  ;;  %v2782_v62 = vpack.c.bf16 %v4672_v10, %v4672_v10  ;;  %v2789_v34 = vand.u32 %v2781_v11, %v5064_v2 }
0x1090   : > { %v2784_v20 = vpack.c.bf16 %v4674_v44, %v4674_v44  ;;  %v2795_v45 = vand.u32 %v2783_v12, %v5064_v2 }
0x1091   : > { %v2792_v31 = vand.u32 %v2782_v62, %v5064_v2  ;;  %v4626_v62 = vld [vmem:[#allocation5 + $0x50] sm:$0xff]  }
0x1092   : > { %v2798_v36 = vand.u32 %v2784_v20, %v5064_v2  ;;  %v5570_v20 = vld [vmem:[#allocation7 + $0x280] sm:$0xff] }
0x1093   : > { %2800 = vmatprep.subr.bf16.mxu0 %v2792_v31  ;;  %5942 = vst [vmem:[#allocation13_spill] sm:$0xff] %v5570_v20  ;;  %v5572_v31 = vld [vmem:[#allocation7 + $0x290] sm:$0xff] }
0x1094   : > { %2841 = vmatprep.subr.bf16.mxu1 %v2798_v36  ;;  %2801 = vmatpush1.bf16.msra.mxu0 %v2789_v34  ;;  %5943 = vst [vmem:[#allocation14_spill] sm:$0xff] %v5572_v31  ;;  %v5574_v34 = vld [vmem:[#allocation7 + $0x288] sm:$0xff] }
0x1095   : > { %2842 = vmatpush1.bf16.msra.mxu1 %v2795_v45  ;;  %5944 = vst [vmem:[#allocation15_spill] sm:$0xff] %v5574_v34  ;;  %v5576_v45 = vld [vmem:[#allocation7 + $0x298] sm:$0xff] }
0x1096   : > { %5945 = vst [vmem:[#allocation16_spill] sm:$0xff] %v5576_v45 }
0x1097   : > { %4486 = vmatmul.mubr.msk.bf16.vlgmr.msra.gmra.mrb[100].mxu0 %vm751_vm8, %v2776_v63 }
0x1098   : > { %4487 = vmatmul.mubr.msk.bf16.vlgmr.msra.gmra.mrb[100].mxu1 %vm751_vm8, %v2776_v63  ;;  %2952 = vmatprep.mubr.bf16.mxu0 %v5901_v13  ;;  %v5578_v63 = vld [vmem:[#allocation7 + $0x2a0] sm:$0xff] }
0x1099   : > { %2995 = vmatprep.mubr.bf16.mxu1 %v5901_v13  ;;  %5946 = vst [vmem:[#allocation17_spill] sm:$0xff] %v5578_v63 }
0x116a   : > { %v2834_v22 = vpop.f32.mrb[100].mxu0 }
0x116b   : > { %v2835_v26 = vadd.f32 %v2834_v22, %v5550_v7  ;;  %v2875_v19 = vpop.f32.mrb[100].mxu1  ;;  %v2836_v33 = vpop.f32.mrb[101].mxu0 }
0x116c   : > { %v2876_v37 = vadd.f32 %v2875_v19, %v5552_v21  ;;  %v2837_v40 = vadd.f32 %v2836_v33, %v5554_v4  ;;  %v2877_v41 = vpop.f32.mrb[101].mxu1  ;;  %v2838_v28 = vpop.f32.mrb[102].mxu0  ;;  %v5581_v33 = vld [vmem:[#allocation7 + $0x2b0] sm:$0xff] }
0x116d   : > { %v2882_v42 = vmax.f32 %v2835_v26, 0.0  ;;  %v2878_v60 = vadd.f32 %v2877_v41, %v5556_v23  ;;  %v2879_v46 = vpop.f32.mrb[102].mxu1  ;;  %v2839_v47 = vpop.f32.mrb[103].mxu0  ;;  %5947 = vst [vmem:[#allocation18_spill] sm:$0xff] %v5581_v33 }
0x116e   : > { %v2884_v54 = vmax.f32 %v2876_v37, 0.0  ;;  %v2883_v55 = vmax.f32 %v2837_v40, 0.0  ;;  %v2880_v16 = vpop.f32.mrb[103].mxu1  ;;  %v5583_v37 = vld [vmem:[#allocation7 + $0x2a8] sm:$0xff] }
0x116f   : > { %v2896_v52 = vpack.c.bf16 %v2882_v42, %v2882_v42  ;;  %v2885_v15 = vmax.f32 %v2878_v60, 0.0  ;;  %5948 = vst [vmem:[#allocation19_spill] sm:$0xff] %v5583_v37  ;;  %v5587_v60 = vld [vmem:[#allocation7 + $0x2b8] sm:$0xff] }
0x1170   : > { %v2898_v39 = vpack.c.bf16 %v2884_v54, %v2884_v54  ;;  %v2897_v10 = vpack.c.bf16 %v2883_v55, %v2883_v55  ;;  %5949 = vst [vmem:[#allocation20_spill] sm:$0xff] %v5587_v60 }
0x1171   : > { %v2899_v11 = vpack.c.bf16 %v2885_v15, %v2885_v15  ;;  %v2909_v44 = vsel %vm641_vm6, %v2896_v52, 0 }
0x1172   : > { %4489 = vmatprep.subr.msk.bf16.mxu0 %vm641_vm6, %v2897_v10  ;;  %v2915_v12 = vsel %vm641_vm6, %v2898_v39, 0 }
0x1173   : > { %4491 = vmatprep.subr.msk.bf16.mxu1 %vm641_vm6, %v2899_v11  ;;  %2921 = vmatpush1.bf16.msra.mxu0 %v2909_v44 }
0x1174   : > { %2964 = vmatpush1.bf16.msra.mxu1 %v2915_v12 }
0x1176   : > { %4490 = vmatmul.mubr.msk.bf16.vlgmr.msra.gmra.mrb[104].mxu0 %vm637_vm7, %v4626_v62 }
0x1177   : > { %4492 = vmatmul.mubr.msk.bf16.vlgmr.msra.gmra.mrb[104].mxu1 %vm637_vm7, %v4626_v62  ;;  %3086 = vmatprep.mubr.bf16.mxu0 %v5901_v13 }
0x1178   : > { %3139 = vmatprep.mubr.bf16.mxu1 %v5901_v13 }
0x1249   : > { %v2954_v36 = vpop.f32.mrb[104].mxu0 }
0x124a   : > { %v2955_v22 = vadd.f32 %v2954_v36, %v5570_v20  ;;  %v2997_v26 = vpop.f32.mrb[104].mxu1  ;;  %v2956_v19 = vpop.f32.mrb[105].mxu0 }
0x124b   : > { %v2998_v40 = vadd.f32 %v2997_v26, %v5572_v31  ;;  %v2957_v41 = vadd.f32 %v2956_v19, %v5574_v34  ;;  %v2999_v28 = vpop.f32.mrb[105].mxu1  ;;  %v2958_v42 = vpop.f32.mrb[106].mxu0  ;;  %v4627_v34 = vld [vmem:[#allocation5 + $0x60] sm:$0xff]  }
0x124c   : > { %v3000_v46 = vadd.f32 %v2999_v28, %v5576_v45  ;;  %v2959_v47 = vadd.f32 %v2958_v42, %v5578_v63  ;;  %v3001_v54 = vpop.f32.mrb[106].mxu1  ;;  %v2960_v55 = vpop.f32.mrb[107].mxu0  ;;  %v3006_v39 = vmax.f32 %v2955_v22, 0.0  ;;  %v4628_v22 = vld [vmem:[#allocation5 + $0x68] sm:$0xff]  }
0x124d   : > { %v3002_v16 = vadd.f32 %v3001_v54, %v5581_v33  ;;  %v2961_v52 = vadd.f32 %v2960_v55, %v5583_v37  ;;  %v3003_v15 = vpop.f32.mrb[107].mxu1  ;;  %v3008_v44 = vmax.f32 %v2998_v40, 0.0  ;;  %v3007_v12 = vmax.f32 %v2957_v41, 0.0  ;;  %v5606_v40 = vld [vmem:[#allocation7 + $0x308] sm:$0xff]  ;;  %v5608_v41 = vld [vmem:[#allocation7 + $0x318] sm:$0xff] }
0x124e   : > { %v3010_v10 = vmax.f32 %v2959_v47, 0.0  ;;  %v3004_v11 = vadd.f32 %v3003_v15, %v5587_v60  ;;  %v3009_v26 = vmax.f32 %v3000_v46, 0.0  ;;  %5952 = vst [vmem:[#allocation23_spill] sm:$0xff] %v5606_v40  ;;  %5953 = vst [vmem:[#allocation24_spill] sm:$0xff] %v5608_v41  ;;  %v5610_v46 = vld [vmem:[#allocation7 + $0x320] sm:$0xff] }
0x124f   : > { %v3012_v62 = vmax.f32 %v3002_v16, 0.0  ;;  %v3011_v36 = vmax.f32 %v2961_v52, 0.0  ;;  %5954 = vst [vmem:[#allocation25_spill] sm:$0xff] %v5610_v46  ;;  %v5613_v16 = vld [vmem:[#allocation7 + $0x330] sm:$0xff]  ;;  %v5615_v52 = vld [vmem:[#allocation7 + $0x328] sm:$0xff]  ;;  %v5626_v60 = vld [vmem:[#allocation7 + $0x340] sm:$0xff] }
0x1250   : > { %v3034_v19 = vpack.c.bf16 %v3010_v10, %v3006_v39  ;;  %v3013_v28 = vmax.f32 %v3004_v11, 0.0  ;;  %5955 = vst [vmem:[#allocation26_spill] sm:$0xff] %v5613_v16  ;;  %5956 = vst [vmem:[#allocation27_spill] sm:$0xff] %v5615_v52 }
0x1251   : > { %v3036_v45 = vpack.c.bf16 %v3012_v62, %v3008_v44  ;;  %v3035_v42 = vpack.c.bf16 %v3011_v36, %v3007_v12  ;;  %v5619_v44 = vld [vmem:[#allocation7 + $0x338] sm:$0xff]  ;;  %5958 = vst [vmem:[#allocation29_spill] sm:$0xff] %v5626_v60 }
0x1252   : > { %v3037_v63 = vpack.c.bf16 %v3013_v28, %v3009_v26  ;;  %5957 = vst [vmem:[#allocation28_spill] sm:$0xff] %v5619_v44 }
0x1253   : > { %3054 = vmatprep.subr.bf16.mxu0 %v3035_v42 }
0x1254   : > { %3107 = vmatprep.subr.bf16.mxu1 %v3037_v63  ;;  %3055 = vmatpush1.bf16.msra.mxu0 %v3034_v19  ;;  %v5602_v63 = vld [vmem:[#allocation7 + $0x300] sm:$0xff] }
0x1255   : > { %3108 = vmatpush1.bf16.msra.mxu1 %v3036_v45  ;;  %5950 = vst [vmem:[#allocation21_spill] sm:$0xff] %v5602_v63  ;;  %v5604_v45 = vld [vmem:[#allocation7 + $0x310] sm:$0xff] }
0x1256   : > { %5951 = vst [vmem:[#allocation22_spill] sm:$0xff] %v5604_v45 }
0x1257   : > { %4495 = vmatmul.mubr.msk.bf16.vlgmr.msra.gmra.mrb[108].mxu0 %vm536_vm5, %v4627_v34 }
0x1258   : > { %4497 = vmatmul.mubr.msk.bf16.vlgmr.msra.gmra.mrb[108].mxu1 %vm536_vm5, %v4627_v34  ;;  %3096 = vmatprep.mubr.bf16.mxu0 %v5901_v13 }
0x1259   : > { %3149 = vmatprep.mubr.bf16.mxu1 %v5901_v13 }
0x125f   : > { %4496 = vmatmul.mubr.msk.bf16.gmra.mrb[112].mxu0 %vm536_vm5, %v4628_v22 }
0x1260   : > { %4498 = vmatmul.mubr.msk.bf16.gmra.mrb[112].mxu1 %vm536_vm5, %v4628_v22  ;;  %3224 = vmatprep.mubr.bf16.mxu0 %v5901_v13 }
0x1261   : > { %3265 = vmatprep.mubr.bf16.mxu1 %v5901_v13 }
0x132a   : > { %v3088_v34 = vpop.f32.mrb[108].mxu0 }
0x132b   : > { %v3089_v47 = vadd.f32 %v3088_v34, %v5602_v63  ;;  %v3141_v54 = vpop.f32.mrb[108].mxu1  ;;  %v3090_v55 = vpop.f32.mrb[109].mxu0 }
0x132c   : > { %v3142_v15 = vadd.f32 %v3141_v54, %v5604_v45  ;;  %v3091_v39 = vadd.f32 %v3090_v55, %v5606_v40  ;;  %v3143_v10 = vpop.f32.mrb[109].mxu1  ;;  %v3092_v11 = vpop.f32.mrb[110].mxu0 }
0x132d   : > { %v3144_v12 = vadd.f32 %v3143_v10, %v5608_v41  ;;  %v3093_v62 = vadd.f32 %v3092_v11, %v5610_v46  ;;  %v3145_v36 = vpop.f32.mrb[110].mxu1  ;;  %v3094_v26 = vpop.f32.mrb[111].mxu0  ;;  %v3160_v22 = vmax.f32 %v3089_v47, 0.0  ;;  %v5628_v41 = vld [vmem:[#allocation7 + $0x350] sm:$0xff] }
0x132e   : > { %v3146_v19 = vadd.f32 %v3145_v36, %v5613_v16  ;;  %v3095_v28 = vadd.f32 %v3094_v26, %v5615_v52  ;;  %v3147_v42 = vpop.f32.mrb[111].mxu1  ;;  %v3162_v55 = vmax.f32 %v3142_v15, 0.0  ;;  %v3161_v40 = vmax.f32 %v3091_v39, 0.0  ;;  %5959 = vst [vmem:[#allocation30_spill] sm:$0xff] %v5628_v41  ;;  %v5630_v36 = vld [vmem:[#allocation7 + $0x348] sm:$0xff]  ;;  %v5634_v15 = vld [vmem:[#allocation7 + $0x360] sm:$0xff] }
0x132f   : > { %v3164_v34 = vmax.f32 %v3093_v62, 0.0  ;;  %v3148_v54 = vadd.f32 %v3147_v42, %v5619_v44  ;;  %v3163_v10 = vmax.f32 %v3144_v12, 0.0  ;;  %5960 = vst [vmem:[#allocation31_spill] sm:$0xff] %v5630_v36  ;;  %v5632_v62 = vld [vmem:[#allocation7 + $0x358] sm:$0xff]  ;;  %5962 = vst [vmem:[#allocation33_spill] sm:$0xff] %v5634_v15  ;;  %v5637_v42 = vld [vmem:[#allocation7 + $0x370] sm:$0xff] }
0x1330   : > { %v3166_v45 = vmax.f32 %v3146_v19, 0.0  ;;  %v3165_v63 = vmax.f32 %v3095_v28, 0.0  ;;  %5961 = vst [vmem:[#allocation32_spill] sm:$0xff] %v5632_v62  ;;  %5963 = vst [vmem:[#allocation34_spill] sm:$0xff] %v5637_v42 }
0x1331   : > { %v3181_v11 = vpack.c.bf16 %v3164_v34, %v3160_v22  ;;  %v3167_v46 = vmax.f32 %v3148_v54, 0.0  ;;  %v5639_v22 = vld [vmem:[#allocation7 + $0x368] sm:$0xff] }
0x1332   : > { %v3183_v26 = vpack.c.bf16 %v3166_v45, %v3162_v55  ;;  %v3182_v52 = vpack.c.bf16 %v3165_v63, %v3161_v40  ;;  %v3098_v47 = vpop.f32.mrb[112].mxu0  ;;  %5964 = vst [vmem:[#allocation35_spill] sm:$0xff] %v5639_v22  ;;  %v3283_v34 = vld [vmem:[%s5054_s30 + $0x68] sm:$0x1f]  ;;  %v5644_v55 = vld [vmem:[#allocation7 + $0x378] sm:$0xff] }
0x1333   : > { %v3184_v39 = vpack.c.bf16 %v3167_v46, %v3163_v10  ;;  %v3099_v19 = vadd.f32 %v3098_v47, %v5626_v60  ;;  %v3151_v28 = vpop.f32.mrb[112].mxu1  ;;  %v3100_v12 = vpop.f32.mrb[113].mxu0  ;;  %v3285_v46 = vld [vmem:[%s5054_s30 + $0x78] sm:$0x1f] }
0x1334   : > { %v3152_v54 = vadd.f32 %v3151_v28, %v5628_v41  ;;  %v3101_v63 = vadd.f32 %v3100_v12, %v5630_v36  ;;  %v3153_v45 = vpop.f32.mrb[113].mxu1  ;;  %v3102_v40 = vpop.f32.mrb[114].mxu0  ;;  %3192 = vmatprep.subr.bf16.mxu0 %v3182_v52  ;;  %v3307_v41 = vpack.c.bf16 %v3283_v34, %v3283_v34  ;;  %v3282_v52 = vld [vmem:[%s5054_s30 + $0x60] sm:$0x1f] }
0x1335   : > { %v3154_v10 = vadd.f32 %v3153_v45, %v5632_v62  ;;  %v3103_v47 = vadd.f32 %v3102_v40, %v5634_v15  ;;  %v3155_v60 = vpop.f32.mrb[114].mxu1  ;;  %3233 = vmatprep.subr.bf16.mxu1 %v3184_v39  ;;  %v3104_v44 = vpop.f32.mrb[115].mxu0  ;;  %3193 = vmatpush1.bf16.msra.mxu0 %v3181_v11  ;;  %v3168_v16 = vmax.f32 %v3099_v19, 0.0  ;;  %v3309_v45 = vpack.c.bf16 %v3285_v46, %v3285_v46  ;;  %v3284_v62 = vld [vmem:[%s5054_s30 + $0x70] sm:$0x1f] }
0x1336   : > { %v3156_v28 = vadd.f32 %v3155_v60, %v5637_v42  ;;  %v3105_v12 = vadd.f32 %v3104_v44, %v5639_v22  ;;  %v3157_v36 = vpop.f32.mrb[115].mxu1  ;;  %3234 = vmatpush1.bf16.msra.mxu1 %v3183_v26  ;;  %v3170_v31 = vmax.f32 %v3152_v54, 0.0  ;;  %v3169_v40 = vmax.f32 %v3101_v63, 0.0 }
0x1337   : > { %v3172_v37 = vmax.f32 %v3103_v47, 0.0  ;;  %v3158_v33 = vadd.f32 %v3157_v36, %v5644_v55  ;;  %v3171_v20 = vmax.f32 %v3154_v10, 0.0  ;;  %v3306_v60 = vpack.c.bf16 %v3282_v52, %v3282_v52  ;;  %v3176_v36 = vld [vmem:[#allocation5 + $0x70] sm:$0x7] }
0x1338   : > { %v3174_v15 = vmax.f32 %v3156_v28, 0.0  ;;  %v3173_v39 = vmax.f32 %v3105_v12, 0.0  ;;  %v3330_v26 = vand.u32 %v3307_v41, %v5068_v5  ;;  %v3308_v34 = vpack.c.bf16 %v3284_v62, %v3284_v62 }
0x1339   : > { %v3185_v11 = vpack.c.bf16 %v3172_v37, %v3168_v16  ;;  %v3175_v23 = vmax.f32 %v3158_v33, 0.0  ;;  %v3336_v19 = vand.u32 %v3309_v45, %v5068_v5  ;;  %v3327_v54 = vand.u32 %v3306_v60, %v5068_v5  ;;  %v3178_v33 = vld [vmem:[#allocation7 + $0x388] sm:$0x1f]  ;;  %v3180_v16 = vld [vmem:[#allocation7 + $0x398] sm:$0x1f] }
0x133a   : > { %v3187_v42 = vpack.c.bf16 %v3174_v15, %v3170_v31  ;;  %v3186_v44 = vpack.c.bf16 %v3173_v39, %v3169_v40  ;;  %v3333_v37 = vand.u32 %v3308_v34, %v5068_v5  ;;  %v4630_v5 = vld [vmem:[#allocation5 + $0x8] sm:$0xff]   ;;  %v3179_v31 = vld [vmem:[#allocation7 + $0x390] sm:$0x1f] }
0x133b   : > { %v3188_v22 = vpack.c.bf16 %v3175_v23, %v3171_v20  ;;  %v4629_v23 = vld [vmem:[#allocation5] sm:$0xff]  }
0x133c   : > { %3194 = vmatprep.subr.bf16.mxu0 %v3186_v44  ;;  %v3177_v20 = vld [vmem:[#allocation7 + $0x380] sm:$0x1f] }
0x133d   : > { %3235 = vmatprep.subr.bf16.mxu1 %v3188_v22  ;;  %3195 = vmatpush1.bf16.msra.mxu0 %v3185_v11 }
0x133e   : > { %3236 = vmatpush1.bf16.msra.mxu1 %v3187_v42  ;;  %3338 = vmatprep.subr.bf16.mxu0 %v3330_v26 }
0x133f   : > { %3391 = vmatprep.subr.bf16.mxu1 %v3336_v19 }
0x1340   : > { %4499 = vmatmul.mubr.msk.bf16.vlgmr.msra.gmra.mrb[116].mxu0 %vm427_vm4, %v3176_v36 }
0x1341   : > { %4500 = vmatmul.mubr.msk.bf16.vlgmr.msra.gmra.mrb[116].mxu1 %vm427_vm4, %v3176_v36  ;;  %3339 = vmatpush1.bf16.msra.mxu0 %v3327_v54 }
0x1342   : > { %3392 = vmatpush1.bf16.msra.mxu1 %v3333_v37  ;;  %3370 = vmatprep.mubr.bf16.mxu0 %v5901_v13 }
0x1343   : > { %3423 = vmatprep.mubr.bf16.mxu1 %v5901_v13 }
0x1348   : > { %4503 = vmatmul.mubr.msk.bf16.vlgmr.msra.gmra.mrb[120].mxu0 %vm257_vm3, %v4629_v23 }
0x1349   : > { %4505 = vmatmul.mubr.msk.bf16.vlgmr.msra.gmra.mrb[120].mxu1 %vm257_vm3, %v4629_v23  ;;  %3380 = vmatprep.mubr.bf16.mxu0 %v5901_v13 }
0x134a   : > { %3433 = vmatprep.mubr.bf16.mxu1 %v5901_v13 }
0x1350   : > { %4504 = vmatmul.mubr.msk.bf16.gmra.mrb[124].mxu0 %vm257_vm3, %v4630_v5 }
0x1351   : > { %4506 = vmatmul.mubr.msk.bf16.gmra.mrb[124].mxu1 %vm257_vm3, %v4630_v5  ;;  %3518 = vmatprep.mubr.bf16.mxu0 %v5901_v13 }
0x1352   : > { %3561 = vmatprep.mubr.bf16.mxu1 %v5901_v13 }
0x1413   : > { %v3226_v41 = vpop.f32.mrb[116].mxu0 }
0x1414   : > { %v3227_v62 = vadd.f32 %v3226_v41, %v3177_v20  ;;  %v3267_v15 = vpop.f32.mrb[116].mxu1  ;;  %v3228_v42 = vpop.f32.mrb[117].mxu0 }
0x1415   : > { %v3268_v22 = vadd.f32 %v3267_v15, %v3179_v31  ;;  %v3229_v63 = vadd.f32 %v3228_v42, %v3178_v33  ;;  %v3269_v46 = vpop.f32.mrb[117].mxu1  ;;  %v3230_v10 = vpop.f32.mrb[118].mxu0 }
0x1416   : > { %4675 = vtanh.f32 %v3227_v62  ;;  %v3270_v47 = vadd.f32 %v3269_v46, %v3180_v16  ;;  %v3271_v28 = vpop.f32.mrb[118].mxu1  ;;  %v3231_v12 = vpop.f32.mrb[119].mxu0 }
0x1417   : > { %4677 = vtanh.f32 %v3268_v22  ;;  %v3272_v52 = vpop.f32.mrb[119].mxu1 }
0x1418   : > { %4679 = vtanh.f32 %v3229_v63 }
0x1419   : > { %4681 = vtanh.f32 %v3270_v47 }
0x141b   : > { %v3372_v45 = vpop.f32.mrb[120].mxu0 }
0x141c   : > { %v3373_v40 = vadd.f32 %v3372_v45, %v5438_v27  ;;  %v3425_v39 = vpop.f32.mrb[120].mxu1  ;;  %v3374_v11 = vpop.f32.mrb[121].mxu0 }
0x141d   : > { %v3426_v60 = vadd.f32 %v3425_v39, %v5440_v32  ;;  %v3375_v44 = vadd.f32 %v3374_v11, %v5442_v49  ;;  %v3427_v26 = vpop.f32.mrb[121].mxu1  ;;  %v3376_v34 = vpop.f32.mrb[122].mxu0 }
0x141e   : > { %v3428_v19 = vadd.f32 %v3427_v26, %v5444_v9  ;;  %v3377_v36 = vadd.f32 %v3376_v34, %v5446_v29  ;;  %v3429_v54 = vpop.f32.mrb[122].mxu1  ;;  %v3378_v37 = vpop.f32.mrb[123].mxu0  ;;  %v3444_v32 = vmax.f32 %v3373_v40, 0.0 }
0x141f   : > { %v3430_v23 = vadd.f32 %v3429_v54, %v5449_v51  ;;  %v3379_v27 = vadd.f32 %v3378_v37, %v5451_v38  ;;  %v3431_v5 = vpop.f32.mrb[123].mxu1  ;;  %v3446_v9 = vmax.f32 %v3426_v60, 0.0  ;;  %v3445_v41 = vmax.f32 %v3375_v44, 0.0 }
0x1420   : > { %v4676_v20 = vpop.eup %4675  ;;  %v3448_v31 = vmax.f32 %v3377_v36, 0.0  ;;  %v3432_v49 = vadd.f32 %v3431_v5, %v5455_v48  ;;  %v3447_v15 = vmax.f32 %v3428_v19, 0.0 }
0x1421   : > { %v4678_v33 = vpop.eup %4677  ;;  %3278 = vst [vmem:[%s5324_s18 + $0x40] sm:$0x1f] %v4676_v20  ;;  %v3450_v29 = vmax.f32 %v3430_v23, 0.0  ;;  %v3449_v16 = vmax.f32 %v3379_v27, 0.0 }
0x1422   : > { %v4680_v62 = vpop.eup %4679  ;;  %3280 = vst [vmem:[%s5324_s18 + $0x50] sm:$0x1f] %v4678_v33  ;;  %v3470_v51 = vpack.c.bf16 %v3448_v31, %v3444_v32  ;;  %v3451_v42 = vmax.f32 %v3432_v49, 0.0 }
0x1423   : > { %v4682_v38 = vpop.eup %4681  ;;  %3279 = vst [vmem:[%s5324_s18 + $0x48] sm:$0x1f] %v4680_v62  ;;  %v3472_v22 = vpack.c.bf16 %v3450_v29, %v3446_v9  ;;  %v3471_v63 = vpack.c.bf16 %v3449_v16, %v3445_v41  ;;  %v3382_v46 = vpop.f32.mrb[124].mxu0 }
0x1424   : > { %3281 = vst [vmem:[%s5324_s18 + $0x58] sm:$0x1f] %v4682_v38  ;;  %v3473_v10 = vpack.c.bf16 %v3451_v42, %v3447_v15  ;;  %v3383_v48 = vadd.f32 %v3382_v46, %v5463_v53  ;;  %v3435_v47 = vpop.f32.mrb[124].mxu1  ;;  %v3384_v28 = vpop.f32.mrb[125].mxu0 }
0x1425   : > { %v3436_v12 = vadd.f32 %v3435_v47, %v5466_v14  ;;  %v3385_v52 = vadd.f32 %v3384_v28, %v5468_v61  ;;  %v3437_v45 = vpop.f32.mrb[125].mxu1  ;;  %v3386_v40 = vpop.f32.mrb[126].mxu0  ;;  %3486 = vmatprep.subr.bf16.mxu0 %v3471_v63 }
0x1426   : > { %v3438_v39 = vadd.f32 %v3437_v45, %v5471_v0  ;;  %v3387_v11 = vadd.f32 %v3386_v40, %v5473_v30  ;;  %v3439_v60 = vpop.f32.mrb[126].mxu1  ;;  %3529 = vmatprep.subr.bf16.mxu1 %v3473_v10  ;;  %v3388_v44 = vpop.f32.mrb[127].mxu0  ;;  %3487 = vmatpush1.bf16.msra.mxu0 %v3470_v51  ;;  %v3452_v14 = vmax.f32 %v3383_v48, 0.0 }
0x1427   : > { %v3440_v26 = vadd.f32 %v3439_v60, %v5477_v35  ;;  %v3389_v53 = vadd.f32 %v3388_v44, %v5479_v1  ;;  %v3441_v34 = vpop.f32.mrb[127].mxu1  ;;  %3530 = vmatpush1.bf16.msra.mxu1 %v3472_v22  ;;  %v3454_v36 = vmax.f32 %v3436_v12, 0.0  ;;  %v3453_v54 = vmax.f32 %v3385_v52, 0.0  ;;  %v4631_v35 = vld [vmem:[#allocation5 + $0x10] sm:$0xff]  }
0x1428   : > { %v3456_v19 = vmax.f32 %v3387_v11, 0.0  ;;  %v3442_v61 = vadd.f32 %v3441_v34, %v5483_v8  ;;  %v3455_v23 = vmax.f32 %v3438_v39, 0.0 }
0x1429   : > { %v3458_v37 = vmax.f32 %v3440_v26, 0.0  ;;  %v3457_v0 = vmax.f32 %v3389_v53, 0.0 }
0x142a   : > { %v3474_v30 = vpack.c.bf16 %v3456_v19, %v3452_v14  ;;  %v3459_v27 = vmax.f32 %v3442_v61, 0.0 }
0x142b   : > { %v3476_v5 = vpack.c.bf16 %v3458_v37, %v3454_v36  ;;  %v3475_v20 = vpack.c.bf16 %v3457_v0, %v3453_v54 }
0x142c   : > { %v3477_v32 = vpack.c.bf16 %v3459_v27, %v3455_v23  ;;  %v3681_v27 = vld [vmem:[#allocation7 + $0x190] sm:$0x7] }
0x142d   : > { %3488 = vmatprep.subr.bf16.mxu0 %v3475_v20 }
0x142e   : > { %3531 = vmatprep.subr.bf16.mxu1 %v3477_v32  ;;  %3489 = vmatpush1.bf16.msra.mxu0 %v3474_v30  ;;  %v3682_v32 = vld [vmem:[#allocation7 + $0x198] sm:$0x7] }
0x142f   : > { %3532 = vmatpush1.bf16.msra.mxu1 %v3476_v5  ;;  %v3680_v5 = vld [vmem:[#allocation7 + $0x188] sm:$0x7] }
0x1431   : > { %4508 = vmatmul.mubr.msk.bf16.vlgmr.msra.gmra.mrb[128].mxu0 %vm427_vm4, %v4631_v35 }
0x1432   : > { %4509 = vmatmul.mubr.msk.bf16.vlgmr.msra.gmra.mrb[128].mxu1 %vm427_vm4, %v4631_v35  ;;  %3624 = vmatprep.mubr.bf16.mxu0 %v5901_v13 }
0x1433   : > { %3665 = vmatprep.mubr.bf16.mxu1 %v5901_v13 }
0x1504   : > { %v3520_v1 = vpop.f32.mrb[128].mxu0 }
0x1505   : > { %v3521_v8 = vadd.f32 %v3520_v1, %v5494_v58  ;;  %v3563_v31 = vpop.f32.mrb[128].mxu1  ;;  %v3522_v49 = vpop.f32.mrb[129].mxu0 }
0x1506   : > { %v3564_v33 = vadd.f32 %v3563_v31, %v5496_v18  ;;  %v3523_v9 = vadd.f32 %v3522_v49, %v5498_v59  ;;  %v3565_v41 = vpop.f32.mrb[129].mxu1  ;;  %v3524_v29 = vpop.f32.mrb[130].mxu0 }
0x1507   : > { %v3566_v16 = vadd.f32 %v3565_v41, %v5500_v6  ;;  %v3525_v62 = vadd.f32 %v3524_v29, %v5502_v25  ;;  %v3567_v15 = vpop.f32.mrb[130].mxu1  ;;  %v3526_v51 = vpop.f32.mrb[131].mxu0  ;;  %v3572_v58 = vmax.f32 %v3521_v8, 0.0 }
0x1508   : > { %v3568_v42 = vadd.f32 %v3567_v15, %v5505_v56  ;;  %v3527_v38 = vadd.f32 %v3526_v51, %v5507_v17  ;;  %v3569_v22 = vpop.f32.mrb[131].mxu1  ;;  %v3574_v18 = vmax.f32 %v3564_v33, 0.0  ;;  %v3573_v10 = vmax.f32 %v3523_v9, 0.0  ;;  %v3580_v56 = vld [vmem:[#allocation5 + $0x20] sm:$0xf] }
0x1509   : > { %v3576_v63 = vmax.f32 %v3525_v62, 0.0  ;;  %v3570_v46 = vadd.f32 %v3569_v22, %v5511_v57  ;;  %v3575_v47 = vmax.f32 %v3566_v16, 0.0 }
0x150a   : > { %v3578_v59 = vmax.f32 %v3568_v42, 0.0  ;;  %v3577_v48 = vmax.f32 %v3527_v38, 0.0 }
0x150b   : > { %v3585_v28 = vpack.c.bf16 %v3576_v63, %v3572_v58  ;;  %v3579_v6 = vmax.f32 %v3570_v46, 0.0 }
0x150c   : > { %v3587_v12 = vpack.c.bf16 %v3578_v59, %v3574_v18  ;;  %v3586_v25 = vpack.c.bf16 %v3577_v48, %v3573_v10 }
0x150d   : > { %v3588_v52 = vpack.c.bf16 %v3579_v6, %v3575_v47  ;;  %v3788_v47 = vld [vmem:[#allocation5 + $0x40] sm:$0xf] }
0x150e   : > { %3592 = vmatprep.subr.bf16.mxu0 %v3586_v25 }
0x150f   : > { %3633 = vmatprep.subr.bf16.mxu1 %v3588_v52  ;;  %3593 = vmatpush1.bf16.msra.mxu0 %v3585_v28 }
0x1510   : > { %3634 = vmatpush1.bf16.msra.mxu1 %v3587_v12 }
0x1512   : > { %4510 = vmatmul.mubr.msk.bf16.vlgmr.msra.gmra.mrb[132].mxu0 %vm536_vm5, %v3580_v56 }
0x1513   : > { %4511 = vmatmul.mubr.msk.bf16.vlgmr.msra.gmra.mrb[132].mxu1 %vm536_vm5, %v3580_v56  ;;  %3734 = vmatprep.mubr.bf16.mxu0 %v5901_v13 }
0x1514   : > { %3775 = vmatprep.mubr.bf16.mxu1 %v5901_v13 }
0x15e5   : > { %v3626_v17 = vpop.f32.mrb[132].mxu0 }
0x15e6   : > { %v3627_v57 = vadd.f32 %v3626_v17, %v5522_v3  ;;  %v3667_v45 = vpop.f32.mrb[132].mxu1  ;;  %v3628_v40 = vpop.f32.mrb[133].mxu0 }
0x15e7   : > { %v3668_v39 = vadd.f32 %v3667_v45, %v5524_v43  ;;  %v3629_v11 = vadd.f32 %v3628_v40, %v5526_v24  ;;  %v3669_v60 = vpop.f32.mrb[133].mxu1  ;;  %v3630_v44 = vpop.f32.mrb[134].mxu0  ;;  %v3678_v24 = vld [vmem:[#allocation5 + $0x30] sm:$0x3]  ;;  %v5965_v45 = vld [vmem:[#allocation12_spill] sm:$0xff] }
0x15e8   : > { %v3674_v26 = vmax.f32 %v3627_v57, 0.0  ;;  %v3670_v53 = vadd.f32 %v3669_v60, %v5528_v50  ;;  %v3671_v34 = vpop.f32.mrb[134].mxu1  ;;  %v3631_v14 = vpop.f32.mrb[135].mxu0  ;;  %v3679_v50 = vld [vmem:[#allocation7 + $0x180] sm:$0x7] }
0x15e9   : > { %v3676_v19 = vmax.f32 %v3668_v39, 0.0  ;;  %v3675_v61 = vmax.f32 %v3629_v11, 0.0  ;;  %v3672_v36 = vpop.f32.mrb[135].mxu1 }
0x15ea   : > { %v3683_v54 = vpack.c.bf16 %v3674_v26, %v3674_v26  ;;  %v3677_v37 = vmax.f32 %v3670_v53, 0.0 }
0x15eb   : > { %v3685_v0 = vpack.c.bf16 %v3676_v19, %v3676_v19  ;;  %v3684_v3 = vpack.c.bf16 %v3675_v61, %v3675_v61 }
0x15ec   : > { %v3686_v23 = vpack.c.bf16 %v3677_v37, %v3677_v37  ;;  %v3691_v30 = vsel %vm641_vm6, %v3683_v54, 0  ;;  %v5966_v54 = vld [vmem:[#allocation13_spill] sm:$0xff] }
0x15ed   : > { %4512 = vmatprep.subr.msk.bf16.mxu0 %vm641_vm6, %v3684_v3  ;;  %v3697_v43 = vsel %vm641_vm6, %v3685_v0, 0 }
0x15ee   : > { %4514 = vmatprep.subr.msk.bf16.mxu1 %vm641_vm6, %v3686_v23  ;;  %3703 = vmatpush1.bf16.msra.mxu0 %v3691_v30  ;;  %v5967_v23 = vld [vmem:[#allocation14_spill] sm:$0xff] }
0x15ef   : > { %3744 = vmatpush1.bf16.msra.mxu1 %v3697_v43  ;;  %v5968_v43 = vld [vmem:[#allocation15_spill] sm:$0xff] }
0x15f1   : > { %4513 = vmatmul.mubr.msk.bf16.vlgmr.msra.gmra.mrb[136].mxu0 %vm637_vm7, %v3678_v24 }
0x15f2   : > { %4515 = vmatmul.mubr.msk.bf16.vlgmr.msra.gmra.mrb[136].mxu1 %vm637_vm7, %v3678_v24  ;;  %3844 = vmatprep.mubr.bf16.mxu0 %v5901_v13 }
0x15f3   : > { %3885 = vmatprep.mubr.bf16.mxu1 %v5901_v13 }
0x16c4   : > { %v3736_v20 = vpop.f32.mrb[136].mxu0 }
0x16c5   : > { %v3737_v35 = vadd.f32 %v3736_v20, %v3679_v50  ;;  %v3777_v1 = vpop.f32.mrb[136].mxu1  ;;  %v3738_v8 = vpop.f32.mrb[137].mxu0 }
0x16c6   : > { %v3778_v31 = vadd.f32 %v3777_v1, %v3681_v27  ;;  %v3739_v49 = vadd.f32 %v3738_v8, %v3680_v5  ;;  %v3779_v33 = vpop.f32.mrb[137].mxu1  ;;  %v3740_v9 = vpop.f32.mrb[138].mxu0  ;;  %v5969_v5 = vld [vmem:[#allocation16_spill] sm:$0xff] }
0x16c7   : > { %4683 = vtanh.f32 %v3737_v35  ;;  %v3780_v41 = vadd.f32 %v3779_v33, %v3682_v32  ;;  %v3781_v29 = vpop.f32.mrb[138].mxu1  ;;  %v3741_v16 = vpop.f32.mrb[139].mxu0  ;;  %v5970_v32 = vld [vmem:[#allocation17_spill] sm:$0xff]  ;;  %v5972_v33 = vld [vmem:[#allocation19_spill] sm:$0xff] }
0x16c8   : > { %4685 = vtanh.f32 %v3778_v31  ;;  %v3782_v62 = vpop.f32.mrb[139].mxu1  ;;  %v5971_v31 = vld [vmem:[#allocation18_spill] sm:$0xff] }
0x16c9   : > { %4687 = vtanh.f32 %v3739_v49  ;;  %v5973_v62 = vld [vmem:[#allocation20_spill] sm:$0xff] }
0x16ca   : > { %4689 = vtanh.f32 %v3780_v41 }
0x16d1   : > { %v4684_v15 = vpop.eup %4683 }
0x16d2   : > { %v4686_v51 = vpop.eup %4685  ;;  %v3793_v38 = vpack.c.bf16 %v4684_v15, %v4684_v15 }
0x16d3   : > { %v4688_v42 = vpop.eup %4687  ;;  %v3795_v58 = vpack.c.bf16 %v4686_v51, %v4686_v51 }
0x16d4   : > { %v4690_v22 = vpop.eup %4689  ;;  %v3794_v63 = vpack.c.bf16 %v4688_v42, %v4688_v42  ;;  %v3801_v10 = vand.u32 %v3793_v38, %v5064_v2 }
0x16d5   : > { %v3796_v46 = vpack.c.bf16 %v4690_v22, %v4690_v22  ;;  %v3807_v48 = vand.u32 %v3795_v58, %v5064_v2 }
0x16d6   : > { %v3804_v18 = vand.u32 %v3794_v63, %v5064_v2 }
0x16d7   : > { %v3810_v59 = vand.u32 %v3796_v46, %v5064_v2 }
0x16d8   : > { %3812 = vmatprep.subr.bf16.mxu0 %v3804_v18 }
0x16d9   : > { %3853 = vmatprep.subr.bf16.mxu1 %v3810_v59  ;;  %3813 = vmatpush1.bf16.msra.mxu0 %v3801_v10 }
0x16da   : > { %3854 = vmatpush1.bf16.msra.mxu1 %v3807_v48  ;;  %v4633_v48 = vld [vmem:[#allocation5 + $0x60] sm:$0xff]  }
0x16dc   : > { %4516 = vmatmul.mubr.msk.bf16.vlgmr.msra.gmra.mrb[140].mxu0 %vm751_vm8, %v3788_v47 }
0x16dd   : > { %4517 = vmatmul.mubr.msk.bf16.vlgmr.msra.gmra.mrb[140].mxu1 %vm751_vm8, %v3788_v47  ;;  %3964 = vmatprep.mubr.bf16.mxu0 %v5901_v13  ;;  %v4634_v47 = vld [vmem:[#allocation5 + $0x68] sm:$0xff]  }
0x16de   : > { %4007 = vmatprep.mubr.bf16.mxu1 %v5901_v13 }
0x17af   : > { %v3846_v28 = vpop.f32.mrb[140].mxu0 }
0x17b0   : > { %v3847_v6 = vadd.f32 %v3846_v28, %v5550_v7  ;;  %v3887_v12 = vpop.f32.mrb[140].mxu1  ;;  %v3848_v25 = vpop.f32.mrb[141].mxu0 }
0x17b1   : > { %v3888_v2 = vadd.f32 %v3887_v12, %v5552_v21  ;;  %v3849_v52 = vadd.f32 %v3848_v25, %v5554_v4  ;;  %v3889_v56 = vpop.f32.mrb[141].mxu1  ;;  %v3850_v17 = vpop.f32.mrb[142].mxu0  ;;  %v4632_v4 = vld [vmem:[#allocation5 + $0x50] sm:$0xff]  }
0x17b2   : > { %v3894_v57 = vmax.f32 %v3847_v6, 0.0  ;;  %v3890_v40 = vadd.f32 %v3889_v56, %v5965_v45  ;;  %v3891_v39 = vpop.f32.mrb[142].mxu1  ;;  %v3851_v11 = vpop.f32.mrb[143].mxu0  ;;  %v5974_v6 = vld [vmem:[#allocation21_spill] sm:$0xff]  ;;  %v5976_v17 = vld [vmem:[#allocation23_spill] sm:$0xff] }
0x17b3   : > { %v3896_v60 = vmax.f32 %v3888_v2, 0.0  ;;  %v3895_v44 = vmax.f32 %v3849_v52, 0.0  ;;  %v3892_v26 = vpop.f32.mrb[143].mxu1  ;;  %v5975_v52 = vld [vmem:[#allocation22_spill] sm:$0xff]  ;;  %v5977_v39 = vld [vmem:[#allocation24_spill] sm:$0xff] }
0x17b4   : > { %v3908_v53 = vpack.c.bf16 %v3894_v57, %v3894_v57  ;;  %v3897_v34 = vmax.f32 %v3890_v40, 0.0 }
0x17b5   : > { %v3910_v14 = vpack.c.bf16 %v3896_v60, %v3896_v60  ;;  %v3909_v7 = vpack.c.bf16 %v3895_v44, %v3895_v44  ;;  %v5978_v60 = vld [vmem:[#allocation25_spill] sm:$0xff] }
0x17b6   : > { %v3911_v19 = vpack.c.bf16 %v3897_v34, %v3897_v34  ;;  %v3921_v61 = vsel %vm641_vm6, %v3908_v53, 0  ;;  %v5979_v34 = vld [vmem:[#allocation26_spill] sm:$0xff] }
0x17b7   : > { %4519 = vmatprep.subr.msk.bf16.mxu0 %vm641_vm6, %v3909_v7  ;;  %v3927_v21 = vsel %vm641_vm6, %v3910_v14, 0 }
0x17b8   : > { %4521 = vmatprep.subr.msk.bf16.mxu1 %vm641_vm6, %v3911_v19  ;;  %3933 = vmatpush1.bf16.msra.mxu0 %v3921_v61 }
0x17b9   : > { %3976 = vmatpush1.bf16.msra.mxu1 %v3927_v21 }
0x17bb   : > { %4520 = vmatmul.mubr.msk.bf16.vlgmr.msra.gmra.mrb[144].mxu0 %vm637_vm7, %v4632_v4 }
0x17bc   : > { %4522 = vmatmul.mubr.msk.bf16.vlgmr.msra.gmra.mrb[144].mxu1 %vm637_vm7, %v4632_v4  ;;  %4098 = vmatprep.mubr.bf16.mxu0 %v5901_v13  ;;  %v5981_v4 = vld [vmem:[#allocation28_spill] sm:$0xff] }
0x17bd   : > { %4151 = vmatprep.mubr.bf16.mxu1 %v5901_v13 }
0x188e   : > { %v3966_v36 = vpop.f32.mrb[144].mxu0 }
0x188f   : > { %v3967_v37 = vadd.f32 %v3966_v36, %v5966_v54  ;;  %v4009_v0 = vpop.f32.mrb[144].mxu1  ;;  %v3968_v3 = vpop.f32.mrb[145].mxu0 }
0x1890   : > { %v4010_v30 = vadd.f32 %v4009_v0, %v5967_v23  ;;  %v3969_v24 = vadd.f32 %v3968_v3, %v5968_v43  ;;  %v4011_v50 = vpop.f32.mrb[145].mxu1  ;;  %v3970_v27 = vpop.f32.mrb[146].mxu0 }
0x1891   : > { %v4012_v20 = vadd.f32 %v4011_v50, %v5969_v5  ;;  %v3971_v35 = vadd.f32 %v3970_v27, %v5970_v32  ;;  %v4013_v1 = vpop.f32.mrb[146].mxu1  ;;  %v3972_v8 = vpop.f32.mrb[147].mxu0  ;;  %v4018_v29 = vmax.f32 %v3967_v37, 0.0 }
0x1892   : > { %v4014_v49 = vadd.f32 %v4013_v1, %v5971_v31  ;;  %v3973_v9 = vadd.f32 %v3972_v8, %v5972_v33  ;;  %v4015_v41 = vpop.f32.mrb[147].mxu1  ;;  %v4020_v51 = vmax.f32 %v4010_v30, 0.0  ;;  %v4019_v42 = vmax.f32 %v3969_v24, 0.0  ;;  %v5983_v8 = vld [vmem:[#allocation30_spill] sm:$0xff] }
0x1893   : > { %v4022_v16 = vmax.f32 %v3971_v35, 0.0  ;;  %v4016_v15 = vadd.f32 %v4015_v41, %v5973_v62  ;;  %v4021_v58 = vmax.f32 %v4012_v20, 0.0  ;;  %v5982_v20 = vld [vmem:[#allocation29_spill] sm:$0xff] }
0x1894   : > { %v4024_v38 = vmax.f32 %v4014_v49, 0.0  ;;  %v4023_v22 = vmax.f32 %v3973_v9, 0.0  ;;  %v5984_v49 = vld [vmem:[#allocation31_spill] sm:$0xff]  ;;  %v5986_v62 = vld [vmem:[#allocation33_spill] sm:$0xff] }
0x1895   : > { %v4046_v63 = vpack.c.bf16 %v4022_v16, %v4018_v29  ;;  %v4025_v46 = vmax.f32 %v4016_v15, 0.0  ;;  %v5985_v29 = vld [vmem:[#allocation32_spill] sm:$0xff] }
0x1896   : > { %v4048_v18 = vpack.c.bf16 %v4024_v38, %v4020_v51  ;;  %v4047_v10 = vpack.c.bf16 %v4023_v22, %v4019_v42  ;;  %v5987_v38 = vld [vmem:[#allocation34_spill] sm:$0xff] }
0x1897   : > { %v4049_v59 = vpack.c.bf16 %v4025_v46, %v4021_v58  ;;  %v5988_v58 = vld [vmem:[#allocation35_spill] sm:$0xff] }
0x1898   : > { %4066 = vmatprep.subr.bf16.mxu0 %v4047_v10 }
0x1899   : > { %4119 = vmatprep.subr.bf16.mxu1 %v4049_v59  ;;  %4067 = vmatpush1.bf16.msra.mxu0 %v4046_v63 }
0x189a   : > { %4120 = vmatpush1.bf16.msra.mxu1 %v4048_v18 }
0x189c   : > { %4525 = vmatmul.mubr.msk.bf16.vlgmr.msra.gmra.mrb[148].mxu0 %vm536_vm5, %v4633_v48 }
0x189d   : > { %4527 = vmatmul.mubr.msk.bf16.vlgmr.msra.gmra.mrb[148].mxu1 %vm536_vm5, %v4633_v48  ;;  %4108 = vmatprep.mubr.bf16.mxu0 %v5901_v13 }
0x189e   : > { %4161 = vmatprep.mubr.bf16.mxu1 %v5901_v13 }
0x18a4   : > { %4526 = vmatmul.mubr.msk.bf16.gmra.mrb[152].mxu0 %vm536_vm5, %v4634_v47 }
0x18a5   : > { %4528 = vmatmul.mubr.msk.bf16.gmra.mrb[152].mxu1 %vm536_vm5, %v4634_v47  ;;  %4236 = vmatprep.mubr.bf16.mxu0 %v5901_v13 }
0x18a6   : > { %4277 = vmatprep.mubr.bf16.mxu1 %v5901_v13  ;;  %v5980_v13 = vld [vmem:[#allocation27_spill] sm:$0xff] }
0x196f   : > { %v4100_v28 = vpop.f32.mrb[148].mxu0 }
0x1970   : > { %v4101_v12 = vadd.f32 %v4100_v28, %v5974_v6  ;;  %v4153_v25 = vpop.f32.mrb[148].mxu1  ;;  %v4102_v2 = vpop.f32.mrb[149].mxu0 }
0x1971   : > { %v4154_v56 = vadd.f32 %v4153_v25, %v5975_v52  ;;  %v4103_v57 = vadd.f32 %v4102_v2, %v5976_v17  ;;  %v4155_v45 = vpop.f32.mrb[149].mxu1  ;;  %v4104_v40 = vpop.f32.mrb[150].mxu0 }
0x1972   : > { %v4156_v11 = vadd.f32 %v4155_v45, %v5977_v39  ;;  %v4105_v44 = vadd.f32 %v4104_v40, %v5978_v60  ;;  %v4157_v26 = vpop.f32.mrb[150].mxu1  ;;  %v4106_v53 = vpop.f32.mrb[151].mxu0  ;;  %v4172_v61 = vmax.f32 %v4101_v12, 0.0  ;;  %v4191_v45 = vld [vmem:[#allocation7 + $0x390] sm:$0x1f] }
0x1973   : > { %v4158_v14 = vadd.f32 %v4157_v26, %v5979_v34  ;;  %v4107_v7 = vadd.f32 %v4106_v53, %v5980_v13  ;;  %v4159_v19 = vpop.f32.mrb[151].mxu1  ;;  %v4174_v54 = vmax.f32 %v4154_v56, 0.0  ;;  %v4173_v37 = vmax.f32 %v4103_v57, 0.0  ;;  %v4188_v57 = vld [vmem:[#allocation5 + $0x70] sm:$0x7] }
0x1974   : > { %v4176_v21 = vmax.f32 %v4105_v44, 0.0  ;;  %v4160_v36 = vadd.f32 %v4159_v19, %v5981_v4  ;;  %v4175_v23 = vmax.f32 %v4156_v11, 0.0  ;;  %v4190_v40 = vld [vmem:[#allocation7 + $0x388] sm:$0x1f]  ;;  %v4192_v11 = vld [vmem:[#allocation7 + $0x398] sm:$0x1f] }
0x1975   : > { %v4178_v0 = vmax.f32 %v4158_v14, 0.0  ;;  %v4177_v3 = vmax.f32 %v4107_v7, 0.0 }
0x1976   : > { %v4193_v30 = vpack.c.bf16 %v4176_v21, %v4172_v61  ;;  %v4179_v43 = vmax.f32 %v4160_v36, 0.0 }
0x1977   : > { %v4195_v24 = vpack.c.bf16 %v4178_v0, %v4174_v54  ;;  %v4194_v50 = vpack.c.bf16 %v4177_v3, %v4173_v37  ;;  %v4110_v27 = vpop.f32.mrb[152].mxu0 }
0x1978   : > { %v4196_v5 = vpack.c.bf16 %v4179_v43, %v4175_v23  ;;  %v4111_v32 = vadd.f32 %v4110_v27, %v5982_v20  ;;  %v4163_v35 = vpop.f32.mrb[152].mxu1  ;;  %v4112_v1 = vpop.f32.mrb[153].mxu0 }
0x1979   : > { %v4164_v31 = vadd.f32 %v4163_v35, %v5983_v8  ;;  %v4113_v33 = vadd.f32 %v4112_v1, %v5984_v49  ;;  %v4165_v9 = vpop.f32.mrb[153].mxu1  ;;  %v4114_v41 = vpop.f32.mrb[154].mxu0  ;;  %4204 = vmatprep.subr.bf16.mxu0 %v4194_v50 }
0x197a   : > { %v4166_v16 = vadd.f32 %v4165_v9, %v5985_v29  ;;  %v4115_v15 = vadd.f32 %v4114_v41, %v5986_v62  ;;  %v4167_v51 = vpop.f32.mrb[154].mxu1  ;;  %4245 = vmatprep.subr.bf16.mxu1 %v4196_v5  ;;  %v4116_v42 = vpop.f32.mrb[155].mxu0  ;;  %4205 = vmatpush1.bf16.msra.mxu0 %v4193_v30  ;;  %v4180_v18 = vmax.f32 %v4111_v32, 0.0 }
0x197b   : > { %v4168_v22 = vadd.f32 %v4167_v51, %v5987_v38  ;;  %v4117_v63 = vadd.f32 %v4116_v42, %v5988_v58  ;;  %v4169_v46 = vpop.f32.mrb[155].mxu1  ;;  %4246 = vmatpush1.bf16.msra.mxu1 %v4195_v24  ;;  %v4182_v48 = vmax.f32 %v4164_v31, 0.0  ;;  %v4181_v47 = vmax.f32 %v4113_v33, 0.0 }
0x197c   : > { %v4184_v10 = vmax.f32 %v4115_v15, 0.0  ;;  %v4170_v59 = vadd.f32 %v4169_v46, %v5644_v55  ;;  %v4183_v12 = vmax.f32 %v4166_v16, 0.0  ;;  %v4189_v55 = vld [vmem:[#allocation7 + $0x380] sm:$0x1f] }
0x197d   : > { %v4186_v28 = vmax.f32 %v4168_v22, 0.0  ;;  %v4185_v6 = vmax.f32 %v4117_v63, 0.0 }
0x197e   : > { %v4197_v25 = vpack.c.bf16 %v4184_v10, %v4180_v18  ;;  %v4187_v2 = vmax.f32 %v4170_v59, 0.0 }
0x197f   : > { %v4199_v52 = vpack.c.bf16 %v4186_v28, %v4182_v48  ;;  %v4198_v56 = vpack.c.bf16 %v4185_v6, %v4181_v47 }
0x1980   : > { %v4200_v17 = vpack.c.bf16 %v4187_v2, %v4183_v12 }
0x1981   : > { %4206 = vmatprep.subr.bf16.mxu0 %v4198_v56 }
0x1982   : > { %4247 = vmatprep.subr.bf16.mxu1 %v4200_v17  ;;  %4207 = vmatpush1.bf16.msra.mxu0 %v4197_v25 }
0x1983   : > { %4248 = vmatpush1.bf16.msra.mxu1 %v4199_v52 }
0x1985   : > { %4529 = vmatmul.mubr.msk.bf16.vlgmr.msra.gmra.mrb[156].mxu0 %vm427_vm4, %v4188_v57 }
0x1986   : > { %4530 = vmatmul.mubr.msk.bf16.vlgmr.msra.gmra.mrb[156].mxu1 %vm427_vm4, %v4188_v57 }
0x1a58   : > { %v4238_v39 = vpop.f32.mrb[156].mxu0 }
0x1a59   : > { %v4239_v60 = vadd.f32 %v4238_v39, %v4189_v55  ;;  %v4279_v44 = vpop.f32.mrb[156].mxu1  ;;  %v4240_v26 = vpop.f32.mrb[157].mxu0 }
0x1a5a   : > { %v4280_v53 = vadd.f32 %v4279_v44, %v4191_v45  ;;  %v4241_v34 = vadd.f32 %v4240_v26, %v4190_v40  ;;  %v4281_v14 = vpop.f32.mrb[157].mxu1  ;;  %v4242_v13 = vpop.f32.mrb[158].mxu0 }
0x1a5b   : > { %4691 = vtanh.f32 %v4239_v60  ;;  %v4282_v7 = vadd.f32 %v4281_v14, %v4192_v11  ;;  %v4283_v19 = vpop.f32.mrb[158].mxu1  ;;  %v4243_v61 = vpop.f32.mrb[159].mxu0 }
0x1a5c   : > { %4693 = vtanh.f32 %v4280_v53  ;;  %v4284_v21 = vpop.f32.mrb[159].mxu1 }
0x1a5d   : > { %4695 = vtanh.f32 %v4241_v34 }
0x1a5e   : > { %4697 = vtanh.f32 %v4282_v7 }
0x1a65   : > { %v4692_v4 = vpop.eup %4691 }
0x1a66   : > { %v4694_v36 = vpop.eup %4693  ;;  %4290 = vst [vmem:[%s5324_s18 + $0x60] sm:$0x1f] %v4692_v4 }
0x1a67   : > { %v4696_v54 = vpop.eup %4695  ;;  %4292 = vst [vmem:[%s5324_s18 + $0x70] sm:$0x1f] %v4694_v36 }
0x1a68   : > { %v4698_v37 = vpop.eup %4697  ;;  %4291 = vst [vmem:[%s5324_s18 + $0x68] sm:$0x1f] %v4696_v54 }
0x1a69   : > { %4293 = vst [vmem:[%s5324_s18 + $0x78] sm:$0x1f] %v4698_v37 }
0x1a6a   : > { %4798 = shalt.err (!%p4795_p7)
}
0x1a6b   : > { %s4799_s23 = scalar_lea.hbm %s5779_s22, 2048  ;;  %s4803_s17 = scalar_lea.hbm %s5827_s3, 8192 }
0x1a6c   : > { %p4800_p9 = scmp.ne.s32.totalorder %s5779_s22, %s4799_s23  ;;  %p4804_p0 = scmp.lt.u32.totalorder %s5779_s22, %s5827_s3 }
0x1a6d   : > { %p4805_p10 = scmp.lt.u32.totalorder %s4803_s17, %s4799_s23  ;;  %p4807_p1 = scmp.lt.u32.totalorder %s4799_s23, %s5779_s22 }
0x1a6e   : > { %p4801_p12 = pnand %p4800_p9, %p5002_p6 }
0x1a6f   : > { %p4806_p11 = por %p4805_p10, %p4804_p0 }
0x1a70   : > { %p4802_p5 = pneg %p4801_p12 }
0x1a71   : > { %p4808_p2 = por %p4807_p1, %p4806_p11 }
0x1a73   : > { %p4809_p4 = pnand %p4808_p2, %p4802_p5 }
0x1a75   : > { %4812 = shalt.err (!%p4809_p4)
}
0x1a76   : > { %4548 = dma.vmem_to_hbm [thread:$0]  (%p5002_p6), %s5781_s24, 2048, %s5779_s22, %s4295_s16  }
0x1a77 PF: > { %p4570_p8 = scmp.ge.s32.totalorder %s4855_s15, 2  ;;  %s4321_s29 = sand.u32 1, %s4843_s12  }
0x1a78   : > { %p5989_p13 = scmp.ne.s32.totalorder %s5882_s19, 0  ;;  %s4322_s30 = scalar_lea.sflag [#allocation4], %s4321_s29 }
0x1a7a   : > { %p4562_p3 = pnand %p4570_p8, %p5989_p13 }
0x1a7c   : > { %4838 = dma.done.wait (!%p4562_p3), %s4322_s30, 2048  }
0x1a7d   : > { %4840 = vsyncadd (!%p4562_p3), %s4322_s30, 4294965248  ;;  %p17_p7 = scmp.ge.s32.totalorder %s4989_s6, 6   ;;  %s5990_s12 = smov %s4847_s13 }
0x1a7e   : > { %s5991_s13 = smov %s4851_s14  ;;  %s5992_s14 = smov %s4998_s9 }
0x1a7f   : > { %s5993_s15 = smov %s4989_s6  ;;  %19 = sbr.rel (!%p17_p7) target bundleno = 6 (0x6), region = 99 }
0x1a86   :  { %4327 = vsyncpa [#allocation3], 1 }
0x1a87   :  { %4329 = vsyncpa [#allocation3 + $0x1], 1 }
0x1a88   :  { %4330 = vsyncpa [#allocation6], 1 }
0x1a89   :  { %4331 = vsyncpa [#allocation4], 1 }
0x1a8a   :  { %4333 = vsyncpa [#allocation4 + $0x1], 1 }

</bundles_post_ra>
